<compile_context>
chip_gen: v6e
topology: v6e:2x2x1
jax: 0.10.0
libtpu: 0.0.40
codegen_flags: <defaults>
</compile_context>

<pallas_src>
import functools

import jax
import jax.numpy as jnp
import numpy as np
from jax.experimental import pallas as pl
from jax.experimental.pallas import tpu as pltpu


def _silu(x):
    return x * jax.nn.sigmoid(x)


# ----------------------------- Pallas kernel ------------------------------- #
def pseudo_update_kernel(
    s_ref,      # [tn, F]      scalar features (row tile)
    v_ref,      # [3, tn, F]   vector features, lane-dense components
    wuv_ref,    # [F, 2F]      concat(Wu, Wv)
    w1a_ref,    # [F, F]       first-MLP weight, vec_norm half
    w1b_ref,    # [F, F]       first-MLP weight, v_v_norm half
    b1_ref,     # [1, F]
    w2_ref,     # [F, 3F]      second-MLP weight
    b2_ref,     # [1, 3F]
    ds_ref,     # [tn, F]      delta_s output
    dv_ref,     # [3, tn, F]   delta_v output (lane-dense components)
    *, feat_dim,
):
    F = feat_dim
    s = s_ref[...]                                   # [tn, F]
    v = v_ref[...]                                   # [3, tn, F]
    tn = s.shape[0]

    # u_mat / v_mat: one fused MXU matmul over the stacked [3*tn, F] LHS.
    vflat = v.reshape(3 * tn, F)
    uv = jnp.dot(vflat, wuv_ref[...], preferred_element_type=jnp.float32)  # [3tn, 2F]
    u3 = uv[:, :F].reshape(3, tn, F)                 # u_v components
    w3 = uv[:, F:].reshape(3, tn, F)                 # v_v components
    ux, uy, uz = u3[0], u3[1], u3[2]
    wx, wy, wz = w3[0], w3[1], w3[2]
    vx, vy, vz = v[0], v[1], v[2]

    # norms: epsilon is added per component before the sum (matches torch).
    v_v_norm = jnp.sqrt(wx * wx + wy * wy + wz * wz + 3e-10)
    sx, sy, sz = s * vx, s * vy, s * vz
    vec_norm = jnp.sqrt(sx * sx + sy * sy + sz * sz + 3e-10)

    # s_dense layer 1: cat([vec_norm, v_v_norm]) @ W1 + b1 done with split
    # weights so no [tn, 2F] concat buffer is ever built in VMEM.
    h = (jnp.dot(vec_norm, w1a_ref[...], preferred_element_type=jnp.float32)
         + jnp.dot(v_v_norm, w1b_ref[...], preferred_element_type=jnp.float32)
         + b1_ref[...])
    h = _silu(h)

    # s_dense layer 2: one lane-dense [tn, 3F] matmul, then static splits.
    out = jnp.dot(h, w2_ref[...], preferred_element_type=jnp.float32) + b2_ref[...]
    a_vv = out[:, 0 * F:1 * F]        # split[:, 0, :]
    sp1 = out[:, 1 * F:2 * F]         # split[:, 1, :]
    sp2 = out[:, 2 * F:3 * F]         # split[:, 2, :]

    inner = ux * wx + uy * wy + uz * wz
    ds_ref[...] = inner * (sp1 * s) + sp2 * s

    dv_ref[0] = ux * a_vv
    dv_ref[1] = uy * a_vv
    dv_ref[2] = uz * a_vv


# -------------------------------- Wrapper ----------------------------------- #
def pseudo_update_block(s_i, v_i, params, *, tile_n=256):
    """s_i: [N, F] f32, v_i: [N, F, 3] f32 -> (delta_s [N, F], delta_v [N, F, 3])."""
    N, F = s_i.shape
    assert v_i.shape == (N, F, 3)

    # Lane-dense vector layout: [3, N, F] (feature axis on the 128-lane dim).
    v3 = jnp.transpose(v_i, (2, 0, 1))

    tn = max(8, (min(tile_n, N) // 8) * 8)
    n_pad = pl.cdiv(N, tn) * tn
    if n_pad != N:
        s_p = jnp.pad(s_i, ((0, n_pad - N), (0, 0)))
        v_p = jnp.pad(v3, ((0, 0), (0, n_pad - N), (0, 0)))
    else:
        s_p, v_p = s_i, v3

    # Weight prep (done once, outside the grid loop).
    wuv = jnp.concatenate([params["wu"], params["wv"]], axis=1)   # [F, 2F]
    w1a = params["w1"][:F]                                        # [F, F]
    w1b = params["w1"][F:]                                        # [F, F]

    grid = (n_pad // tn,)
    row = lambda i: (i, 0)
    row3 = lambda i: (0, i, 0)
    pinned = lambda i: (0, 0)

    kernel = functools.partial(pseudo_update_kernel, feat_dim=F)
    ds_p, dv_p = pl.pallas_call(
        kernel,
        grid=grid,
        in_specs=[
            pl.BlockSpec((tn, F), row),            # s_i row tile
            pl.BlockSpec((3, tn, F), row3),        # v_i row tile (lane-dense)
            pl.BlockSpec((F, 2 * F), pinned),      # Wu|Wv
            pl.BlockSpec((F, F), pinned),          # W1a
            pl.BlockSpec((F, F), pinned),          # W1b
            pl.BlockSpec((1, F), pinned),          # b1
            pl.BlockSpec((F, 3 * F), pinned),      # W2
            pl.BlockSpec((1, 3 * F), pinned),      # b2
        ],
        out_specs=(
            pl.BlockSpec((tn, F), row),
            pl.BlockSpec((3, tn, F), row3),
        ),
        out_shape=(
            jax.ShapeDtypeStruct((n_pad, F), jnp.float32),
            jax.ShapeDtypeStruct((3, n_pad, F), jnp.float32),
        ),
        compiler_params=pltpu.CompilerParams(
            dimension_semantics=("parallel",),     # row tiles split across TCs
            vmem_limit_bytes=32 * 1024 * 1024,
        ),
    )(s_p, v_p, wuv, w1a, w1b, params["b1"], params["w2"], params["b2"])

    ds = ds_p[:N]
    dv = jnp.transpose(dv_p[:, :N, :], (1, 2, 0))  # back to PyTorch [N, F, 3]
    return ds, dv


# --------------------------- pure-JAX reference ----------------------------- #
def reference(s_i, v_i, params):
    N, F = s_i.shape
    wu, wv = params["wu"], params["wv"]
    w1, b1 = params["w1"], params["b1"]
    w2, b2 = params["w2"], params["b2"]

    v_t = jnp.transpose(v_i, (0, 2, 1)).reshape(-1, F)             # [3N, F]
    u_v = jnp.transpose((v_t @ wu).reshape(N, 3, F), (0, 2, 1))    # [N, F, 3]
    v_v = jnp.transpose((v_t @ wv).reshape(N, 3, F), (0, 2, 1))    # [N, F, 3]
    v_v_norm = jnp.sqrt(jnp.sum(v_v ** 2 + 1e-10, axis=-1))
    vector = s_i[..., None] * v_i
    vector_norm = jnp.sqrt(jnp.sum(vector ** 2 + 1e-10, axis=-1))
    s_stack = jnp.concatenate([vector_norm, v_v_norm], axis=-1)    # [N, 2F]
    h = _silu(s_stack @ w1 + b1)
    split = (h @ w2 + b2).reshape(N, 3, F)
    a_vv = split[:, 0, :][..., None]
    delta_v = u_v * a_vv
    a_sv = split[:, 1, :] * s_i
    a_ss = split[:, 2, :] * s_i
    inner = jnp.sum(u_v * v_v, axis=-1)
    delta_s = inner * a_sv + a_ss
    return delta_s, delta_v


if __name__ == "__main__":
    N, F = 1024, 128   # grid of 4 row tiles at tile_n=256; feature axis is lane-dense

    key = jax.random.PRNGKey(0)
    ks = jax.random.split(key, 6)
    s_i = jax.random.normal(ks[0], (N, F), jnp.float32)
    v_i = jax.random.normal(ks[1], (N, F, 3), jnp.float32)

    # Weights stored in JAX [in, out] convention (transpose of nn.Linear.weight).
    params = {
        "wu": 0.1 * jax.random.normal(ks[2], (F, F), jnp.float32),
        "wv": 0.1 * jax.random.normal(ks[3], (F, F), jnp.float32),
        "w1": 0.1 * jax.random.normal(ks[4], (2 * F, F), jnp.float32),
        "b1": 0.01 * jnp.ones((1, F), jnp.float32),
        "w2": 0.1 * jax.random.normal(ks[5], (F, 3 * F), jnp.float32),
        "b2": 0.01 * jnp.ones((1, 3 * F), jnp.float32),
    }

    ds, dv = pseudo_update_block(s_i, v_i, params, tile_n=256)
    jax.block_until_ready((ds, dv))

    ds_ref, dv_ref = reference(s_i, v_i, params)
    np.testing.assert_allclose(np.asarray(ds), np.asarray(ds_ref),
                               rtol=1e-3, atol=1e-3)
    np.testing.assert_allclose(np.asarray(dv), np.asarray(dv_ref),
                               rtol=1e-3, atol=1e-3)

    print("KERNEL_OK")
</pallas_src>

<mosaic_0001>
module attributes {stable_mosaic.version = 11 : i64} {
  func.func @pseudo_update_kernel(%arg0: i32, %arg1: memref<256x128xf32, #tpu.memory_space<vmem>>, %arg2: memref<3x256x128xf32, #tpu.memory_space<vmem>>, %arg3: memref<128x256xf32, #tpu.memory_space<vmem>>, %arg4: memref<128x128xf32, #tpu.memory_space<vmem>>, %arg5: memref<128x128xf32, #tpu.memory_space<vmem>>, %arg6: memref<1x128xf32, #tpu.memory_space<vmem>>, %arg7: memref<128x384xf32, #tpu.memory_space<vmem>>, %arg8: memref<1x384xf32, #tpu.memory_space<vmem>>, %arg9: memref<256x128xf32, #tpu.memory_space<vmem>>, %arg10: memref<3x256x128xf32, #tpu.memory_space<vmem>>) attributes {dimension_semantics = [#tpu.dimension_semantics<parallel>], iteration_bounds = array<i64: 4>, scalar_prefetch = 0 : i64, scratch_operands = 0 : i64, tpu.core_type = #tpu.core_type<tc>, window_params = [{transform_indices = @transform_0, window_bounds = array<i64: 256, 128>}, {transform_indices = @transform_1, window_bounds = array<i64: 3, 256, 128>}, {pipeline_mode = #tpu.pipeline_mode<synchronous>, transform_indices = @transform_2, window_bounds = array<i64: 128, 256>}, {pipeline_mode = #tpu.pipeline_mode<synchronous>, transform_indices = @transform_3, window_bounds = array<i64: 128, 128>}, {pipeline_mode = #tpu.pipeline_mode<synchronous>, transform_indices = @transform_4, window_bounds = array<i64: 128, 128>}, {pipeline_mode = #tpu.pipeline_mode<synchronous>, transform_indices = @transform_5, window_bounds = array<i64: 1, 128>}, {pipeline_mode = #tpu.pipeline_mode<synchronous>, transform_indices = @transform_6, window_bounds = array<i64: 128, 384>}, {pipeline_mode = #tpu.pipeline_mode<synchronous>, transform_indices = @transform_7, window_bounds = array<i64: 1, 384>}, {transform_indices = @transform_8, window_bounds = array<i64: 256, 128>}, {transform_indices = @transform_9, window_bounds = array<i64: 3, 256, 128>}]} {
    %c0 = arith.constant 0 : index
    %c0_0 = arith.constant 0 : index
    %0 = vector.load %arg1[%c0, %c0_0] : memref<256x128xf32, #tpu.memory_space<vmem>>, vector<256x128xf32>
    %c0_1 = arith.constant 0 : index
    %c0_2 = arith.constant 0 : index
    %c0_3 = arith.constant 0 : index
    %1 = vector.load %arg2[%c0_1, %c0_2, %c0_3] : memref<3x256x128xf32, #tpu.memory_space<vmem>>, vector<3x256x128xf32>
    %2 = vector.shape_cast %1 : vector<3x256x128xf32> to vector<768x128xf32>
    %c0_4 = arith.constant 0 : index
    %c0_5 = arith.constant 0 : index
    %3 = vector.load %arg3[%c0_4, %c0_5] : memref<128x256xf32, #tpu.memory_space<vmem>>, vector<128x256xf32>
    %cst = arith.constant dense<0.000000e+00> : vector<768x256xf32>
    %4 = tpu.matmul %2, %3, %cst {dimension_numbers = #tpu.dot_dimension_numbers<[1], [0], [0], [1], [0, 0, 1, 1], [], []>} : vector<768x128xf32>, vector<128x256xf32>, vector<768x256xf32> -> vector<768x256xf32>
    %5 = vector.extract_strided_slice %4 {offsets = [0, 0], sizes = [768, 128], strides = [1, 1]} : vector<768x256xf32> to vector<768x128xf32>
    %6 = vector.shape_cast %5 : vector<768x128xf32> to vector<3x256x128xf32>
    %7 = vector.extract_strided_slice %4 {offsets = [0, 128], sizes = [768, 128], strides = [1, 1]} : vector<768x256xf32> to vector<768x128xf32>
    %8 = vector.shape_cast %7 : vector<768x128xf32> to vector<3x256x128xf32>
    %9 = vector.extract_strided_slice %6 {offsets = [0, 0, 0], sizes = [1, 256, 128], strides = [1, 1, 1]} : vector<3x256x128xf32> to vector<1x256x128xf32>
    %10 = vector.shape_cast %9 : vector<1x256x128xf32> to vector<256x128xf32>
    %11 = vector.extract_strided_slice %6 {offsets = [1, 0, 0], sizes = [1, 256, 128], strides = [1, 1, 1]} : vector<3x256x128xf32> to vector<1x256x128xf32>
    %12 = vector.shape_cast %11 : vector<1x256x128xf32> to vector<256x128xf32>
    %13 = vector.extract_strided_slice %6 {offsets = [2, 0, 0], sizes = [1, 256, 128], strides = [1, 1, 1]} : vector<3x256x128xf32> to vector<1x256x128xf32>
    %14 = vector.shape_cast %13 : vector<1x256x128xf32> to vector<256x128xf32>
    %15 = vector.extract_strided_slice %8 {offsets = [0, 0, 0], sizes = [1, 256, 128], strides = [1, 1, 1]} : vector<3x256x128xf32> to vector<1x256x128xf32>
    %16 = vector.shape_cast %15 : vector<1x256x128xf32> to vector<256x128xf32>
    %17 = vector.extract_strided_slice %8 {offsets = [1, 0, 0], sizes = [1, 256, 128], strides = [1, 1, 1]} : vector<3x256x128xf32> to vector<1x256x128xf32>
    %18 = vector.shape_cast %17 : vector<1x256x128xf32> to vector<256x128xf32>
    %19 = vector.extract_strided_slice %8 {offsets = [2, 0, 0], sizes = [1, 256, 128], strides = [1, 1, 1]} : vector<3x256x128xf32> to vector<1x256x128xf32>
    %20 = vector.shape_cast %19 : vector<1x256x128xf32> to vector<256x128xf32>
    %21 = vector.extract_strided_slice %1 {offsets = [0, 0, 0], sizes = [1, 256, 128], strides = [1, 1, 1]} : vector<3x256x128xf32> to vector<1x256x128xf32>
    %22 = vector.shape_cast %21 : vector<1x256x128xf32> to vector<256x128xf32>
    %23 = vector.extract_strided_slice %1 {offsets = [1, 0, 0], sizes = [1, 256, 128], strides = [1, 1, 1]} : vector<3x256x128xf32> to vector<1x256x128xf32>
    %24 = vector.shape_cast %23 : vector<1x256x128xf32> to vector<256x128xf32>
    %25 = vector.extract_strided_slice %1 {offsets = [2, 0, 0], sizes = [1, 256, 128], strides = [1, 1, 1]} : vector<3x256x128xf32> to vector<1x256x128xf32>
    %26 = vector.shape_cast %25 : vector<1x256x128xf32> to vector<256x128xf32>
    %27 = arith.mulf %16, %16 : vector<256x128xf32>
    %28 = arith.mulf %18, %18 : vector<256x128xf32>
    %29 = arith.addf %27, %28 : vector<256x128xf32>
    %30 = arith.mulf %20, %20 : vector<256x128xf32>
    %31 = arith.addf %29, %30 : vector<256x128xf32>
    %cst_6 = arith.constant 3.000000e-10 : f32
    %32 = vector.broadcast %cst_6 : f32 to vector<256x128xf32>
    %33 = arith.addf %31, %32 : vector<256x128xf32>
    %34 = math.sqrt %33 : vector<256x128xf32>
    %35 = arith.mulf %0, %22 : vector<256x128xf32>
    %36 = arith.mulf %0, %24 : vector<256x128xf32>
    %37 = arith.mulf %0, %26 : vector<256x128xf32>
    %38 = arith.mulf %35, %35 : vector<256x128xf32>
    %39 = arith.mulf %36, %36 : vector<256x128xf32>
    %40 = arith.addf %38, %39 : vector<256x128xf32>
    %41 = arith.mulf %37, %37 : vector<256x128xf32>
    %42 = arith.addf %40, %41 : vector<256x128xf32>
    %cst_7 = arith.constant 3.000000e-10 : f32
    %43 = vector.broadcast %cst_7 : f32 to vector<256x128xf32>
    %44 = arith.addf %42, %43 : vector<256x128xf32>
    %45 = math.sqrt %44 : vector<256x128xf32>
    %c0_8 = arith.constant 0 : index
    %c0_9 = arith.constant 0 : index
    %46 = vector.load %arg4[%c0_8, %c0_9] : memref<128x128xf32, #tpu.memory_space<vmem>>, vector<128x128xf32>
    %cst_10 = arith.constant dense<0.000000e+00> : vector<256x128xf32>
    %47 = tpu.matmul %45, %46, %cst_10 {dimension_numbers = #tpu.dot_dimension_numbers<[1], [0], [0], [1], [0, 0, 1, 1], [], []>} : vector<256x128xf32>, vector<128x128xf32>, vector<256x128xf32> -> vector<256x128xf32>
    %c0_11 = arith.constant 0 : index
    %c0_12 = arith.constant 0 : index
    %48 = vector.load %arg5[%c0_11, %c0_12] : memref<128x128xf32, #tpu.memory_space<vmem>>, vector<128x128xf32>
    %cst_13 = arith.constant dense<0.000000e+00> : vector<256x128xf32>
    %49 = tpu.matmul %34, %48, %cst_13 {dimension_numbers = #tpu.dot_dimension_numbers<[1], [0], [0], [1], [0, 0, 1, 1], [], []>} : vector<256x128xf32>, vector<128x128xf32>, vector<256x128xf32> -> vector<256x128xf32>
    %50 = arith.addf %47, %49 : vector<256x128xf32>
    %c0_14 = arith.constant 0 : index
    %c0_15 = arith.constant 0 : index
    %51 = vector.load %arg6[%c0_14, %c0_15] : memref<1x128xf32, #tpu.memory_space<vmem>>, vector<1x128xf32>
    %52 = vector.broadcast %51 : vector<1x128xf32> to vector<256x128xf32>
    %53 = arith.addf %50, %52 : vector<256x128xf32>
    %54 = arith.negf %53 : vector<256x128xf32>
    %55 = math.exp %54 : vector<256x128xf32>
    %cst_16 = arith.constant 1.000000e+00 : f32
    %56 = vector.broadcast %cst_16 : f32 to vector<256x128xf32>
    %57 = arith.addf %56, %55 : vector<256x128xf32>
    %58 = arith.divf %56, %57 : vector<256x128xf32>
    %59 = arith.mulf %53, %58 : vector<256x128xf32>
    %c0_17 = arith.constant 0 : index
    %c0_18 = arith.constant 0 : index
    %60 = vector.load %arg7[%c0_17, %c0_18] : memref<128x384xf32, #tpu.memory_space<vmem>>, vector<128x384xf32>
    %cst_19 = arith.constant dense<0.000000e+00> : vector<256x384xf32>
    %61 = tpu.matmul %59, %60, %cst_19 {dimension_numbers = #tpu.dot_dimension_numbers<[1], [0], [0], [1], [0, 0, 1, 1], [], []>} : vector<256x128xf32>, vector<128x384xf32>, vector<256x384xf32> -> vector<256x384xf32>
    %c0_20 = arith.constant 0 : index
    %c0_21 = arith.constant 0 : index
    %62 = vector.load %arg8[%c0_20, %c0_21] : memref<1x384xf32, #tpu.memory_space<vmem>>, vector<1x384xf32>
    %63 = vector.broadcast %62 : vector<1x384xf32> to vector<256x384xf32>
    %64 = arith.addf %61, %63 : vector<256x384xf32>
    %65 = vector.extract_strided_slice %64 {offsets = [0, 0], sizes = [256, 128], strides = [1, 1]} : vector<256x384xf32> to vector<256x128xf32>
    %66 = vector.extract_strided_slice %64 {offsets = [0, 128], sizes = [256, 128], strides = [1, 1]} : vector<256x384xf32> to vector<256x128xf32>
    %67 = vector.extract_strided_slice %64 {offsets = [0, 256], sizes = [256, 128], strides = [1, 1]} : vector<256x384xf32> to vector<256x128xf32>
    %68 = arith.mulf %10, %16 : vector<256x128xf32>
    %69 = arith.mulf %12, %18 : vector<256x128xf32>
    %70 = arith.addf %68, %69 : vector<256x128xf32>
    %71 = arith.mulf %14, %20 : vector<256x128xf32>
    %72 = arith.addf %70, %71 : vector<256x128xf32>
    %73 = arith.mulf %66, %0 : vector<256x128xf32>
    %74 = arith.mulf %72, %73 : vector<256x128xf32>
    %75 = arith.mulf %67, %0 : vector<256x128xf32>
    %76 = arith.addf %74, %75 : vector<256x128xf32>
    %c0_22 = arith.constant 0 : index
    %c0_23 = arith.constant 0 : index
    %77 = vector.load %arg9[%c0_22, %c0_23] : memref<256x128xf32, #tpu.memory_space<vmem>>, vector<256x128xf32>
    tpu.vector_store %arg9[%c0_22, %c0_23], %76 {strides = array<i32>} : memref<256x128xf32, #tpu.memory_space<vmem>>, vector<256x128xf32>,
    %78 = arith.mulf %10, %65 : vector<256x128xf32>
    %c0_24 = arith.constant 0 : index
    %c0_25 = arith.constant 0 : index
    %c0_26 = arith.constant 0 : index
    %79 = vector.load %arg10[%c0_24, %c0_25, %c0_26] : memref<3x256x128xf32, #tpu.memory_space<vmem>>, vector<1x256x128xf32>
    %80 = vector.shape_cast %79 : vector<1x256x128xf32> to vector<256x128xf32>
    %81 = vector.shape_cast %78 : vector<256x128xf32> to vector<1x256x128xf32>
    tpu.vector_store %arg10[%c0_24, %c0_25, %c0_26], %81 {strides = array<i32>} : memref<3x256x128xf32, #tpu.memory_space<vmem>>, vector<1x256x128xf32>,
    %82 = arith.mulf %12, %65 : vector<256x128xf32>
    %c1 = arith.constant 1 : index
    %c0_27 = arith.constant 0 : index
    %c0_28 = arith.constant 0 : index
    %83 = vector.load %arg10[%c1, %c0_27, %c0_28] : memref<3x256x128xf32, #tpu.memory_space<vmem>>, vector<1x256x128xf32>
    %84 = vector.shape_cast %83 : vector<1x256x128xf32> to vector<256x128xf32>
    %85 = vector.shape_cast %82 : vector<256x128xf32> to vector<1x256x128xf32>
    tpu.vector_store %arg10[%c1, %c0_27, %c0_28], %85 {strides = array<i32>} : memref<3x256x128xf32, #tpu.memory_space<vmem>>, vector<1x256x128xf32>,
    %86 = arith.mulf %14, %65 : vector<256x128xf32>
    %c2 = arith.constant 2 : index
    %c0_29 = arith.constant 0 : index
    %c0_30 = arith.constant 0 : index
    %87 = vector.load %arg10[%c2, %c0_29, %c0_30] : memref<3x256x128xf32, #tpu.memory_space<vmem>>, vector<1x256x128xf32>
    %88 = vector.shape_cast %87 : vector<1x256x128xf32> to vector<256x128xf32>
    %89 = vector.shape_cast %86 : vector<256x128xf32> to vector<1x256x128xf32>
    tpu.vector_store %arg10[%c2, %c0_29, %c0_30], %89 {strides = array<i32>} : memref<3x256x128xf32, #tpu.memory_space<vmem>>, vector<1x256x128xf32>,
    return
  }
  func.func @transform_0(%arg0: i32) -> (i32, i32) {
    %c0_i32 = arith.constant 0 : i32
    %c0_i32_0 = arith.constant 0 : i32
    return %arg0, %c0_i32 : i32, i32
  }
  func.func @transform_1(%arg0: i32) -> (i32, i32, i32) {
    %c0_i32 = arith.constant 0 : i32
    %c0_i32_0 = arith.constant 0 : i32
    %c0_i32_1 = arith.constant 0 : i32
    return %c0_i32, %arg0, %c0_i32_0 : i32, i32, i32
  }
  func.func @transform_2(%arg0: i32) -> (i32, i32) {
    %c0_i32 = arith.constant 0 : i32
    %c0_i32_0 = arith.constant 0 : i32
    %c0_i32_1 = arith.constant 0 : i32
    return %c0_i32, %c0_i32_0 : i32, i32
  }
  func.func @transform_3(%arg0: i32) -> (i32, i32) {
    %c0_i32 = arith.constant 0 : i32
    %c0_i32_0 = arith.constant 0 : i32
    %c0_i32_1 = arith.constant 0 : i32
    return %c0_i32, %c0_i32_0 : i32, i32
  }
  func.func @transform_4(%arg0: i32) -> (i32, i32) {
    %c0_i32 = arith.constant 0 : i32
    %c0_i32_0 = arith.constant 0 : i32
    %c0_i32_1 = arith.constant 0 : i32
    return %c0_i32, %c0_i32_0 : i32, i32
  }
  func.func @transform_5(%arg0: i32) -> (i32, i32) {
    %c0_i32 = arith.constant 0 : i32
    %c0_i32_0 = arith.constant 0 : i32
    %c0_i32_1 = arith.constant 0 : i32
    return %c0_i32, %c0_i32_0 : i32, i32
  }
  func.func @transform_6(%arg0: i32) -> (i32, i32) {
    %c0_i32 = arith.constant 0 : i32
    %c0_i32_0 = arith.constant 0 : i32
    %c0_i32_1 = arith.constant 0 : i32
    return %c0_i32, %c0_i32_0 : i32, i32
  }
  func.func @transform_7(%arg0: i32) -> (i32, i32) {
    %c0_i32 = arith.constant 0 : i32
    %c0_i32_0 = arith.constant 0 : i32
    %c0_i32_1 = arith.constant 0 : i32
    return %c0_i32, %c0_i32_0 : i32, i32
  }
  func.func @transform_8(%arg0: i32) -> (i32, i32) {
    %c0_i32 = arith.constant 0 : i32
    %c0_i32_0 = arith.constant 0 : i32
    return %arg0, %c0_i32 : i32, i32
  }
  func.func @transform_9(%arg0: i32) -> (i32, i32, i32) {
    %c0_i32 = arith.constant 0 : i32
    %c0_i32_0 = arith.constant 0 : i32
    %c0_i32_1 = arith.constant 0 : i32
    return %c0_i32, %arg0, %c0_i32_0 : i32, i32, i32
  }
}

</mosaic_0001>

<bundles_post_ra>
// kernel: tpu_custom_call.1
= control target key start
LH: loop header
LB: loop body
LE: loop exit
PB: predicated region body
PF: predicated region fallthrough
CT: control target
= control target key end

     0   :  { %s9072_s0 = inlined_call_operand.hbm [shape: f32[1024,128], index: 0, kind: input, shape index: {}]   ;;  %s9073_s1 = inlined_call_operand.hbm [shape: f32[3,1024,128], index: 1, kind: input, shape index: {}]   ;;  %s9074_s2 = inlined_call_operand.hbm [shape: f32[128,256], index: 2, kind: input, shape index: {}]   ;;  %s9075_s3 = inlined_call_operand.hbm [shape: f32[128,128], index: 3, kind: input, shape index: {}]   ;;  %s9076_s4 = inlined_call_operand.hbm [shape: f32[128,128], index: 4, kind: input, shape index: {}]   ;;  %s9077_s5 = inlined_call_operand.hbm [shape: f32[1,128], index: 5, kind: input, shape index: {}]   ;;  %s9078_s6 = inlined_call_operand.hbm [shape: f32[128,384], index: 6, kind: input, shape index: {}]   ;;  %s9079_s7 = inlined_call_operand.hbm [shape: f32[1,384], index: 7, kind: input, shape index: {}]   ;;  %s9080_s8 = inlined_call_operand.hbm [shape: f32[1024,128], index: 8, kind: output, shape index: {0}]   ;;  %s9081_s9 = inlined_call_operand.hbm [shape: f32[3,1024,128], index: 9, kind: output, shape index: {1}]  }
   0x1   :  { %9234 = sst [smem:[#allocation180_spill]] %s9072_s0 }
   0x2   :  { %9235 = sst [smem:[#allocation181_spill]] %s9075_s3 }
   0x3   :  { %15 = vsyncpa [#allocation3], 0 }
   0x4   :  { %17 = vsyncpa [#allocation3 + $0x1], 0 }
   0x5   :  { %18 = vsyncpa [#allocation6], 0 }
   0x6   :  { %20 = vsyncpa [#allocation6 + $0x1], 0 }
   0x7   :  { %21 = vsyncpa [#allocation9], 0 }
   0x8   :  { %22 = vsyncpa [#allocation12], 0 }
   0x9   :  { %23 = vsyncpa [#allocation15], 0 }
   0xa   :  { %24 = vsyncpa [#allocation4], 0 }
   0xb   :  { %26 = vsyncpa [#allocation4 + $0x1], 0 }
   0xc   :  { %27 = vsyncpa [#allocation18], 0 }
   0xd   :  { %29 = vsyncpa [#allocation18 + $0x1], 0  ;;  %s5742_s30 = smov 0   ;;  %s5744_s10 = smov 0  }
   0xe   :  { %s5746_s11 = smov 0   ;;  %s5748_s12 = smov 0  }
   0xf LB: > { %s5763_s13 = sadd.s32 4294967295, %s5658_s12   ;;  %s4292_s14 = sadd.s32 4294967294, %s5658_s12   ;;  %s5658_s12 = sphi %s5748_s12, %s9750_s12   ;;  %s5654_s11 = sphi %s5746_s11, %s9754_s11   ;;  %s5650_s10 = sphi %s5744_s10, %s9753_s10   ;;  %s5646_s30 = sphi %s5742_s30, %s9752_s30  }
  0x10   : > { %s5767_s15 = sadd.s32 1, %s5658_s12   ;;  %s42_s16 = sadd.s32 1, %s5654_s11 }
  0x11   : > { %9236 = sst [smem:[#allocation32_spill]] %s5767_s15  ;;  %s39_s17 = ssub.s32 %s5658_s12, %s5767_s15 }
  0x12   : > { %p49_p0 = scmp.ne.s32.totalorder %s5654_s11, %s5650_s10  ;;  %p40_p1 = scmp.eq.s32.totalorder %s39_s17, 0 }
  0x13   : > { %p50_p2 = scmp.eq.s32.totalorder %s5658_s12, 0  ;;  %p55_p3 = scmp.ne.s32.totalorder %s5650_s10, %s5646_s30 }
  0x14   : > { %p9082_p4 = scmp.eq.s32.totalorder %s5763_s13, 0  ;;  %p231_p7 = scmp.eq.s32.totalorder %s5763_s13, 3 }
  0x15   : > { %s5779_s18 = scalar_select %p40_p1, %s5654_s11, %s42_s16  }
  0x16   : > { %p5781_p5 = por %p50_p2, %p49_p0  ;;  %p5787_p6 = por %p9082_p4, %p55_p3 }
  0x17   : > { %9237 = sst [smem:[#allocation33_spill]] %s5779_s18  ;;  %p237_p8 = scmp.eq.s32.totalorder %s4292_s14, 3 }
  0x18   : > { %s9239_s20 = scalar_select %p5787_p6, 1, 0 }
  0x19   : > { %p4293_p9 = scmp.ge.s32.totalorder %s5658_s12, 1  ;;  %p270_p10 = scmp.lt.s32.totalorder %s5658_s12, 5 }
  0x1a   : > { %p5794_p11 = por %p231_p7, %p49_p0  ;;  %p5798_p12 = por %p237_p8, %p55_p3 }
  0x1b   : > { %p5802_p13 = pnand %p4293_p9, %p270_p10  ;;  %s5660_s24 = smov [#allocation8]  }
  0x1c   : > { %s9240_s21 = scalar_select %p5794_p11, 1, 0 }
  0x1d   : > { %s9241_s22 = scalar_select %p5798_p12, 1, 0 }
  0x1e   : > { %p4888_p1 = pneg %p5802_p13  ;;  %s295_s25 = sshll.u32 %s5660_s24, 4  ;;  %s296_s25 = int_to_ptr.vmem [resolvable:$true] %s295_s25 }
  0x1f   : > { %9242 = sst [smem:[#allocation34_spill]] %s9241_s22  ;;  %s5661_s27 = smov [#allocation11]  }
  0x20   : > { %p5810_p2 = pnand %p4888_p1, %p9082_p4  ;;  %s322_s28 = sshll.u32 %s5661_s27, 4  ;;  %s323_s28 = int_to_ptr.vmem [resolvable:$true] %s322_s28 }
  0x21   : > { %s5399_s14 = scalar_lea.vmem %s296_s25, 2048  ;;  %p5407_p9 = scmp.lt.s32.totalorder %s296_s25, %s296_s25 }
  0x22   : > { %p5816_p0 = pneg %p5810_p2  ;;  %p5400_p3 = scmp.ne.s32.totalorder %s296_s25, %s5399_s14 }
  0x23   : > { %p5408_p10 = scmp.lt.s32.totalorder %s5399_s14, %s5399_s14 }
  0x24   : > { %p5402_p7 = pnand %p5400_p3, %p5816_p0 }
  0x25   : > { %p5409_p1 = por %p5408_p10, %p5407_p9 }
  0x26   : > { %p5403_p8 = pneg %p5402_p7 }
  0x28   : > { %p5410_p4 = pnand %p5409_p1, %p5403_p8 }
  0x2a   : > { %5413 = shalt.err (!%p5410_p4)
}
  0x2b   : > { %s9088_s16 = smov 128   ;;  %s9089_s17 = smov 8  }
  0x2c   : > { %s9246_s3 = sld [smem:[#allocation181_spill]]  ;;  %s5425_s18 = scalar_lea.vmem %s323_s28, 16 }
  0x2d   : > { %p5426_p3 = scmp.ne.s32.totalorder %s323_s28, %s5425_s18  ;;  %s5432_s14 = scalar_lea.vmem %s323_s28, 32 }
  0x2e   : > { %p5433_p8 = scmp.lt.s32.totalorder %s323_s28, %s323_s28  ;;  %p5434_p4 = scmp.lt.s32.totalorder %s5432_s14, %s5425_s18 }
  0x2f   : > { %p5428_p7 = pnand %p5426_p3, %p5816_p0 }
  0x30   : > { %p5435_p9 = por %p5434_p4, %p5433_p8 }
  0x31   : > { %p5429_p12 = pneg %p5428_p7 }
  0x32   : > { %4894 = dma.hbm_to_vmem [thread:$0]  (!%p5810_p2), %s9246_s3, 2048, %s296_s25, [#allocation9], %s9088_s16, %s9088_s16, %s9089_s17  }
  0x33   : > { %p5436_p10 = pnand %p5435_p9, %p5429_p12 }
  0x35   : > { %5439 = shalt.err (!%p5436_p10)
}
  0x36   : > { %4900 = dma.hbm_to_vmem [thread:$0]  (!%p5810_p2), %s9077_s5, 16, %s323_s28, [#allocation12]  }
  0x37   : > { %s5664_s24 = smov [#allocation7]  }
  0x38   : > { %s282_s25 = sshll.u32 %s5664_s24, 4  ;;  %s283_s25 = int_to_ptr.vmem [resolvable:$true] %s282_s25 }
  0x39   : > { %s5451_s27 = scalar_lea.vmem %s283_s25, 4096  ;;  %p5459_p11 = scmp.lt.s32.totalorder %s283_s25, %s283_s25 }
  0x3a   : > { %p5452_p1 = scmp.ne.s32.totalorder %s283_s25, %s5451_s27  ;;  %p5460_p6 = scmp.lt.s32.totalorder %s5451_s27, %s5451_s27 }
  0x3c   : > { %p5454_p3 = pnand %p5452_p1, %p5816_p0  ;;  %p5461_p8 = por %p5460_p6, %p5459_p11 }
  0x3e   : > { %p5455_p7 = pneg %p5454_p3 }
  0x40   : > { %p5462_p12 = pnand %p5461_p8, %p5455_p7 }
  0x42   : > { %5465 = shalt.err (!%p5462_p12)
}
  0x43   : > { %s5665_s18 = smov 256   ;;  %s5666_s14 = smov 16  }
  0x44   : > { %4891 = dma.hbm_to_vmem [thread:$0]  (!%p5810_p2), %s9074_s2, 4096, %s283_s25, [#allocation6], %s5665_s18, %s5665_s18, %s5666_s14  }
  0x45   : > { %s5667_s28 = smov [#allocation10]   ;;  %s5668_s16 = smov [#allocation13]  }
  0x46   : > { %s308_s24 = sshll.u32 %s5667_s28, 4  ;;  %s332_s17 = sshll.u32 %s5668_s16, 4  ;;  %s309_s24 = int_to_ptr.vmem [resolvable:$true] %s308_s24  ;;  %s333_s17 = int_to_ptr.vmem [resolvable:$true] %s332_s17 }
  0x47   : > { %s5477_s3 = scalar_lea.vmem %s309_s24, 2048  ;;  %p5485_p9 = scmp.lt.s32.totalorder %s309_s24, %s309_s24 }
  0x48   : > { %p5478_p4 = scmp.ne.s32.totalorder %s309_s24, %s5477_s3  ;;  %p5486_p10 = scmp.lt.s32.totalorder %s5477_s3, %s5477_s3 }
  0x4a   : > { %p5480_p6 = pnand %p5478_p4, %p5816_p0  ;;  %p5487_p1 = por %p5486_p10, %p5485_p9 }
  0x4c   : > { %p5481_p11 = pneg %p5480_p6 }
  0x4e   : > { %p5488_p3 = pnand %p5487_p1, %p5481_p11 }
  0x50   : > { %5491 = shalt.err (!%p5488_p3)
}
  0x51   : > { %s9247_s27 = smov 8   ;;  %s9248_s25 = smov 128  }
  0x52   : > { %4897 = dma.hbm_to_vmem [thread:$0]  (!%p5810_p2), %s9076_s4, 2048, %s309_s24, [#allocation9], %s9248_s25, %s9248_s25, %s9247_s27  }
  0x53   : > { %s5503_s16 = scalar_lea.vmem %s333_s17, 6144  ;;  %p5511_p4 = scmp.lt.s32.totalorder %s333_s17, %s333_s17 }
  0x54   : > { %p5504_p7 = scmp.ne.s32.totalorder %s333_s17, %s5503_s16  ;;  %p5512_p6 = scmp.lt.s32.totalorder %s5503_s16, %s5503_s16 }
  0x56   : > { %p5506_p8 = pnand %p5504_p7, %p5816_p0  ;;  %p5513_p9 = por %p5512_p6, %p5511_p4 }
  0x58   : > { %p5507_p12 = pneg %p5506_p8 }
  0x5a   : > { %p5514_p11 = pnand %p5513_p9, %p5507_p12 }
  0x5c   : > { %5517 = shalt.err (!%p5514_p11)
}
  0x5d   : > { %s5669_s3 = smov 384   ;;  %s5670_s15 = smov 24  }
  0x5e   : > { %4903 = dma.hbm_to_vmem [thread:$0]  (!%p5810_p2), %s9078_s6, 6144, %s333_s17, [#allocation12], %s5669_s3, %s5669_s3, %s5670_s15  }
  0x5f   : > { %s5671_s24 = smov [#allocation14]  }
  0x60   : > { %s346_s27 = sshll.u32 %s5671_s24, 4  ;;  %s347_s27 = int_to_ptr.vmem [resolvable:$true] %s346_s27 }
  0x61   : > { %s5529_s25 = scalar_lea.vmem %s347_s27, 48  ;;  %s5536_s18 = scalar_lea.vmem %s347_s27, 64 }
  0x62   : > { %p5530_p10 = scmp.ne.s32.totalorder %s347_s27, %s5529_s25  ;;  %p5537_p7 = scmp.lt.s32.totalorder %s347_s27, %s347_s27 }
  0x63   : > { %p5538_p8 = scmp.lt.s32.totalorder %s5536_s18, %s5529_s25 }
  0x64   : > { %p5532_p1 = pnand %p5530_p10, %p5816_p0 }
  0x65   : > { %p5539_p12 = por %p5538_p8, %p5537_p7 }
  0x66   : > { %p5533_p3 = pneg %p5532_p1 }
  0x68   : > { %p5540_p4 = pnand %p5539_p12, %p5533_p3 }
  0x6a   : > { %5543 = shalt.err (!%p5540_p4)
}
  0x6b   : > { %4906 = dma.hbm_to_vmem [thread:$0]  (!%p5810_p2), %s9079_s7, 48, %s347_s27, [#allocation15]  }
  0x6c   : > { %p4300_p6 = scmp.ge.s32.totalorder %s5658_s12, 4 }
  0x6d   : > { %s5870_s29 = sand.u32 (!%p4300_p6), 1, %s5654_s11   ;;  %s4421_s17 = sshll.u32 (!%p4300_p6), %s5658_s12, 12 }
  0x6e   : > { %353 = sbr.rel (%p4300_p6) target bundleno = 153 (0x99), region = 40  ;;  %s4301_s3 = sshll.u32 (!%p4300_p6), %s5870_s29, 8 }
  0x6f   : > { %s9249_s0 = sld [smem:[#allocation180_spill]] (!%p4300_p6)  ;;  %s361_s28 = scalar_lea.vmem (!%p4300_p6), [#allocation2], %s4301_s3 }
  0x70   : > { %s368_s24 = sshll.u32 (!%p4300_p6), %s361_s28, 4  ;;  %s358_s27 = scalar_lea.sflag (!%p4300_p6), [#allocation3], %s5870_s29  ;;  %s5881_s24 = int_to_ptr.vmem [resolvable:$true] %s368_s24 }
  0x75   : > { %s5879_s22 = scalar_lea.hbm %s9249_s0, %s4421_s17  ;;  %s5548_s16 = scalar_lea.hbm %s9249_s0, 16384 }
  0x76   : > { %s5544_s25 = scalar_lea.hbm %s5879_s22, 4096  ;;  %p5549_p11 = scmp.lt.s32.totalorder %s5879_s22, %s9249_s0 }
  0x77   : > { %p5545_p2 = scmp.ne.s32.totalorder %s5879_s22, %s5544_s25  ;;  %p5550_p10 = scmp.lt.s32.totalorder %s5548_s16, %s5544_s25 }
  0x79   : > { %p5546_p0 = pnand %p5545_p2, %p5781_p5  ;;  %p5551_p1 = por %p5550_p10, %p5549_p11 }
  0x7b   : > { %p5547_p9 = pneg %p5546_p0 }
  0x7d   : > { %p5552_p3 = pnand %p5551_p1, %p5547_p9 }
  0x7f   : > { %5555 = shalt.err (!%p5552_p3)
}
  0x80   : > { %s5556_s3 = scalar_lea.vmem %s5881_s24, 4096  ;;  %s5672_s28 = smov [#allocation2]  }
  0x81   : > { %p5557_p7 = scmp.ne.s32.totalorder %s5881_s24, %s5556_s3  ;;  %s5560_s18 = sshll.u32 %s5672_s28, 4  ;;  %s5561_s18 = int_to_ptr.vmem [resolvable:$false] %s5560_s18 }
  0x82   : > { %s5562_s14 = scalar_lea.vmem %s5561_s18, 8192  ;;  %p5563_p4 = scmp.lt.s32.totalorder %s5881_s24, %s5561_s18 }
  0x83   : > { %p5558_p8 = pnand %p5557_p7, %p5781_p5  ;;  %p5564_p6 = scmp.lt.s32.totalorder %s5562_s14, %s5556_s3 }
  0x85   : > { %p5559_p12 = pneg %p5558_p8  ;;  %p5565_p2 = por %p5564_p6, %p5563_p4 }
  0x87   : > { %p5566_p0 = pnand %p5565_p2, %p5559_p12 }
  0x89   : > { %5569 = shalt.err (!%p5566_p0)
}
  0x8a   : > { %s5673_s25 = smov 128   ;;  %s5674_s16 = smov 8  }
  0x8b   : > { %4855 = dma.hbm_to_vmem [thread:$0]  (%p5781_p5), %s5879_s22, 4096, %s5881_s24, %s358_s27, %s5673_s25, %s5673_s25, %s5674_s16  }
  0x8c   : > { %s378_s15 = sand.u32 1, %s5658_s12   ;;  %s4841_s26 = smul.u32 768, %s5870_s29 }
  0x8d   : > { %s4856_s3 = scalar_select %p5781_p5, [#allocation0], [#allocation23] }
  0x8e   : > { %s388_s14 = scalar_lea.hbm %s9073_s1, %s4421_s17  ;;  %s5675_s22 = smov 16384  }
  0x8f   : > { %4857 = sst [smem:[#allocation20]] (%p5781_p5), %s5675_s22  ;;  %s382_s27 = scalar_lea.vmem [#allocation5], %s4841_s26 }
  0x90   : > { %s393_s24 = sld [smem:[%s4856_s3]]   ;;  %s401_s25 = sshll.u32 %s382_s27, 4  ;;  %s402_s25 = int_to_ptr.vmem [resolvable:$true] %s401_s25 }
  0x91   : > { %s5676_s16 = smov 4096   ;;  %s5677_s0 = smov 32  }
  0x92   : > { %4858 = sst [smem:[#allocation20 + $0x1]] (%p5781_p5), %s5676_s16  ;;  %s5678_s29 = smov 128  }
  0x93   : > { %4859 = sst [smem:[#allocation20 + $0x2]] (%p5781_p5), %s5677_s0  ;;  %s5679_s28 = smov 8  }
  0x94   : > { %4860 = sst [smem:[#allocation20 + $0x3]] (%p5781_p5), %s5678_s29  ;;  %s379_s26 = scalar_lea.sflag [#allocation6], %s378_s15 }
  0x95   : > { %4861 = sst [smem:[#allocation20 + $0x4]] (%p5781_p5), %s5678_s29  ;;  %s5680_s18 = smov 131072  }
  0x96   : > { %s4306_s17 = sshll.u32 %s393_s24, 26  ;;  %4862 = sst [smem:[#allocation20 + $0x5]] (%p5781_p5), %s5679_s28 }
  0x97   : > { %s4307_s3 = sadd.s32 134217728, %s4306_s17 }
  0x98   : > { %4863 = dma.general (%p5781_p5), %s388_s14, 12288, %s402_s25, %s379_s26, %s5680_s18, [#allocation20], %s4307_s3, 0  }
  0x99 PF: > { %426 = sbr.rel (%p5802_p13) target bundleno = 1448 (0x5a8), region = 52 }
  0x9e   : > { %s5932_s0 = sand.u32 1, %s5650_s10   ;;  %p9250_p9 = scmp.ne.s32.totalorder %s9239_s20, 0 }
  0x9f   : > { %s4309_s22 = sshll.u32 %s5932_s0, 8  ;;  %s429_s24 = scalar_lea.sflag [#allocation3], %s5932_s0 }
  0xa0   : > { %s5938_s27 = scalar_lea.vmem [#allocation2], %s4309_s22 }
  0xa1   : > { %5613 = dma.done.wait (%p9250_p9), %s429_s24, 4096  }
  0xa2   : > { %5615 = vsyncadd (%p9250_p9), %s429_s24, 4294963200  ;;  %s437_s19 = sand.u32 1, %s5763_s13   ;;  %s4842_s23 = smul.u32 768, %s5932_s0 }
  0xa3   : > { %s438_s15 = scalar_lea.sflag [#allocation6], %s437_s19 }
  0xa4   : > { %s5948_s14 = scalar_lea.vmem [#allocation5], %s4842_s23 }
  0xa5   : > { %5617 = dma.done.wait (%p9250_p9), %s438_s15, 12288  }
  0xa6   : > { %5619 = vsyncadd (%p9250_p9), %s438_s15, 4294955008  ;;  %p9251_p5 = scmp.eq.s32.totalorder %s5763_s13, 0 }
  0xa8   : > { %5621 = dma.done.wait (%p9251_p5), [#allocation6], 4096   ;;  %p9252_p13 = pmov %p9251_p5 }
  0xa9   : > { %p9253_p11 = pmov %p9251_p5 }
  0xaa   : > { %5623 = vsyncadd (%p9252_p13), [#allocation6], 4294963200 }
  0xab   : > { %5625 = dma.done.wait (%p9253_p11), [#allocation9], 4096   ;;  %p9254_p10 = pmov %p9251_p5 }
  0xac   : > { %p9255_p1 = pmov %p9251_p5 }
  0xad   : > { %5627 = vsyncadd (%p9254_p10), [#allocation9], 4294963200 }
  0xae   : > { %5629 = dma.done.wait (%p9255_p1), [#allocation12], 6160   ;;  %p9256_p3 = pmov %p9255_p1 }
  0xaf   : > { %p9257_p7 = pmov %p9255_p1 }
  0xb0   : > { %5631 = vsyncadd (%p9256_p3), [#allocation12], 4294961136 }
  0xb1   : > { %5633 = dma.done.wait (%p9257_p7), [#allocation15], 48   ;;  %p9258_p8 = pmov %p9255_p1 }
  0xb2   : > { %v9102_v0 = vmov 0.0   ;;  %v673_v1 = vld [vmem:[#allocation7 + $0xf8] sm:$0xff]  ;;  %v672_v2 = vld [vmem:[#allocation7 + $0xf0] sm:$0xff]  ;;  %v671_v3 = vld [vmem:[#allocation7 + $0xe8] sm:$0xff]  ;;  %s8375_s20 = scalar_lea.vmem [#allocation17], %s4842_s23  ;;  %s8872_s25 = scalar_lea.vmem [#allocation16], %s4309_s22 }
  0xb3   : > { %5635 = vsyncadd (%p9258_p8), [#allocation15], 4294967248  ;;  %738 = vmatprep.mubr.f32.mxu0 %v9102_v0  ;;  %1266 = vmatprep.mubr.f32.mxu1 %v9102_v0  ;;  %v670_v4 = vld [vmem:[#allocation7 + $0xe0] sm:$0xff]  ;;  %v669_v5 = vld [vmem:[#allocation7 + $0xd8] sm:$0xff]  ;;  %s4423_s16 = sshll.u32 %s5763_s13, 12  ;;  %s4068_s29 = sshll.u32 %s8872_s25, 4  ;;  %s9006_s29 = int_to_ptr.vmem [resolvable:$true] %s4068_s29 }
  0xb4   : > { %674 = vmatprep.subr.mxu0 %v673_v1  ;;  %4809 = vmatprep.subr.mxu1 %v673_v1  ;;  %v668_v6 = vld [vmem:[#allocation7 + $0xd0] sm:$0xff]  ;;  %v667_v7 = vld [vmem:[#allocation7 + $0xc8] sm:$0xff]  ;;  %v666_v8 = vld [vmem:[#allocation7 + $0xc0] sm:$0xff]  ;;  %s9004_s3 = scalar_lea.hbm %s9080_s8, %s4423_s16  ;;  %s4050_s26 = scalar_lea.sflag [#allocation4], %s5932_s0 }
  0xb5   : > { %675 = vmatpush1.msra.mxu0 %v672_v2  ;;  %4825 = vmatpush1.msra.mxu1 %v672_v2  ;;  %v665_v9 = vld [vmem:[#allocation7 + $0xb8] sm:$0xff]  ;;  %v664_v10 = vld [vmem:[#allocation7 + $0xb0] sm:$0xff]  ;;  %v663_v11 = vld [vmem:[#allocation7 + $0xa8] sm:$0xff]  ;;  %s5570_s18 = scalar_lea.vmem %s9006_s29, 4096  ;;  %p9747_p4 = scmp.ne.s32.totalorder %s9240_s21, 0 }
  0xb6   : > { %676 = vmatprep.subr.mxu0 %v671_v3  ;;  %4810 = vmatprep.subr.mxu1 %v671_v3  ;;  %v662_v12 = vld [vmem:[#allocation7 + $0xa0] sm:$0xff]  ;;  %v661_v13 = vld [vmem:[#allocation7 + $0x98] sm:$0xff]  ;;  %v660_v14 = vld [vmem:[#allocation7 + $0x90] sm:$0xff]  ;;  %p5571_p12 = scmp.ne.s32.totalorder %s9006_s29, %s5570_s18  ;;  %s5682_s22 = smov [#allocation16]  }
  0xb7   : > { %677 = vmatpush1.msra.mxu0 %v670_v4  ;;  %4826 = vmatpush1.msra.mxu1 %v670_v4  ;;  %v659_v15 = vld [vmem:[#allocation7 + $0x88] sm:$0xff]  ;;  %v658_v16 = vld [vmem:[#allocation7 + $0x80] sm:$0xff]  ;;  %v657_v17 = vld [vmem:[#allocation7 + $0x78] sm:$0xff]  ;;  %s5574_s24 = sshll.u32 %s5682_s22, 4  ;;  %s5575_s24 = int_to_ptr.vmem [resolvable:$false] %s5574_s24 }
  0xb8   : > { %678 = vmatprep.subr.mxu0 %v669_v5  ;;  %4811 = vmatprep.subr.mxu1 %v669_v5  ;;  %v656_v18 = vld [vmem:[#allocation7 + $0x70] sm:$0xff]  ;;  %v655_v19 = vld [vmem:[#allocation7 + $0x68] sm:$0xff]  ;;  %v654_v20 = vld [vmem:[#allocation7 + $0x60] sm:$0xff]  ;;  %p5572_p6 = pnand %p5571_p12, %p9747_p4  ;;  %p5577_p0 = scmp.lt.s32.totalorder %s9006_s29, %s5575_s24 }
  0xb9   : > { %679 = vmatpush1.msra.mxu0 %v668_v6  ;;  %4827 = vmatpush1.msra.mxu1 %v668_v6  ;;  %v653_v21 = vld [vmem:[#allocation7 + $0x58] sm:$0xff]  ;;  %v652_v22 = vld [vmem:[#allocation7 + $0x50] sm:$0xff]  ;;  %v651_v23 = vld [vmem:[#allocation7 + $0x48] sm:$0xff] }
  0xba   : > { %680 = vmatprep.subr.mxu0 %v667_v7  ;;  %4812 = vmatprep.subr.mxu1 %v667_v7  ;;  %v650_v24 = vld [vmem:[#allocation7 + $0x40] sm:$0xff]  ;;  %v649_v25 = vld [vmem:[#allocation7 + $0x38] sm:$0xff]  ;;  %v648_v26 = vld [vmem:[#allocation7 + $0x30] sm:$0xff]  ;;  %p5573_p2 = pneg %p5572_p6 }
  0xbb   : > { %681 = vmatpush1.msra.mxu0 %v666_v8  ;;  %4828 = vmatpush1.msra.mxu1 %v666_v8  ;;  %v647_v27 = vld [vmem:[#allocation7 + $0x28] sm:$0xff]  ;;  %v646_v28 = vld [vmem:[#allocation7 + $0x20] sm:$0xff]  ;;  %v645_v29 = vld [vmem:[#allocation7 + $0x18] sm:$0xff] }
  0xbc   : > { %682 = vmatprep.subr.mxu0 %v665_v9  ;;  %4813 = vmatprep.subr.mxu1 %v665_v9  ;;  %v644_v30 = vld [vmem:[#allocation7 + $0x10] sm:$0xff]  ;;  %v643_v31 = vld [vmem:[#allocation7 + $0x8] sm:$0xff]  ;;  %v642_v32 = vld [vmem:[#allocation7] sm:$0xff] }
  0xbd   : > { %683 = vmatpush1.msra.mxu0 %v664_v10  ;;  %4829 = vmatpush1.msra.mxu1 %v664_v10  ;;  %v546_v33 = vld [vmem:[%s5948_s14] sm:$0xff]  ;;  %v547_v34 = vld [vmem:[%s5948_s14 + $0x8] sm:$0xff]  ;;  %v548_v35 = vld [vmem:[%s5948_s14 + $0x10] sm:$0xff] }
  0xbe   : > { %684 = vmatprep.subr.mxu0 %v663_v11  ;;  %4814 = vmatprep.subr.mxu1 %v663_v11  ;;  %v549_v36 = vld [vmem:[%s5948_s14 + $0x18] sm:$0xff]  ;;  %v550_v37 = vld [vmem:[%s5948_s14 + $0x20] sm:$0xff]  ;;  %v551_v38 = vld [vmem:[%s5948_s14 + $0x28] sm:$0xff] }
  0xbf   : > { %685 = vmatpush1.msra.mxu0 %v662_v12  ;;  %4830 = vmatpush1.msra.mxu1 %v662_v12  ;;  %v552_v39 = vld [vmem:[%s5948_s14 + $0x30] sm:$0xff]  ;;  %v553_v40 = vld [vmem:[%s5948_s14 + $0x38] sm:$0xff]  ;;  %v554_v41 = vld [vmem:[%s5948_s14 + $0x40] sm:$0xff] }
  0xc0   : > { %686 = vmatprep.subr.mxu0 %v661_v13  ;;  %4815 = vmatprep.subr.mxu1 %v661_v13  ;;  %v555_v42 = vld [vmem:[%s5948_s14 + $0x48] sm:$0xff]  ;;  %v556_v43 = vld [vmem:[%s5948_s14 + $0x50] sm:$0xff]  ;;  %v557_v44 = vld [vmem:[%s5948_s14 + $0x58] sm:$0xff] }
  0xc1   : > { %687 = vmatpush1.msra.mxu0 %v660_v14  ;;  %4831 = vmatpush1.msra.mxu1 %v660_v14  ;;  %v558_v45 = vld [vmem:[%s5948_s14 + $0x60] sm:$0xff]  ;;  %v559_v46 = vld [vmem:[%s5948_s14 + $0x68] sm:$0xff]  ;;  %v560_v47 = vld [vmem:[%s5948_s14 + $0x70] sm:$0xff] }
  0xc2   : > { %688 = vmatprep.subr.mxu0 %v659_v15  ;;  %4816 = vmatprep.subr.mxu1 %v659_v15  ;;  %v561_v48 = vld [vmem:[%s5948_s14 + $0x78] sm:$0xff]  ;;  %v562_v49 = vld [vmem:[%s5948_s14 + $0x80] sm:$0xff]  ;;  %v563_v50 = vld [vmem:[%s5948_s14 + $0x88] sm:$0xff] }
  0xc3   : > { %689 = vmatpush1.msra.mxu0 %v658_v16  ;;  %4832 = vmatpush1.msra.mxu1 %v658_v16  ;;  %v564_v51 = vld [vmem:[%s5948_s14 + $0x90] sm:$0xff]  ;;  %v565_v52 = vld [vmem:[%s5948_s14 + $0x98] sm:$0xff]  ;;  %v566_v53 = vld [vmem:[%s5948_s14 + $0xa0] sm:$0xff] }
  0xc4   : > { %690 = vmatprep.subr.mxu0 %v657_v17  ;;  %4817 = vmatprep.subr.mxu1 %v657_v17  ;;  %v567_v54 = vld [vmem:[%s5948_s14 + $0xa8] sm:$0xff]  ;;  %v568_v55 = vld [vmem:[%s5948_s14 + $0xb0] sm:$0xff]  ;;  %v569_v56 = vld [vmem:[%s5948_s14 + $0xb8] sm:$0xff] }
  0xc5   : > { %691 = vmatpush1.msra.mxu0 %v656_v18  ;;  %4833 = vmatpush1.msra.mxu1 %v656_v18  ;;  %v570_v57 = vld [vmem:[%s5948_s14 + $0xc0] sm:$0xff]  ;;  %v571_v58 = vld [vmem:[%s5948_s14 + $0xc8] sm:$0xff]  ;;  %v572_v60 = vld [vmem:[%s5948_s14 + $0xd0] sm:$0xff] }
  0xc6   : > { %692 = vmatprep.subr.mxu0 %v655_v19  ;;  %4818 = vmatprep.subr.mxu1 %v655_v19  ;;  %v634_v59 = vld [vmem:[%s5948_s14 + $0x2c0] sm:$0xff]  ;;  %v635_v61 = vld [vmem:[%s5948_s14 + $0x2c8] sm:$0xff]  ;;  %v573_v62 = vld [vmem:[%s5948_s14 + $0xd8] sm:$0xff] }
  0xc7   : > { %693 = vmatpush1.msra.mxu0 %v654_v20  ;;  %4834 = vmatpush1.msra.mxu1 %v654_v20  ;;  %v636_v63 = vld [vmem:[%s5948_s14 + $0x2d0] sm:$0xff]  ;;  %v574_v1 = vld [vmem:[%s5948_s14 + $0xe0] sm:$0xff]  ;;  %v637_v2 = vld [vmem:[%s5948_s14 + $0x2d8] sm:$0xff] }
  0xc8   : > { %694 = vmatprep.subr.mxu0 %v653_v21  ;;  %4819 = vmatprep.subr.mxu1 %v653_v21  ;;  %v575_v3 = vld [vmem:[%s5948_s14 + $0xe8] sm:$0xff]  ;;  %v638_v4 = vld [vmem:[%s5948_s14 + $0x2e0] sm:$0xff]  ;;  %v576_v5 = vld [vmem:[%s5948_s14 + $0xf0] sm:$0xff] }
  0xc9   : > { %695 = vmatpush1.msra.mxu0 %v652_v22  ;;  %4835 = vmatpush1.msra.mxu1 %v652_v22  ;;  %v639_v6 = vld [vmem:[%s5948_s14 + $0x2e8] sm:$0xff]  ;;  %v577_v7 = vld [vmem:[%s5948_s14 + $0xf8] sm:$0xff]  ;;  %v640_v8 = vld [vmem:[%s5948_s14 + $0x2f0] sm:$0xff] }
  0xca   : > { %696 = vmatprep.subr.mxu0 %v651_v23  ;;  %4820 = vmatprep.subr.mxu1 %v651_v23  ;;  %v578_v9 = vld [vmem:[%s5948_s14 + $0x100] sm:$0xff]  ;;  %v641_v10 = vld [vmem:[%s5948_s14 + $0x2f8] sm:$0xff]  ;;  %v579_v11 = vld [vmem:[%s5948_s14 + $0x108] sm:$0xff] }
  0xcb   : > { %697 = vmatpush1.msra.mxu0 %v650_v24  ;;  %4836 = vmatpush1.msra.mxu1 %v650_v24  ;;  %v580_v12 = vld [vmem:[%s5948_s14 + $0x110] sm:$0xff]  ;;  %v581_v13 = vld [vmem:[%s5948_s14 + $0x118] sm:$0xff]  ;;  %v582_v14 = vld [vmem:[%s5948_s14 + $0x120] sm:$0xff] }
  0xcc   : > { %698 = vmatprep.subr.mxu0 %v649_v25  ;;  %4821 = vmatprep.subr.mxu1 %v649_v25  ;;  %v583_v15 = vld [vmem:[%s5948_s14 + $0x128] sm:$0xff]  ;;  %v584_v16 = vld [vmem:[%s5948_s14 + $0x130] sm:$0xff]  ;;  %v585_v17 = vld [vmem:[%s5948_s14 + $0x138] sm:$0xff] }
  0xcd   : > { %699 = vmatpush1.msra.mxu0 %v648_v26  ;;  %4837 = vmatpush1.msra.mxu1 %v648_v26  ;;  %v586_v18 = vld [vmem:[%s5948_s14 + $0x140] sm:$0xff]  ;;  %v587_v19 = vld [vmem:[%s5948_s14 + $0x148] sm:$0xff]  ;;  %v588_v20 = vld [vmem:[%s5948_s14 + $0x150] sm:$0xff] }
  0xce   : > { %700 = vmatprep.subr.mxu0 %v647_v27  ;;  %4822 = vmatprep.subr.mxu1 %v647_v27  ;;  %v589_v21 = vld [vmem:[%s5948_s14 + $0x158] sm:$0xff]  ;;  %v590_v22 = vld [vmem:[%s5948_s14 + $0x160] sm:$0xff]  ;;  %v591_v23 = vld [vmem:[%s5948_s14 + $0x168] sm:$0xff] }
  0xcf   : > { %701 = vmatpush1.msra.mxu0 %v646_v28  ;;  %4838 = vmatpush1.msra.mxu1 %v646_v28  ;;  %v592_v24 = vld [vmem:[%s5948_s14 + $0x170] sm:$0xff]  ;;  %v593_v25 = vld [vmem:[%s5948_s14 + $0x178] sm:$0xff]  ;;  %v594_v26 = vld [vmem:[%s5948_s14 + $0x180] sm:$0xff] }
  0xd0   : > { %702 = vmatprep.subr.mxu0 %v645_v29  ;;  %4823 = vmatprep.subr.mxu1 %v645_v29  ;;  %v595_v28 = vld [vmem:[%s5948_s14 + $0x188] sm:$0xff] }
  0xd1   : > { %703 = vmatpush1.msra.mxu0 %v644_v30  ;;  %4839 = vmatpush1.msra.mxu1 %v644_v30 }
  0xd2   : > { %704 = vmatprep.subr.mxu0 %v643_v31  ;;  %4824 = vmatprep.subr.mxu1 %v643_v31  ;;  %v596_v31 = vld [vmem:[%s5948_s14 + $0x190] sm:$0xff] }
  0xd3   : > { %705 = vmatpush1.msra.mxu0 %v642_v32  ;;  %4840 = vmatpush1.msra.mxu1 %v642_v32 }
  0xd4   : > { %739 = vmatmul.mubr.f32.vlgmr.msra.gmra.mxu0 %v546_v33  ;;  %1267 = vmatmul.mubr.f32.vlgmr.msra.gmra.mxu1 %v634_v59 }
  0xd5   : > { %744 = vmatprep.mubr.f32.mxu0 %v9102_v0  ;;  %1272 = vmatprep.mubr.f32.mxu1 %v9102_v0 }
  0xd8   : > { %745 = vmatmul.mubr.f32.gmra.mxu0 %v547_v34  ;;  %1273 = vmatmul.mubr.f32.gmra.mxu1 %v635_v61  ;;  %v597_v34 = vld [vmem:[%s5948_s14 + $0x198] sm:$0xff]  ;;  %v606_v61 = vld [vmem:[%s5948_s14 + $0x1e0] sm:$0xff] }
  0xd9   : > { %750 = vmatprep.mubr.f32.mxu0 %v9102_v0  ;;  %1278 = vmatprep.mubr.f32.mxu1 %v9102_v0 }
  0xdc   : > { %751 = vmatmul.mubr.f32.gmra.mxu0 %v548_v35  ;;  %1279 = vmatmul.mubr.f32.gmra.mxu1 %v636_v63 }
  0xdd   : > { %756 = vmatprep.mubr.f32.mxu0 %v9102_v0  ;;  %1284 = vmatprep.mubr.f32.mxu1 %v9102_v0 }
  0xe0   : > { %757 = vmatmul.mubr.f32.gmra.mxu0 %v549_v36  ;;  %1285 = vmatmul.mubr.f32.gmra.mxu1 %v637_v2 }
  0xe1   : > { %762 = vmatprep.mubr.f32.mxu0 %v9102_v0  ;;  %1290 = vmatprep.mubr.f32.mxu1 %v9102_v0 }
  0xe4   : > { %763 = vmatmul.mubr.f32.gmra.mxu0 %v550_v37  ;;  %1291 = vmatmul.mubr.f32.gmra.mxu1 %v638_v4  ;;  %v598_v37 = vld [vmem:[%s5948_s14 + $0x1a0] sm:$0xff]  ;;  %v608_v4 = vld [vmem:[%s5948_s14 + $0x1f0] sm:$0xff] }
  0xe5   : > { %768 = vmatprep.mubr.f32.mxu0 %v9102_v0  ;;  %1296 = vmatprep.mubr.f32.mxu1 %v9102_v0 }
  0xe8   : > { %769 = vmatmul.mubr.f32.gmra.mxu0 %v551_v38  ;;  %1297 = vmatmul.mubr.f32.gmra.mxu1 %v639_v6 }
  0xe9   : > { %774 = vmatprep.mubr.f32.mxu0 %v9102_v0  ;;  %1302 = vmatprep.mubr.f32.mxu1 %v9102_v0 }
  0xec   : > { %775 = vmatmul.mubr.f32.gmra.mxu0 %v552_v39  ;;  %1303 = vmatmul.mubr.f32.gmra.mxu1 %v640_v8 }
  0xed   : > { %780 = vmatprep.mubr.f32.mxu0 %v9102_v0  ;;  %1308 = vmatprep.mubr.f32.mxu1 %v9102_v0 }
  0xf0   : > { %781 = vmatmul.mubr.f32.gmra.mxu0 %v553_v40  ;;  %1309 = vmatmul.mubr.f32.gmra.mxu1 %v641_v10  ;;  %v599_v40 = vld [vmem:[%s5948_s14 + $0x1a8] sm:$0xff]  ;;  %v610_v10 = vld [vmem:[%s5948_s14 + $0x200] sm:$0xff] }
  0xf1   : > { %786 = vmatprep.mubr.f32.mxu0 %v9102_v0 }
  0xf4   : > { %787 = vmatmul.mubr.f32.gmra.mxu0 %v554_v41 }
  0xf5   : > { %792 = vmatprep.mubr.f32.mxu0 %v9102_v0 }
  0xf8   : > { %793 = vmatmul.mubr.f32.gmra.mxu0 %v555_v42 }
  0xf9   : > { %798 = vmatprep.mubr.f32.mxu0 %v9102_v0 }
  0xfc   : > { %799 = vmatmul.mubr.f32.gmra.mxu0 %v556_v43  ;;  %v600_v43 = vld [vmem:[%s5948_s14 + $0x1b0] sm:$0xff] }
  0xfd   : > { %804 = vmatprep.mubr.f32.mxu0 %v9102_v0 }
 0x100   : > { %805 = vmatmul.mubr.f32.gmra.mxu0 %v557_v44 }
 0x101   : > { %810 = vmatprep.mubr.f32.mxu0 %v9102_v0 }
 0x104   : > { %811 = vmatmul.mubr.f32.gmra.mxu0 %v558_v45 }
 0x105   : > { %816 = vmatprep.mubr.f32.mxu0 %v9102_v0 }
 0x108   : > { %817 = vmatmul.mubr.f32.gmra.mxu0 %v559_v46  ;;  %v601_v46 = vld [vmem:[%s5948_s14 + $0x1b8] sm:$0xff] }
 0x109   : > { %822 = vmatprep.mubr.f32.mxu0 %v9102_v0 }
 0x10c   : > { %823 = vmatmul.mubr.f32.gmra.mxu0 %v560_v47 }
 0x10d   : > { %828 = vmatprep.mubr.f32.mxu0 %v9102_v0 }
 0x110   : > { %829 = vmatmul.mubr.f32.gmra.mxu0 %v561_v48 }
 0x111   : > { %834 = vmatprep.mubr.f32.mxu0 %v9102_v0 }
 0x114   : > { %835 = vmatmul.mubr.f32.gmra.mxu0 %v562_v49  ;;  %v602_v49 = vld [vmem:[%s5948_s14 + $0x1c0] sm:$0xff] }
 0x115   : > { %840 = vmatprep.mubr.f32.mxu0 %v9102_v0 }
 0x118   : > { %841 = vmatmul.mubr.f32.gmra.mxu0 %v563_v50 }
 0x119   : > { %846 = vmatprep.mubr.f32.mxu0 %v9102_v0 }
 0x11c   : > { %847 = vmatmul.mubr.f32.gmra.mxu0 %v564_v51 }
 0x11d   : > { %852 = vmatprep.mubr.f32.mxu0 %v9102_v0 }
 0x120   : > { %853 = vmatmul.mubr.f32.gmra.mxu0 %v565_v52  ;;  %v603_v52 = vld [vmem:[%s5948_s14 + $0x1c8] sm:$0xff] }
 0x121   : > { %858 = vmatprep.mubr.f32.mxu0 %v9102_v0 }
 0x124   : > { %859 = vmatmul.mubr.f32.gmra.mxu0 %v566_v53 }
 0x125   : > { %864 = vmatprep.mubr.f32.mxu0 %v9102_v0 }
 0x128   : > { %865 = vmatmul.mubr.f32.gmra.mxu0 %v567_v54 }
 0x129   : > { %870 = vmatprep.mubr.f32.mxu0 %v9102_v0 }
 0x12c   : > { %871 = vmatmul.mubr.f32.gmra.mxu0 %v568_v55  ;;  %v604_v55 = vld [vmem:[%s5948_s14 + $0x1d0] sm:$0xff] }
 0x12d   : > { %876 = vmatprep.mubr.f32.mxu0 %v9102_v0 }
 0x130   : > { %877 = vmatmul.mubr.f32.gmra.mxu0 %v569_v56 }
 0x131   : > { %882 = vmatprep.mubr.f32.mxu0 %v9102_v0 }
 0x134   : > { %883 = vmatmul.mubr.f32.gmra.mxu0 %v570_v57 }
 0x135   : > { %888 = vmatprep.mubr.f32.mxu0 %v9102_v0 }
 0x138   : > { %889 = vmatmul.mubr.f32.gmra.mxu0 %v571_v58  ;;  %v605_v58 = vld [vmem:[%s5948_s14 + $0x1d8] sm:$0xff] }
 0x139   : > { %894 = vmatprep.mubr.f32.mxu0 %v9102_v0 }
 0x13c   : > { %895 = vmatmul.mubr.f32.gmra.mxu0 %v572_v60 }
 0x13d   : > { %900 = vmatprep.mubr.f32.mxu0 %v9102_v0 }
 0x140   : > { %901 = vmatmul.mubr.f32.gmra.mxu0 %v573_v62 }
 0x141   : > { %906 = vmatprep.mubr.f32.mxu0 %v9102_v0 }
 0x144   : > { %907 = vmatmul.mubr.f32.gmra.mxu0 %v574_v1  ;;  %v607_v1 = vld [vmem:[%s5948_s14 + $0x1e8] sm:$0xff] }
 0x145   : > { %912 = vmatprep.mubr.f32.mxu0 %v9102_v0 }
 0x148   : > { %913 = vmatmul.mubr.f32.gmra.mxu0 %v575_v3 }
 0x149   : > { %918 = vmatprep.mubr.f32.mxu0 %v9102_v0 }
 0x14c   : > { %919 = vmatmul.mubr.f32.gmra.mxu0 %v576_v5 }
 0x14d   : > { %924 = vmatprep.mubr.f32.mxu0 %v9102_v0 }
 0x150   : > { %925 = vmatmul.mubr.f32.gmra.mxu0 %v577_v7  ;;  %v609_v7 = vld [vmem:[%s5948_s14 + $0x1f8] sm:$0xff] }
 0x151   : > { %930 = vmatprep.mubr.f32.mxu0 %v9102_v0 }
 0x154   : > { %931 = vmatmul.mubr.f32.gmra.mxu0 %v578_v9 }
 0x155   : > { %936 = vmatprep.mubr.f32.mxu0 %v9102_v0 }
 0x158   : > { %937 = vmatmul.mubr.f32.gmra.mxu0 %v579_v11 }
 0x159   : > { %942 = vmatprep.mubr.f32.mxu0 %v9102_v0 }
 0x15c   : > { %943 = vmatmul.mubr.f32.gmra.mxu0 %v580_v12 }
 0x15d   : > { %948 = vmatprep.mubr.f32.mxu0 %v9102_v0 }
 0x160   : > { %949 = vmatmul.mubr.f32.gmra.mxu0 %v581_v13  ;;  %v611_v13 = vld [vmem:[%s5948_s14 + $0x208] sm:$0xff] }
 0x161   : > { %954 = vmatprep.mubr.f32.mxu0 %v9102_v0 }
 0x164   : > { %955 = vmatmul.mubr.f32.gmra.mxu0 %v582_v14 }
 0x165   : > { %960 = vmatprep.mubr.f32.mxu0 %v9102_v0 }
 0x168   : > { %961 = vmatmul.mubr.f32.gmra.mxu0 %v583_v15 }
 0x169   : > { %966 = vmatprep.mubr.f32.mxu0 %v9102_v0 }
 0x16c   : > { %967 = vmatmul.mubr.f32.gmra.mxu0 %v584_v16  ;;  %v612_v16 = vld [vmem:[%s5948_s14 + $0x210] sm:$0xff] }
 0x16d   : > { %972 = vmatprep.mubr.f32.mxu0 %v9102_v0 }
 0x170   : > { %973 = vmatmul.mubr.f32.gmra.mxu0 %v585_v17 }
 0x171   : > { %978 = vmatprep.mubr.f32.mxu0 %v9102_v0 }
 0x174   : > { %979 = vmatmul.mubr.f32.gmra.mxu0 %v586_v18 }
 0x175   : > { %984 = vmatprep.mubr.f32.mxu0 %v9102_v0 }
 0x178   : > { %985 = vmatmul.mubr.f32.gmra.mxu0 %v587_v19  ;;  %v613_v19 = vld [vmem:[%s5948_s14 + $0x218] sm:$0xff] }
 0x179   : > { %990 = vmatprep.mubr.f32.mxu0 %v9102_v0 }
 0x17c   : > { %991 = vmatmul.mubr.f32.gmra.mxu0 %v588_v20 }
 0x17d   : > { %996 = vmatprep.mubr.f32.mxu0 %v9102_v0 }
 0x180   : > { %997 = vmatmul.mubr.f32.gmra.mxu0 %v589_v21 }
 0x181   : > { %1002 = vmatprep.mubr.f32.mxu0 %v9102_v0 }
 0x184   : > { %1003 = vmatmul.mubr.f32.gmra.mxu0 %v590_v22  ;;  %v614_v22 = vld [vmem:[%s5948_s14 + $0x220] sm:$0xff] }
 0x185   : > { %1008 = vmatprep.mubr.f32.mxu0 %v9102_v0 }
 0x188   : > { %1009 = vmatmul.mubr.f32.gmra.mxu0 %v591_v23 }
 0x189   : > { %1014 = vmatprep.mubr.f32.mxu0 %v9102_v0 }
 0x18c   : > { %1015 = vmatmul.mubr.f32.gmra.mxu0 %v592_v24 }
 0x18d   : > { %1020 = vmatprep.mubr.f32.mxu0 %v9102_v0 }
 0x190   : > { %1021 = vmatmul.mubr.f32.gmra.mxu0 %v593_v25  ;;  %v615_v25 = vld [vmem:[%s5948_s14 + $0x228] sm:$0xff] }
 0x191   : > { %1026 = vmatprep.mubr.f32.mxu0 %v9102_v0 }
 0x194   : > { %v6084_v27 = vpop.f32.mrf.mxu0  ;;  %1027 = vmatmul.mubr.f32.gmra.mxu0 %v594_v26 }
 0x195   : > { %9259 = vst [vmem:[#allocation35_spill] sm:$0xff] %v6084_v27  ;;  %1032 = vmatprep.mubr.f32.mxu0 %v9102_v0 }
 0x196   : > { %v6088_v29 = vpop.f32.mrf.mxu0 }
 0x198   : > { %v6090_v30 = vpop.f32.mrf.mxu0  ;;  %1033 = vmatmul.mubr.f32.gmra.mxu0 %v595_v28 }
 0x199   : > { %9260 = vst [vmem:[#allocation36_spill] sm:$0xff] %v6090_v30  ;;  %1038 = vmatprep.mubr.f32.mxu0 %v9102_v0 }
 0x19a   : > { %v6094_v32 = vpop.f32.mrf.mxu0 }
 0x19c   : > { %v6096_v33 = vpop.f32.mrf.mxu0  ;;  %1039 = vmatmul.mubr.f32.gmra.mxu0 %v596_v31  ;;  %v616_v31 = vld [vmem:[%s5948_s14 + $0x230] sm:$0xff] }
 0x19d   : > { %9261 = vst [vmem:[#allocation37_spill] sm:$0xff] %v6096_v33  ;;  %1044 = vmatprep.mubr.f32.mxu0 %v9102_v0 }
 0x19e   : > { %v6100_v35 = vpop.f32.mrf.mxu0 }
 0x1a0   : > { %v6102_v36 = vpop.f32.mrf.mxu0  ;;  %1045 = vmatmul.mubr.f32.gmra.mxu0 %v597_v34 }
 0x1a1   : > { %9262 = vst [vmem:[#allocation38_spill] sm:$0xff] %v6102_v36  ;;  %1050 = vmatprep.mubr.f32.mxu0 %v9102_v0 }
 0x1a2   : > { %v6106_v38 = vpop.f32.mrf.mxu0 }
 0x1a4   : > { %v6108_v39 = vpop.f32.mrf.mxu0  ;;  %1051 = vmatmul.mubr.f32.gmra.mxu0 %v598_v37 }
 0x1a5   : > { %9263 = vst [vmem:[#allocation39_spill] sm:$0xff] %v6108_v39  ;;  %1056 = vmatprep.mubr.f32.mxu0 %v9102_v0 }
 0x1a6   : > { %v6112_v41 = vpop.f32.mrf.mxu0 }
 0x1a8   : > { %v6114_v42 = vpop.f32.mrf.mxu0  ;;  %1057 = vmatmul.mubr.f32.gmra.mxu0 %v599_v40  ;;  %v617_v40 = vld [vmem:[%s5948_s14 + $0x238] sm:$0xff] }
 0x1a9   : > { %9264 = vst [vmem:[#allocation40_spill] sm:$0xff] %v6114_v42  ;;  %1062 = vmatprep.mubr.f32.mxu0 %v9102_v0 }
 0x1aa   : > { %v6118_v44 = vpop.f32.mrf.mxu0 }
 0x1ac   : > { %v6120_v45 = vpop.f32.mrf.mxu0  ;;  %1063 = vmatmul.mubr.f32.gmra.mxu0 %v600_v43 }
 0x1ad   : > { %9265 = vst [vmem:[#allocation41_spill] sm:$0xff] %v6120_v45  ;;  %1068 = vmatprep.mubr.f32.mxu0 %v9102_v0 }
 0x1ae   : > { %v6124_v47 = vpop.f32.mrf.mxu0 }
 0x1b0   : > { %v6126_v48 = vpop.f32.mrf.mxu0  ;;  %1069 = vmatmul.mubr.f32.gmra.mxu0 %v601_v46 }
 0x1b1   : > { %9266 = vst [vmem:[#allocation42_spill] sm:$0xff] %v6126_v48  ;;  %1074 = vmatprep.mubr.f32.mxu0 %v9102_v0 }
 0x1b2   : > { %v6130_v50 = vpop.f32.mrf.mxu0 }
 0x1b4   : > { %v6132_v51 = vpop.f32.mrf.mxu0  ;;  %1075 = vmatmul.mubr.f32.gmra.mxu0 %v602_v49  ;;  %v618_v49 = vld [vmem:[%s5948_s14 + $0x240] sm:$0xff] }
 0x1b5   : > { %9267 = vst [vmem:[#allocation43_spill] sm:$0xff] %v6132_v51  ;;  %1080 = vmatprep.mubr.f32.mxu0 %v9102_v0 }
 0x1b6   : > { %v6136_v53 = vpop.f32.mrf.mxu0 }
 0x1b8   : > { %v6138_v54 = vpop.f32.mrf.mxu0  ;;  %1081 = vmatmul.mubr.f32.gmra.mxu0 %v603_v52 }
 0x1b9   : > { %9268 = vst [vmem:[#allocation44_spill] sm:$0xff] %v6138_v54  ;;  %1086 = vmatprep.mubr.f32.mxu0 %v9102_v0 }
 0x1ba   : > { %v6142_v56 = vpop.f32.mrf.mxu0 }
 0x1bc   : > { %v6144_v57 = vpop.f32.mrf.mxu0  ;;  %1087 = vmatmul.mubr.f32.gmra.mxu0 %v604_v55 }
 0x1bd   : > { %9269 = vst [vmem:[#allocation45_spill] sm:$0xff] %v6144_v57  ;;  %1092 = vmatprep.mubr.f32.mxu0 %v9102_v0 }
 0x1be   : > { %v6148_v59 = vpop.f32.mrf.mxu0 }
 0x1c0   : > { %v6150_v60 = vpop.f32.mrf.mxu0  ;;  %1093 = vmatmul.mubr.f32.gmra.mxu0 %v605_v58  ;;  %v619_v58 = vld [vmem:[%s5948_s14 + $0x248] sm:$0xff] }
 0x1c1   : > { %9270 = vst [vmem:[#allocation46_spill] sm:$0xff] %v6150_v60  ;;  %1098 = vmatprep.mubr.f32.mxu0 %v9102_v0 }
 0x1c2   : > { %v6154_v62 = vpop.f32.mrf.mxu0 }
 0x1c4   : > { %v6156_v63 = vpop.f32.mrf.mxu0  ;;  %1099 = vmatmul.mubr.f32.gmra.mxu0 %v606_v61 }
 0x1c5   : > { %9271 = vst [vmem:[#allocation47_spill] sm:$0xff] %v6156_v63  ;;  %1104 = vmatprep.mubr.f32.mxu0 %v9102_v0 }
 0x1c6   : > { %v6160_v2 = vpop.f32.mrf.mxu0 }
 0x1c8   : > { %v6162_v3 = vpop.f32.mrf.mxu0  ;;  %1105 = vmatmul.mubr.f32.gmra.mxu0 %v607_v1 }
 0x1c9   : > { %9272 = vst [vmem:[#allocation48_spill] sm:$0xff] %v6162_v3  ;;  %1110 = vmatprep.mubr.f32.mxu0 %v9102_v0 }
 0x1ca   : > { %v6166_v5 = vpop.f32.mrf.mxu0 }
 0x1cc   : > { %v6168_v6 = vpop.f32.mrf.mxu0  ;;  %1111 = vmatmul.mubr.f32.gmra.mxu0 %v608_v4  ;;  %v620_v4 = vld [vmem:[%s5948_s14 + $0x250] sm:$0xff] }
 0x1cd   : > { %9273 = vst [vmem:[#allocation49_spill] sm:$0xff] %v6168_v6  ;;  %1116 = vmatprep.mubr.f32.mxu0 %v9102_v0 }
 0x1ce   : > { %v6172_v8 = vpop.f32.mrf.mxu0 }
 0x1d0   : > { %v6174_v9 = vpop.f32.mrf.mxu0  ;;  %1117 = vmatmul.mubr.f32.gmra.mxu0 %v609_v7 }
 0x1d1   : > { %9274 = vst [vmem:[#allocation50_spill] sm:$0xff] %v6174_v9  ;;  %1122 = vmatprep.mubr.f32.mxu0 %v9102_v0 }
 0x1d2   : > { %v6178_v11 = vpop.f32.mrf.mxu0 }
 0x1d4   : > { %v6180_v12 = vpop.f32.mrf.mxu0  ;;  %1123 = vmatmul.mubr.f32.gmra.mxu0 %v610_v10 }
 0x1d5   : > { %9275 = vst [vmem:[#allocation51_spill] sm:$0xff] %v6180_v12  ;;  %1128 = vmatprep.mubr.f32.mxu0 %v9102_v0 }
 0x1d6   : > { %v6184_v14 = vpop.f32.mrf.mxu0 }
 0x1d8   : > { %v6186_v15 = vpop.f32.mrf.mxu0  ;;  %1129 = vmatmul.mubr.f32.gmra.mxu0 %v611_v13  ;;  %v621_v13 = vld [vmem:[%s5948_s14 + $0x258] sm:$0xff] }
 0x1d9   : > { %9276 = vst [vmem:[#allocation52_spill] sm:$0xff] %v6186_v15  ;;  %1134 = vmatprep.mubr.f32.mxu0 %v9102_v0 }
 0x1da   : > { %v6190_v17 = vpop.f32.mrf.mxu0 }
 0x1dc   : > { %v6192_v18 = vpop.f32.mrf.mxu0  ;;  %1135 = vmatmul.mubr.f32.gmra.mxu0 %v612_v16 }
 0x1dd   : > { %9277 = vst [vmem:[#allocation53_spill] sm:$0xff] %v6192_v18  ;;  %1140 = vmatprep.mubr.f32.mxu0 %v9102_v0 }
 0x1de   : > { %v6196_v20 = vpop.f32.mrf.mxu0 }
 0x1e0   : > { %v6198_v21 = vpop.f32.mrf.mxu0  ;;  %1141 = vmatmul.mubr.f32.gmra.mxu0 %v613_v19 }
 0x1e1   : > { %9278 = vst [vmem:[#allocation54_spill] sm:$0xff] %v6198_v21  ;;  %1146 = vmatprep.mubr.f32.mxu0 %v9102_v0 }
 0x1e2   : > { %v6202_v23 = vpop.f32.mrf.mxu0 }
 0x1e4   : > { %v6204_v24 = vpop.f32.mrf.mxu0  ;;  %1147 = vmatmul.mubr.f32.gmra.mxu0 %v614_v22  ;;  %v622_v22 = vld [vmem:[%s5948_s14 + $0x260] sm:$0xff] }
 0x1e5   : > { %9279 = vst [vmem:[#allocation55_spill] sm:$0xff] %v6204_v24  ;;  %1152 = vmatprep.mubr.f32.mxu0 %v9102_v0 }
 0x1e6   : > { %v6208_v26 = vpop.f32.mrf.mxu0 }
 0x1e8   : > { %v6210_v28 = vpop.f32.mrf.mxu0  ;;  %1153 = vmatmul.mubr.f32.gmra.mxu0 %v615_v25 }
 0x1e9   : > { %9280 = vst [vmem:[#allocation56_spill] sm:$0xff] %v6210_v28  ;;  %1158 = vmatprep.mubr.f32.mxu0 %v9102_v0 }
 0x1ea   : > { %v6214_v34 = vpop.f32.mrf.mxu0 }
 0x1ec   : > { %v6216_v37 = vpop.f32.mrf.mxu0  ;;  %1159 = vmatmul.mubr.f32.gmra.mxu0 %v616_v31 }
 0x1ed   : > { %9281 = vst [vmem:[#allocation57_spill] sm:$0xff] %v6216_v37  ;;  %1164 = vmatprep.mubr.f32.mxu0 %v9102_v0 }
 0x1ee   : > { %v6220_v43 = vpop.f32.mrf.mxu0 }
 0x1f0   : > { %v6222_v46 = vpop.f32.mrf.mxu0  ;;  %1165 = vmatmul.mubr.f32.gmra.mxu0 %v617_v40  ;;  %v623_v40 = vld [vmem:[%s5948_s14 + $0x268] sm:$0xff] }
 0x1f1   : > { %9282 = vst [vmem:[#allocation58_spill] sm:$0xff] %v6222_v46  ;;  %1170 = vmatprep.mubr.f32.mxu0 %v9102_v0 }
 0x1f2   : > { %v6226_v52 = vpop.f32.mrf.mxu0 }
 0x1f4   : > { %v6228_v55 = vpop.f32.mrf.mxu0  ;;  %1171 = vmatmul.mubr.f32.gmra.mxu0 %v618_v49 }
 0x1f5   : > { %9283 = vst [vmem:[#allocation59_spill] sm:$0xff] %v6228_v55  ;;  %1176 = vmatprep.mubr.f32.mxu0 %v9102_v0 }
 0x1f6   : > { %v6232_v61 = vpop.f32.mrf.mxu0 }
 0x1f8   : > { %v6234_v1 = vpop.f32.mrf.mxu0  ;;  %1177 = vmatmul.mubr.f32.gmra.mxu0 %v619_v58 }
 0x1f9   : > { %9284 = vst [vmem:[#allocation60_spill] sm:$0xff] %v6234_v1  ;;  %1182 = vmatprep.mubr.f32.mxu0 %v9102_v0 }
 0x1fa   : > { %v6238_v7 = vpop.f32.mrf.mxu0 }
 0x1fb   : > { %9285 = vst [vmem:[#allocation61_spill] sm:$0xff] %v6238_v7  ;;  %v628_v7 = vld [vmem:[%s5948_s14 + $0x290] sm:$0xff] }
 0x1fc   : > { %v6240_v10 = vpop.f32.mrf.mxu0  ;;  %1183 = vmatmul.mubr.f32.gmra.mxu0 %v620_v4  ;;  %v624_v4 = vld [vmem:[%s5948_s14 + $0x270] sm:$0xff] }
 0x1fd   : > { %9286 = vst [vmem:[#allocation62_spill] sm:$0xff] %v6240_v10  ;;  %1188 = vmatprep.mubr.f32.mxu0 %v9102_v0 }
 0x1fe   : > { %v6244_v16 = vpop.f32.mrf.mxu0 }
 0x1ff   : > { %9287 = vst [vmem:[#allocation63_spill] sm:$0xff] %v6244_v16 }
 0x200   : > { %v6246_v19 = vpop.f32.mrf.mxu0  ;;  %1189 = vmatmul.mubr.f32.gmra.mxu0 %v621_v13 }
 0x201   : > { %9288 = vst [vmem:[#allocation64_spill] sm:$0xff] %v6246_v19  ;;  %1194 = vmatprep.mubr.f32.mxu0 %v9102_v0 }
 0x202   : > { %v6250_v25 = vpop.f32.mrf.mxu0 }
 0x203   : > { %9289 = vst [vmem:[#allocation65_spill] sm:$0xff] %v6250_v25 }
 0x204   : > { %v6252_v31 = vpop.f32.mrf.mxu0  ;;  %1195 = vmatmul.mubr.f32.gmra.mxu0 %v622_v22  ;;  %v625_v22 = vld [vmem:[%s5948_s14 + $0x278] sm:$0xff] }
 0x205   : > { %9290 = vst [vmem:[#allocation66_spill] sm:$0xff] %v6252_v31  ;;  %1200 = vmatprep.mubr.f32.mxu0 %v9102_v0 }
 0x206   : > { %v6256_v49 = vpop.f32.mrf.mxu0 }
 0x207   : > { %9291 = vst [vmem:[#allocation67_spill] sm:$0xff] %v6256_v49  ;;  %v2274_v49 = vld [vmem:[#allocation10 + $0x78] sm:$0xff] }
 0x208   : > { %v6258_v58 = vpop.f32.mrf.mxu0  ;;  %1201 = vmatmul.mubr.f32.gmra.mxu0 %v623_v40  ;;  %v626_v40 = vld [vmem:[%s5948_s14 + $0x280] sm:$0xff]  ;;  %4569 = vmatprep.subr.mxu1 %v2274_v49 }
 0x209   : > { %9292 = vst [vmem:[#allocation68_spill] sm:$0xff] %v6258_v58  ;;  %1206 = vmatprep.mubr.f32.mxu0 %v9102_v0  ;;  %4570 = vmatpush3.msra.mxu1 %v2274_v49 }
 0x20a   : > { %v6262_v13 = vpop.f32.mrf.mxu0 }
 0x20b   : > { %9293 = vst [vmem:[#allocation69_spill] sm:$0xff] %v6262_v13 }
 0x20c   : > { %v6264_v19 = vpop.f32.mrf.mxu0  ;;  %1207 = vmatmul.mubr.f32.gmra.mxu0 %v624_v4  ;;  %v2273_v4 = vld [vmem:[#allocation10 + $0x70] sm:$0xff] }
 0x20d   : > { %9294 = vst [vmem:[#allocation70_spill] sm:$0xff] %v6264_v19  ;;  %1212 = vmatprep.mubr.f32.mxu0 %v9102_v0  ;;  %v627_v19 = vld [vmem:[%s5948_s14 + $0x288] sm:$0xff]  ;;  %4571 = vmatprep.subr.mxu1 %v2273_v4 }
 0x20e   : > { %v6268_v31 = vpop.f32.mrf.mxu0  ;;  %4572 = vmatpush3.msra.mxu1 %v2273_v4  ;;  %v9302_v4 = vmov 0.0  }
 0x20f   : > { %9295 = vst [vmem:[#allocation71_spill] sm:$0xff] %v6268_v31 }
 0x210   : > { %v6270_v25 = vpop.f32.mrf.mxu0  ;;  %1213 = vmatmul.mubr.f32.gmra.mxu0 %v625_v22  ;;  %v2272_v22 = vld [vmem:[#allocation10 + $0x68] sm:$0xff] }
 0x211   : > { %9296 = vst [vmem:[#allocation72_spill] sm:$0xff] %v6270_v25  ;;  %1218 = vmatprep.mubr.f32.mxu0 %v9102_v0  ;;  %v1315_v25 = vmul.f32 %v6088_v29, %v6088_v29  ;;  %4573 = vmatprep.subr.mxu1 %v2272_v22 }
 0x212   : > { %v6274_v58 = vpop.f32.mrf.mxu0  ;;  %4574 = vmatpush3.msra.mxu1 %v2272_v22 }
 0x213   : > { %9297 = vst [vmem:[#allocation73_spill] sm:$0xff] %v6274_v58  ;;  %v3535_v58 = vmul.f32 %v6088_v29, %v6084_v27  ;;  %v2270_v29 = vld [vmem:[#allocation10 + $0x58] sm:$0xff] }
 0x214   : > { %v6276_v13 = vpop.f32.mrf.mxu0  ;;  %1219 = vmatmul.mubr.f32.gmra.mxu0 %v626_v40  ;;  %v2271_v40 = vld [vmem:[#allocation10 + $0x60] sm:$0xff] }
 0x215   : > { %9298 = vst [vmem:[#allocation74_spill] sm:$0xff] %v6276_v13  ;;  %1224 = vmatprep.mubr.f32.mxu0 %v9102_v0  ;;  %4575 = vmatprep.subr.mxu1 %v2271_v40 }
 0x216   : > { %v934_v31 = vpop.f32.mrf.mxu0  ;;  %4576 = vmatpush3.msra.mxu1 %v2271_v40  ;;  %v629_v40 = vld [vmem:[%s5948_s14 + $0x298] sm:$0xff] }
 0x217   : > { %v1347_v10 = vmul.f32 %v934_v31, %v934_v31  ;;  %v3567_v16 = vmul.f32 %v934_v31, %v6276_v13  ;;  %v1316_v31 = vmul.f32 %v6094_v32, %v6094_v32  ;;  %4577 = vmatprep.subr.mxu1 %v2270_v29 }
 0x218   : > { %v6285_v49 = vpop.f32.mrf.mxu0  ;;  %1225 = vmatmul.mubr.f32.gmra.mxu0 %v627_v19  ;;  %v3536_v19 = vmul.f32 %v6094_v32, %v6090_v30  ;;  %4578 = vmatpush3.msra.mxu1 %v2270_v29  ;;  %v2268_v32 = vld [vmem:[#allocation10 + $0x48] sm:$0xff] }
 0x219   : > { %9299 = vst [vmem:[#allocation75_spill] sm:$0xff] %v6285_v49  ;;  %v6287_v0 = vadd.f32 %v1347_v10, %v1315_v25  ;;  %v6289_v1 = vadd.f32 %v3567_v16, %v3535_v58  ;;  %1230 = vmatprep.mubr.f32.mxu0 %v9302_v4  ;;  %v2269_v25 = vld [vmem:[#allocation10 + $0x50] sm:$0xff] }
 0x21a   : > { %v940_v55 = vpop.f32.mrf.mxu0  ;;  %4579 = vmatprep.subr.mxu1 %v2269_v25 }
 0x21b   : > { %9300 = vst [vmem:[#allocation76_spill] sm:$0xff] %v6287_v0  ;;  %9301 = vst [vmem:[#allocation77_spill] sm:$0xff] %v6289_v1  ;;  %v1348_v22 = vmul.f32 %v940_v55, %v940_v55  ;;  %v3568_v10 = vmul.f32 %v940_v55, %v6285_v49  ;;  %4580 = vmatpush3.msra.mxu1 %v2269_v25  ;;  %v1317_v55 = vmul.f32 %v6100_v35, %v6100_v35  ;;  %v630_v25 = vld [vmem:[%s5948_s14 + $0x2a0] sm:$0xff] }
 0x21c   : > { %v6298_v16 = vpop.f32.mrf.mxu0  ;;  %1231 = vmatmul.mubr.f32.gmra.mxu0 %v628_v7  ;;  %v3537_v7 = vmul.f32 %v6100_v35, %v6096_v33  ;;  %4581 = vmatprep.subr.mxu1 %v2268_v32  ;;  %v2266_v35 = vld [vmem:[#allocation10 + $0x38] sm:$0xff]  ;;  %v5265_v1 = vld [vmem:[%s5948_s14 + $0xa0] sm:$0xff] }
 0x21d   : > { %9303 = vst [vmem:[#allocation78_spill] sm:$0xff] %v6298_v16  ;;  %v6300_v58 = vadd.f32 %v1348_v22, %v1316_v31  ;;  %v6302_v13 = vadd.f32 %v3568_v10, %v3536_v19  ;;  %1236 = vmatprep.mubr.f32.mxu0 %v9302_v4  ;;  %4582 = vmatpush3.msra.mxu1 %v2268_v32  ;;  %v2267_v22 = vld [vmem:[#allocation10 + $0x40] sm:$0xff] }
 0x21e   : > { %v946_v27 = vpop.f32.mrf.mxu0  ;;  %4583 = vmatprep.subr.mxu1 %v2267_v22 }
 0x21f   : > { %9304 = vst [vmem:[#allocation79_spill] sm:$0xff] %v6300_v58  ;;  %9305 = vst [vmem:[#allocation80_spill] sm:$0xff] %v6302_v13  ;;  %v1349_v29 = vmul.f32 %v946_v27, %v946_v27  ;;  %v3569_v31 = vmul.f32 %v946_v27, %v6298_v16  ;;  %4584 = vmatpush3.msra.mxu1 %v2267_v22  ;;  %v1318_v27 = vmul.f32 %v6106_v38, %v6106_v38  ;;  %v631_v22 = vld [vmem:[%s5948_s14 + $0x2a8] sm:$0xff] }
 0x220   : > { %v6311_v19 = vpop.f32.mrf.mxu0  ;;  %1237 = vmatmul.mubr.f32.gmra.mxu0 %v629_v40  ;;  %v3538_v40 = vmul.f32 %v6106_v38, %v6102_v36  ;;  %4585 = vmatprep.subr.mxu1 %v2266_v35  ;;  %v2264_v38 = vld [vmem:[#allocation10 + $0x28] sm:$0xff] }
 0x221   : > { %9306 = vst [vmem:[#allocation81_spill] sm:$0xff] %v6311_v19  ;;  %v6313_v10 = vadd.f32 %v1349_v29, %v1317_v55  ;;  %v6315_v49 = vadd.f32 %v3569_v31, %v3537_v7  ;;  %1242 = vmatprep.mubr.f32.mxu0 %v9302_v4  ;;  %4586 = vmatpush3.msra.mxu1 %v2266_v35  ;;  %v2265_v29 = vld [vmem:[#allocation10 + $0x30] sm:$0xff] }
 0x222   : > { %v952_v30 = vpop.f32.mrf.mxu0  ;;  %4587 = vmatprep.subr.mxu1 %v2265_v29 }
 0x223   : > { %9307 = vst [vmem:[#allocation82_spill] sm:$0xff] %v6313_v10  ;;  %9308 = vst [vmem:[#allocation83_spill] sm:$0xff] %v6315_v49  ;;  %v1350_v32 = vmul.f32 %v952_v30, %v952_v30  ;;  %v3570_v55 = vmul.f32 %v952_v30, %v6311_v19  ;;  %4588 = vmatpush3.msra.mxu1 %v2265_v29  ;;  %v1319_v30 = vmul.f32 %v6112_v41, %v6112_v41  ;;  %v632_v29 = vld [vmem:[%s5948_s14 + $0x2b0] sm:$0xff]  ;;  %v6656_v49 = vld [vmem:[%s5938_s27 + $0xa8] sm:$0xff] }
 0x224   : > { %v6324_v7 = vpop.f32.mrf.mxu0  ;;  %1243 = vmatmul.mubr.f32.gmra.mxu0 %v630_v25  ;;  %v3539_v25 = vmul.f32 %v6112_v41, %v6108_v39  ;;  %4589 = vmatprep.subr.mxu1 %v2264_v38  ;;  %v2262_v41 = vld [vmem:[#allocation10 + $0x18] sm:$0xff]  ;;  %9371 = vst [vmem:[#allocation146_spill] sm:$0xff] %v6656_v49 }
 0x225   : > { %9309 = vst [vmem:[#allocation84_spill] sm:$0xff] %v6324_v7  ;;  %v6326_v31 = vadd.f32 %v1350_v32, %v1318_v27  ;;  %v6328_v16 = vadd.f32 %v3570_v55, %v3538_v40  ;;  %1248 = vmatprep.mubr.f32.mxu0 %v9302_v4  ;;  %4590 = vmatpush3.msra.mxu1 %v2264_v38  ;;  %v2263_v32 = vld [vmem:[#allocation10 + $0x20] sm:$0xff]  ;;  %v5264_v10 = vld [vmem:[%s5948_s14 + $0x98] sm:$0xff] }
 0x226   : > { %v958_v33 = vpop.f32.mrf.mxu0  ;;  %4591 = vmatprep.subr.mxu1 %v2263_v32 }
 0x227   : > { %9310 = vst [vmem:[#allocation85_spill] sm:$0xff] %v6326_v31  ;;  %9311 = vst [vmem:[#allocation86_spill] sm:$0xff] %v6328_v16  ;;  %v1351_v35 = vmul.f32 %v958_v33, %v958_v33  ;;  %v3571_v27 = vmul.f32 %v958_v33, %v6324_v7  ;;  %4592 = vmatpush3.msra.mxu1 %v2263_v32  ;;  %v1320_v33 = vmul.f32 %v6118_v44, %v6118_v44  ;;  %v633_v32 = vld [vmem:[%s5948_s14 + $0x2b8] sm:$0xff]  ;;  %v5262_v16 = vld [vmem:[%s5948_s14 + $0x88] sm:$0xff] }
 0x228   : > { %v6337_v40 = vpop.f32.mrf.mxu0  ;;  %1249 = vmatmul.mubr.f32.gmra.mxu0 %v631_v22  ;;  %v3540_v22 = vmul.f32 %v6118_v44, %v6114_v42  ;;  %4593 = vmatprep.subr.mxu1 %v2262_v41  ;;  %v2260_v44 = vld [vmem:[#allocation10 + $0x8] sm:$0xff]  ;;  %v1322_v42 = vmul.f32 %v6130_v50, %v6130_v50  ;;  %v5263_v31 = vld [vmem:[%s5948_s14 + $0x90] sm:$0xff] }
 0x229   : > { %9312 = vst [vmem:[#allocation87_spill] sm:$0xff] %v6337_v40  ;;  %v6339_v55 = vadd.f32 %v1351_v35, %v1319_v30  ;;  %v6341_v19 = vadd.f32 %v3571_v27, %v3539_v25  ;;  %1254 = vmatprep.mubr.f32.mxu0 %v9302_v4  ;;  %4594 = vmatpush3.msra.mxu1 %v2262_v41  ;;  %v2261_v35 = vld [vmem:[#allocation10 + $0x10] sm:$0xff] }
 0x22a   : > { %v964_v36 = vpop.f32.mrf.mxu0  ;;  %4595 = vmatprep.subr.mxu1 %v2261_v35 }
 0x22b   : > { %9313 = vst [vmem:[#allocation88_spill] sm:$0xff] %v6339_v55  ;;  %9314 = vst [vmem:[#allocation89_spill] sm:$0xff] %v6341_v19  ;;  %v1352_v38 = vmul.f32 %v964_v36, %v964_v36  ;;  %v3572_v30 = vmul.f32 %v964_v36, %v6337_v40  ;;  %4596 = vmatpush3.msra.mxu1 %v2261_v35  ;;  %v1321_v36 = vmul.f32 %v6124_v47, %v6124_v47 }
 0x22c   : > { %v6350_v25 = vpop.f32.mrf.mxu0  ;;  %1255 = vmatmul.mubr.f32.gmra.mxu0 %v632_v29  ;;  %v3541_v40 = vmul.f32 %v6124_v47, %v6120_v45  ;;  %4597 = vmatprep.subr.mxu1 %v2260_v44  ;;  %v3542_v47 = vmul.f32 %v6130_v50, %v6126_v48 }
 0x22d   : > { %9315 = vst [vmem:[#allocation90_spill] sm:$0xff] %v6350_v25  ;;  %v6352_v27 = vadd.f32 %v1352_v38, %v1320_v33  ;;  %v6354_v7 = vadd.f32 %v3572_v30, %v3540_v22  ;;  %1260 = vmatprep.mubr.f32.mxu0 %v9302_v4  ;;  %4598 = vmatpush3.msra.mxu1 %v2260_v44  ;;  %v2259_v30 = vld [vmem:[#allocation10] sm:$0xff] }
 0x22e   : > { %v970_v39 = vpop.f32.mrf.mxu0  ;;  %4599 = vmatprep.subr.mxu1 %v2259_v30 }
 0x22f   : > { %9316 = vst [vmem:[#allocation91_spill] sm:$0xff] %v6352_v27  ;;  %9317 = vst [vmem:[#allocation92_spill] sm:$0xff] %v6354_v7  ;;  %v1353_v29 = vmul.f32 %v970_v39, %v970_v39  ;;  %v3573_v41 = vmul.f32 %v970_v39, %v6350_v25  ;;  %4600 = vmatpush3.msra.mxu1 %v2259_v30  ;;  %v5261_v27 = vld [vmem:[%s5948_s14 + $0x80] sm:$0xff] }
 0x230   : > { %v6363_v33 = vpop.f32.mrf.mxu0  ;;  %1261 = vmatmul.mubr.f32.gmra.mxu0 %v633_v32 }
 0x231   : > { %9318 = vst [vmem:[#allocation93_spill] sm:$0xff] %v6363_v33  ;;  %v6365_v22 = vadd.f32 %v1353_v29, %v1321_v36  ;;  %v6367_v38 = vadd.f32 %v3573_v41, %v3541_v40  ;;  %v1323_v36 = vmul.f32 %v6136_v53, %v6136_v53  ;;  %v3543_v29 = vmul.f32 %v6136_v53, %v6132_v51 }
 0x232   : > { %v976_v35 = vpop.f32.mrf.mxu0 }
 0x233   : > { %9319 = vst [vmem:[#allocation94_spill] sm:$0xff] %v6365_v22  ;;  %9320 = vst [vmem:[#allocation95_spill] sm:$0xff] %v6367_v38  ;;  %v1354_v45 = vmul.f32 %v976_v35, %v976_v35  ;;  %v3574_v39 = vmul.f32 %v976_v35, %v6363_v33 }
 0x234   : > { %v6374_v25 = vpop.f32.mrf.mxu0 }
 0x235   : > { %9321 = vst [vmem:[#allocation96_spill] sm:$0xff] %v6374_v25  ;;  %v6376_v32 = vadd.f32 %v1354_v45, %v1322_v42  ;;  %v6378_v44 = vadd.f32 %v3574_v39, %v3542_v47  ;;  %v1324_v45 = vmul.f32 %v6142_v56, %v6142_v56  ;;  %v3544_v47 = vmul.f32 %v6142_v56, %v6138_v54 }
 0x236   : > { %v982_v40 = vpop.f32.mrf.mxu0 }
 0x237   : > { %9322 = vst [vmem:[#allocation97_spill] sm:$0xff] %v6376_v32  ;;  %9323 = vst [vmem:[#allocation98_spill] sm:$0xff] %v6378_v44  ;;  %v1355_v41 = vmul.f32 %v982_v40, %v982_v40  ;;  %v3575_v50 = vmul.f32 %v982_v40, %v6374_v25 }
 0x238   : > { %v6385_v48 = vpop.f32.mrf.mxu0 }
 0x239   : > { %9324 = vst [vmem:[#allocation99_spill] sm:$0xff] %v6385_v48  ;;  %v6387_v35 = vadd.f32 %v1355_v41, %v1323_v36  ;;  %v6389_v30 = vadd.f32 %v3575_v50, %v3543_v29  ;;  %v1325_v29 = vmul.f32 %v6148_v59, %v6148_v59  ;;  %v3545_v41 = vmul.f32 %v6148_v59, %v6144_v57 }
 0x23a   : > { %v988_v42 = vpop.f32.mrf.mxu0 }
 0x23b   : > { %9325 = vst [vmem:[#allocation100_spill] sm:$0xff] %v6387_v35  ;;  %9326 = vst [vmem:[#allocation101_spill] sm:$0xff] %v6389_v30  ;;  %v1356_v39 = vmul.f32 %v988_v42, %v988_v42  ;;  %v3576_v33 = vmul.f32 %v988_v42, %v6385_v48  ;;  %v5255_v35 = vld [vmem:[%s5948_s14 + $0x50] sm:$0xff] }
 0x23c   : > { %v6396_v53 = vpop.f32.mrf.mxu0 }
 0x23d   : > { %9327 = vst [vmem:[#allocation102_spill] sm:$0xff] %v6396_v53  ;;  %v6398_v51 = vadd.f32 %v1356_v39, %v1324_v45  ;;  %v6400_v40 = vadd.f32 %v3576_v33, %v3544_v47  ;;  %v1326_v33 = vmul.f32 %v6154_v62, %v6154_v62  ;;  %v3546_v47 = vmul.f32 %v6154_v62, %v6150_v60 }
 0x23e   : > { %v994_v36 = vpop.f32.mrf.mxu0 }
 0x23f   : > { %9328 = vst [vmem:[#allocation103_spill] sm:$0xff] %v6398_v51  ;;  %9329 = vst [vmem:[#allocation104_spill] sm:$0xff] %v6400_v40  ;;  %v1357_v50 = vmul.f32 %v994_v36, %v994_v36  ;;  %v3577_v25 = vmul.f32 %v994_v36, %v6396_v53  ;;  %v6583_v51 = vld [vmem:[%s5938_s27 + $0x70] sm:$0xff] }
 0x240   : > { %v6407_v56 = vpop.f32.mrf.mxu0 }
 0x241   : > { %9330 = vst [vmem:[#allocation105_spill] sm:$0xff] %v6407_v56  ;;  %v6409_v54 = vadd.f32 %v1357_v50, %v1325_v29  ;;  %v6411_v42 = vadd.f32 %v3577_v25, %v3545_v41  ;;  %v1327_v25 = vmul.f32 %v6160_v2, %v6160_v2  ;;  %v3547_v41 = vmul.f32 %v6160_v2, %v6156_v63 }
 0x242   : > { %v1000_v45 = vpop.f32.mrf.mxu0 }
 0x243   : > { %9331 = vst [vmem:[#allocation106_spill] sm:$0xff] %v6409_v54  ;;  %9332 = vst [vmem:[#allocation107_spill] sm:$0xff] %v6411_v42  ;;  %v1358_v39 = vmul.f32 %v1000_v45, %v1000_v45  ;;  %v3578_v48 = vmul.f32 %v1000_v45, %v6407_v56  ;;  %v6561_v42 = vld [vmem:[%s5938_s27 + $0x58] sm:$0xff]  ;;  %v5254_v54 = vld [vmem:[%s5948_s14 + $0x48] sm:$0xff] }
 0x244   : > { %v6418_v59 = vpop.f32.mrf.mxu0 }
 0x245   : > { %9333 = vst [vmem:[#allocation108_spill] sm:$0xff] %v6418_v59  ;;  %v6420_v57 = vadd.f32 %v1358_v39, %v1326_v33  ;;  %v6422_v36 = vadd.f32 %v3578_v48, %v3546_v47  ;;  %v1328_v48 = vmul.f32 %v6166_v5, %v6166_v5  ;;  %v3548_v47 = vmul.f32 %v6166_v5, %v6162_v3 }
 0x246   : > { %v1006_v29 = vpop.f32.mrf.mxu0 }
 0x247   : > { %9334 = vst [vmem:[#allocation109_spill] sm:$0xff] %v6420_v57  ;;  %9335 = vst [vmem:[#allocation110_spill] sm:$0xff] %v6422_v36  ;;  %v1359_v50 = vmul.f32 %v1006_v29, %v1006_v29  ;;  %v3579_v53 = vmul.f32 %v1006_v29, %v6418_v59  ;;  %v5252_v36 = vld [vmem:[%s5948_s14 + $0x38] sm:$0xff]  ;;  %v5253_v57 = vld [vmem:[%s5948_s14 + $0x40] sm:$0xff] }
 0x248   : > { %v6429_v62 = vpop.f32.mrf.mxu0 }
 0x249   : > { %9336 = vst [vmem:[#allocation111_spill] sm:$0xff] %v6429_v62  ;;  %v6431_v60 = vadd.f32 %v1359_v50, %v1327_v25  ;;  %v6433_v45 = vadd.f32 %v3579_v53, %v3547_v41  ;;  %v1329_v53 = vmul.f32 %v6172_v8, %v6172_v8  ;;  %v3549_v41 = vmul.f32 %v6172_v8, %v6168_v6 }
 0x24a   : > { %v1012_v33 = vpop.f32.mrf.mxu0 }
 0x24b   : > { %9337 = vst [vmem:[#allocation112_spill] sm:$0xff] %v6431_v60  ;;  %9338 = vst [vmem:[#allocation113_spill] sm:$0xff] %v6433_v45  ;;  %v1360_v39 = vmul.f32 %v1012_v33, %v1012_v33  ;;  %v3580_v56 = vmul.f32 %v1012_v33, %v6429_v62  ;;  %v5246_v62 = vld [vmem:[%s5948_s14 + $0x8] sm:$0xff] }
 0x24c   : > { %v6440_v2 = vpop.f32.mrf.mxu0 }
 0x24d   : > { %9339 = vst [vmem:[#allocation114_spill] sm:$0xff] %v6440_v2  ;;  %v6442_v63 = vadd.f32 %v1360_v39, %v1328_v48  ;;  %v6444_v29 = vadd.f32 %v3580_v56, %v3548_v47  ;;  %v1330_v56 = vmul.f32 %v6178_v11, %v6178_v11  ;;  %v3550_v47 = vmul.f32 %v6178_v11, %v6174_v9 }
 0x24e   : > { %v1018_v25 = vpop.f32.mrf.mxu0 }
 0x24f   : > { %9340 = vst [vmem:[#allocation115_spill] sm:$0xff] %v6442_v63  ;;  %9341 = vst [vmem:[#allocation116_spill] sm:$0xff] %v6444_v29  ;;  %v1361_v50 = vmul.f32 %v1018_v25, %v1018_v25  ;;  %v3581_v59 = vmul.f32 %v1018_v25, %v6440_v2  ;;  %v3551_v2 = vmul.f32 %v6184_v14, %v6180_v12  ;;  %v6489_v12 = vld [vmem:[%s5938_s27 + $0x18] sm:$0xff] }
 0x250   : > { %v6451_v5 = vpop.f32.mrf.mxu0  ;;  %9353 = vst [vmem:[#allocation128_spill] sm:$0xff] %v6489_v12  ;;  %v1333_v29 = vmul.f32 %v6196_v20, %v6196_v20 }
 0x251   : > { %9342 = vst [vmem:[#allocation117_spill] sm:$0xff] %v6451_v5  ;;  %v6453_v3 = vadd.f32 %v1361_v50, %v1329_v53  ;;  %v6455_v33 = vadd.f32 %v3581_v59, %v3549_v41  ;;  %v1331_v50 = vmul.f32 %v6184_v14, %v6184_v14  ;;  %v6486_v14 = vld [vmem:[%s5938_s27 + $0x10] sm:$0xff] }
 0x252   : > { %v1024_v48 = vpop.f32.mrf.mxu0  ;;  %9352 = vst [vmem:[#allocation127_spill] sm:$0xff] %v6486_v14 }
 0x253   : > { %9343 = vst [vmem:[#allocation118_spill] sm:$0xff] %v6453_v3  ;;  %9344 = vst [vmem:[#allocation119_spill] sm:$0xff] %v6455_v33  ;;  %v1362_v39 = vmul.f32 %v1024_v48, %v1024_v48  ;;  %v3582_v8 = vmul.f32 %v1024_v48, %v6451_v5  ;;  %v6520_v33 = vld [vmem:[%s5938_s27 + $0x38] sm:$0xff]  ;;  %v6523_v3 = vld [vmem:[%s5938_s27 + $0x40] sm:$0xff] }
 0x254   : > { %v6462_v25 = vpop.f32.mrf.mxu0 }
 0x255   : > { %9345 = vst [vmem:[#allocation120_spill] sm:$0xff] %v6462_v25  ;;  %v6464_v53 = vadd.f32 %v1362_v39, %v1330_v56  ;;  %v6466_v59 = vadd.f32 %v3582_v8, %v3550_v47  ;;  %v6480_v47 = vld [vmem:[%s5938_s27] sm:$0xff]  ;;  %v6483_v39 = vld [vmem:[%s5938_s27 + $0x8] sm:$0xff] }
 0x256   : > { %v1030_v41 = vpop.f32.mrf.mxu0  ;;  %9351 = vst [vmem:[#allocation126_spill] sm:$0xff] %v6483_v39  ;;  %v1732_v4 = vmul.f32 %v5246_v62, %v6483_v39 }
 0x257   : > { %9346 = vst [vmem:[#allocation121_spill] sm:$0xff] %v6464_v53  ;;  %9347 = vst [vmem:[#allocation122_spill] sm:$0xff] %v6466_v59  ;;  %v1363_v11 = vmul.f32 %v1030_v41, %v1030_v41  ;;  %v3583_v9 = vmul.f32 %v1030_v41, %v6462_v25  ;;  %v1332_v41 = vmul.f32 %v6190_v17, %v6190_v17  ;;  %v5245_v25 = vld [vmem:[%s5948_s14] sm:$0xff]  ;;  %v6509_v59 = vld [vmem:[%s5938_s27 + $0x30] sm:$0xff] }
 0x258   : > { %v6473_v48 = vpop.f32.mrf.mxu0  ;;  %v1731_v6 = vmul.f32 %v5245_v25, %v6480_v47  ;;  %9356 = vst [vmem:[#allocation131_spill] sm:$0xff] %v6509_v59  ;;  %v5248_v25 = vld [vmem:[%s5948_s14 + $0x18] sm:$0xff] }
 0x259   : > { %9348 = vst [vmem:[#allocation123_spill] sm:$0xff] %v6473_v48  ;;  %v6475_v5 = vadd.f32 %v1363_v11, %v1331_v50  ;;  %v6477_v56 = vadd.f32 %v3583_v9, %v3551_v2  ;;  %v3552_v9 = vmul.f32 %v6190_v17, %v6186_v15  ;;  %v1734_v53 = vmul.f32 %v5248_v25, %v6489_v12  ;;  %v5250_v25 = vld [vmem:[%s5948_s14 + $0x28] sm:$0xff] }
 0x25a   : > { %v1036_v8 = vpop.f32.mrf.mxu0 }
 0x25b   : > { %9349 = vst [vmem:[#allocation124_spill] sm:$0xff] %v6475_v5  ;;  %9350 = vst [vmem:[#allocation125_spill] sm:$0xff] %v6477_v56  ;;  %v1364_v2 = vmul.f32 %v1036_v8, %v1036_v8  ;;  %v3584_v50 = vmul.f32 %v1036_v8, %v6473_v48  ;;  %v6503_v56 = vld [vmem:[%s5938_s27 + $0x20] sm:$0xff]  ;;  %v6506_v5 = vld [vmem:[%s5938_s27 + $0x28] sm:$0xff] }
 0x25c   : > { %v6496_v11 = vpop.f32.mrf.mxu0  ;;  %9355 = vst [vmem:[#allocation130_spill] sm:$0xff] %v6503_v56  ;;  %v5247_v48 = vld [vmem:[%s5948_s14 + $0x10] sm:$0xff] }
 0x25d   : > { %9354 = vst [vmem:[#allocation129_spill] sm:$0xff] %v6496_v11  ;;  %v6511_v17 = vadd.f32 %v1364_v2, %v1332_v41  ;;  %v6513_v8 = vadd.f32 %v3584_v50, %v3552_v9  ;;  %v1733_v15 = vmul.f32 %v5247_v48, %v6486_v14  ;;  %v3553_v41 = vmul.f32 %v6196_v20, %v6192_v18  ;;  %v5249_v48 = vld [vmem:[%s5948_s14 + $0x20] sm:$0xff] }
 0x25e   : > { %v1042_v62 = vpop.f32.mrf.mxu0  ;;  %v1735_v50 = vmul.f32 %v5249_v48, %v6503_v56  ;;  %v6538_v20 = vmul.f32 %v1731_v6, %v1731_v6  ;;  %v6540_v18 = vmul.f32 %v1732_v4, %v1732_v4  ;;  %v1739_v6 = vmul.f32 %v5253_v57, %v6523_v3  ;;  %v6558_v4 = vld [vmem:[%s5938_s27 + $0x50] sm:$0xff] }
 0x25f   : > { %9357 = vst [vmem:[#allocation132_spill] sm:$0xff] %v6511_v17  ;;  %9358 = vst [vmem:[#allocation133_spill] sm:$0xff] %v6513_v8  ;;  %v1365_v9 = vmul.f32 %v1042_v62, %v1042_v62  ;;  %v3585_v2 = vmul.f32 %v1042_v62, %v6496_v11  ;;  %v1736_v8 = vmul.f32 %v5250_v25, %v6506_v5  ;;  %v5251_v17 = vld [vmem:[%s5948_s14 + $0x30] sm:$0xff]  ;;  %v6543_v62 = vld [vmem:[%s5938_s27 + $0x48] sm:$0xff] }
 0x260   : > { %v1737_v63 = vmul.f32 %v5251_v17, %v6509_v59  ;;  %v6536_v45 = vpop.f32.mrf.mxu0  ;;  %v6549_v60 = vmul.f32 %v1733_v15, %v1733_v15  ;;  %v6551_v25 = vmul.f32 %v1734_v53, %v1734_v53  ;;  %v1738_v17 = vmul.f32 %v5252_v36, %v6520_v33  ;;  %v6567_v15 = vld [vmem:[%s5938_s27 + $0x68] sm:$0xff] }
 0x261   : > { %9359 = vst [vmem:[#allocation134_spill] sm:$0xff] %v6536_v45  ;;  %v6545_v11 = vadd.f32 %v1365_v9, %v1333_v29  ;;  %v6547_v48 = vadd.f32 %v3585_v2, %v3553_v41  ;;  %v6564_v41 = vld [vmem:[%s5938_s27 + $0x60] sm:$0xff]  ;;  %v1334_v53 = vmul.f32 %v6202_v23, %v6202_v23  ;;  %v3554_v36 = vmul.f32 %v6202_v23, %v6198_v21  ;;  %v6601_v21 = vld [vmem:[#allocation8 + $0x78] sm:$0xff] }
 0x262   : > { %v1048_v29 = vpop.f32.mrf.mxu0  ;;  %v6574_v2 = vmul.f32 %v1735_v50, %v1735_v50  ;;  %v1740_v40 = vmul.f32 %v5254_v54, %v6543_v62  ;;  %v1741_v23 = vmul.f32 %v5255_v35, %v6558_v4  ;;  %v6592_v50 = vld [vmem:[%s5938_s27 + $0x78] sm:$0xff]  ;;  %9365 = vst [vmem:[#allocation140_spill] sm:$0xff] %v6601_v21  ;;  %v6603_v44 = vmul.f32 %v1738_v17, %v1738_v17  ;;  %v5257_v35 = vld [vmem:[%s5948_s14 + $0x60] sm:$0xff] }
 0x263   : > { %9360 = vst [vmem:[#allocation135_spill] sm:$0xff] %v6545_v11  ;;  %9361 = vst [vmem:[#allocation136_spill] sm:$0xff] %v6547_v48  ;;  %v1366_v57 = vmul.f32 %v1048_v29, %v1048_v29  ;;  %v3586_v9 = vmul.f32 %v1048_v29, %v6536_v45  ;;  %v6576_v48 = vmul.f32 %v1736_v8, %v1736_v8  ;;  %v5256_v29 = vld [vmem:[%s5948_s14 + $0x58] sm:$0xff]  ;;  %4649 = vmatprep.subr.mxu1 %v6601_v21 }
 0x264   : > { %v6578_v11 = vmul.f32 %v1737_v63, %v1737_v63  ;;  %v6585_v30 = vpop.f32.mrf.mxu0  ;;  %v1742_v8 = vmul.f32 %v5256_v29, %v6561_v42  ;;  %v6595_v63 = vld [vmem:[%s5938_s27 + $0x80] sm:$0xff]  ;;  %v6605_v32 = vmul.f32 %v1739_v6, %v1739_v6  ;;  %v1743_v38 = vmul.f32 %v5257_v35, %v6564_v41  ;;  %v5258_v29 = vld [vmem:[%s5948_s14 + $0x68] sm:$0xff] }
 0x265   : > { %9362 = vst [vmem:[#allocation137_spill] sm:$0xff] %v6585_v30  ;;  %v6597_v45 = vadd.f32 %v1366_v57, %v1334_v53  ;;  %v6599_v54 = vadd.f32 %v3586_v9, %v3554_v36  ;;  %v1744_v22 = vmul.f32 %v5258_v29, %v6567_v15  ;;  %v6613_v53 = vld [vmem:[%s5938_s27 + $0x88] sm:$0xff]  ;;  %v6616_v36 = vld [vmem:[%s5938_s27 + $0x90] sm:$0xff]  ;;  %v1335_v17 = vmul.f32 %v6208_v26, %v6208_v26 }
 0x266   : > { %v1054_v7 = vpop.f32.mrf.mxu0  ;;  %v3555_v6 = vmul.f32 %v6208_v26, %v6204_v24  ;;  %v6623_v35 = vmul.f32 %v1740_v40, %v1740_v40  ;;  %v5259_v29 = vld [vmem:[%s5948_s14 + $0x70] sm:$0xff]  ;;  %v1747_v19 = vmul.f32 %v5261_v27, %v6595_v63  ;;  %v6635_v40 = vmul.f32 %v1742_v8, %v1742_v8  ;;  %v6653_v8 = vld [vmem:[%s5938_s27 + $0xa0] sm:$0xff] }
 0x267   : > { %9363 = vst [vmem:[#allocation138_spill] sm:$0xff] %v6597_v45  ;;  %9364 = vst [vmem:[#allocation139_spill] sm:$0xff] %v6599_v54  ;;  %v1367_v57 = vmul.f32 %v1054_v7, %v1054_v7  ;;  %v3587_v9 = vmul.f32 %v1054_v7, %v6585_v30  ;;  %v1745_v54 = vmul.f32 %v5259_v29, %v6583_v51  ;;  %v5260_v45 = vld [vmem:[%s5948_s14 + $0x78] sm:$0xff] }
 0x268   : > { %v1746_v21 = vmul.f32 %v5260_v45, %v6592_v50  ;;  %v6631_v26 = vpop.f32.mrf.mxu0  ;;  %v6633_v7 = vmul.f32 %v1741_v23, %v1741_v23  ;;  %v6638_v30 = vld [vmem:[%s5938_s27 + $0x98] sm:$0xff]  ;;  %v6644_v55 = vmul.f32 %v1743_v38, %v1743_v38  ;;  %v6646_v45 = vmul.f32 %v1744_v22, %v1744_v22  ;;  %9370 = vst [vmem:[#allocation145_spill] sm:$0xff] %v6653_v8 }
 0x269   : > { %9366 = vst [vmem:[#allocation141_spill] sm:$0xff] %v6631_v26  ;;  %9367 = vst [vmem:[#allocation142_spill] sm:$0xff] %v6638_v30  ;;  %v6640_v24 = vadd.f32 %v1367_v57, %v1335_v17  ;;  %v6642_v29 = vadd.f32 %v3587_v9, %v3555_v6  ;;  %v1748_v27 = vmul.f32 %v5262_v16, %v6613_v53  ;;  %v6659_v6 = vld [vmem:[%s5938_s27 + $0xb0] sm:$0xff]  ;;  %v6662_v38 = vld [vmem:[%s5938_s27 + $0xb8] sm:$0xff] }
 0x26a   : > { %v1749_v23 = vmul.f32 %v5263_v31, %v6616_v36  ;;  %v1060_v17 = vpop.f32.mrf.mxu0  ;;  %9372 = vst [vmem:[#allocation147_spill] sm:$0xff] %v6659_v6  ;;  %9373 = vst [vmem:[#allocation148_spill] sm:$0xff] %v6662_v38  ;;  %v1336_v22 = vmul.f32 %v6214_v34, %v6214_v34  ;;  %v3556_v16 = vmul.f32 %v6214_v34, %v6210_v28  ;;  %v5266_v28 = vld [vmem:[%s5948_s14 + $0xa8] sm:$0xff] }
 0x26b   : > { %9368 = vst [vmem:[#allocation143_spill] sm:$0xff] %v6640_v24  ;;  %9369 = vst [vmem:[#allocation144_spill] sm:$0xff] %v6642_v29  ;;  %v1368_v31 = vmul.f32 %v1060_v17, %v1060_v17  ;;  %v3588_v57 = vmul.f32 %v1060_v17, %v6631_v26  ;;  %v6669_v9 = vmul.f32 %v1745_v54, %v1745_v54  ;;  %v6684_v17 = vld [vmem:[%s5938_s27 + $0xc0] sm:$0xff] }
 0x26c   : > { %v6671_v29 = vmul.f32 %v1746_v21, %v1746_v21  ;;  %v6673_v24 = vmul.f32 %v1747_v19, %v1747_v19  ;;  %v1750_v13 = vmul.f32 %v5264_v10, %v6638_v30  ;;  %v6677_v58 = vpop.f32.mrf.mxu0  ;;  %v1751_v34 = vmul.f32 %v5265_v1, %v6653_v8  ;;  %v6687_v21 = vld [vmem:[%s5938_s27 + $0xc8] sm:$0xff]  ;;  %v6690_v19 = vld [vmem:[%s5938_s27 + $0xd0] sm:$0xff]  ;;  %v6705_v30 = vld [vmem:[%s5938_s27 + $0xd8] sm:$0xff] }
 0x26d   : > { %9376 = vst [vmem:[#allocation151_spill] sm:$0xff] %v6677_v58  ;;  %v1752_v54 = vmul.f32 %v5266_v28, %v6656_v49  ;;  %9377 = vst [vmem:[#allocation152_spill] sm:$0xff] %v6690_v19  ;;  %v6692_v26 = vadd.f32 %v1368_v31, %v1336_v22  ;;  %v6694_v10 = vadd.f32 %v3588_v57, %v3556_v16  ;;  %v5267_v1 = vld [vmem:[%s5948_s14 + $0xb0] sm:$0xff]  ;;  %v5268_v49 = vld [vmem:[%s5948_s14 + $0xb8] sm:$0xff] }
 0x26e   : > { %9374 = vst [vmem:[#allocation149_spill] sm:$0xff] %v6671_v29  ;;  %9375 = vst [vmem:[#allocation150_spill] sm:$0xff] %v6673_v24  ;;  %v6696_v0 = vmul.f32 %v1748_v27, %v1748_v27  ;;  %v6698_v24 = vmul.f32 %v1749_v23, %v1749_v23  ;;  %v1753_v28 = vmul.f32 %v5267_v1, %v6659_v6  ;;  %v1066_v29 = vpop.f32.mrf.mxu0  ;;  %v6708_v22 = vld [vmem:[%s5938_s27 + $0xe0] sm:$0xff] }
 0x26f   : > { %9378 = vst [vmem:[#allocation153_spill] sm:$0xff] %v6692_v26  ;;  %9379 = vst [vmem:[#allocation154_spill] sm:$0xff] %v6694_v10  ;;  %v1754_v8 = vmul.f32 %v5268_v49, %v6662_v38  ;;  %v1337_v27 = vmul.f32 %v6220_v43, %v6220_v43  ;;  %v3557_v23 = vmul.f32 %v6220_v43, %v6216_v37  ;;  %v5269_v1 = vld [vmem:[%s5948_s14 + $0xc0] sm:$0xff]  ;;  %v5270_v10 = vld [vmem:[%s5948_s14 + $0xc8] sm:$0xff] }
 0x270   : > { %9380 = vst [vmem:[#allocation155_spill] sm:$0xff] %v6698_v24  ;;  %9381 = vst [vmem:[#allocation156_spill] sm:$0xff] %v6708_v22  ;;  %v1369_v16 = vmul.f32 %v1066_v29, %v1066_v29  ;;  %v3589_v31 = vmul.f32 %v1066_v29, %v6677_v58  ;;  %v6715_v57 = vmul.f32 %v1750_v13, %v1750_v13  ;;  %v5271_v38 = vld [vmem:[%s5948_s14 + $0xd0] sm:$0xff]  ;;  %v6723_v6 = vpop.f32.mrf.mxu0  ;;  %v6730_v29 = vld [vmem:[%s5938_s27 + $0xe8] sm:$0xff] }
 0x271   : > { %v1755_v49 = vmul.f32 %v5269_v1, %v6684_v17  ;;  %v1756_v26 = vmul.f32 %v5270_v10, %v6687_v21  ;;  %v1757_v24 = vmul.f32 %v5271_v38, %v6690_v19  ;;  %9383 = vst [vmem:[#allocation158_spill] sm:$0xff] %v6723_v6  ;;  %v6725_v43 = vmul.f32 %v1751_v34, %v1751_v34  ;;  %v5272_v10 = vld [vmem:[%s5948_s14 + $0xd8] sm:$0xff]  ;;  %v5273_v19 = vld [vmem:[%s5948_s14 + $0xe0] sm:$0xff] }
 0x272   : > { %9382 = vst [vmem:[#allocation157_spill] sm:$0xff] %v6715_v57  ;;  %v6727_v37 = vmul.f32 %v1752_v54, %v1752_v54  ;;  %9384 = vst [vmem:[#allocation159_spill] sm:$0xff] %v6730_v29  ;;  %v6732_v13 = vadd.f32 %v1369_v16, %v1337_v27  ;;  %v6734_v58 = vadd.f32 %v3589_v31, %v3557_v23  ;;  %v6745_v54 = vld [vmem:[%s5938_s27 + $0xf0] sm:$0xff]  ;;  %v1072_v27 = vpop.f32.mrf.mxu0 }
 0x273   : > { %v6736_v1 = vmul.f32 %v1753_v28, %v1753_v28  ;;  %v6738_v57 = vmul.f32 %v1754_v8, %v1754_v8  ;;  %v1758_v38 = vmul.f32 %v5272_v10, %v6705_v30  ;;  %v1759_v34 = vmul.f32 %v5273_v19, %v6708_v22  ;;  %9389 = vst [vmem:[#allocation164_spill] sm:$0xff] %v6745_v54 }
 0x274   : > { %9385 = vst [vmem:[#allocation160_spill] sm:$0xff] %v6732_v13  ;;  %9386 = vst [vmem:[#allocation161_spill] sm:$0xff] %v6734_v58  ;;  %v1338_v23 = vmul.f32 %v6226_v52, %v6226_v52  ;;  %v3558_v28 = vmul.f32 %v6226_v52, %v6222_v46  ;;  %v1370_v8 = vmul.f32 %v1072_v27, %v1072_v27  ;;  %v5274_v58 = vld [vmem:[%s5948_s14 + $0xe8] sm:$0xff]  ;;  %v6765_v52 = vld [vmem:[%s5938_s27 + $0xf8] sm:$0xff] }
 0x275   : > { %9387 = vst [vmem:[#allocation162_spill] sm:$0xff] %v6736_v1  ;;  %9388 = vst [vmem:[#allocation163_spill] sm:$0xff] %v6738_v57  ;;  %v3590_v16 = vmul.f32 %v1072_v27, %v6723_v6  ;;  %v6752_v31 = vmul.f32 %v1755_v49, %v1755_v49  ;;  %v6754_v10 = vmul.f32 %v1756_v26, %v1756_v26  ;;  %v6760_v57 = vpop.f32.mrf.mxu0  ;;  %v5275_v1 = vld [vmem:[%s5948_s14 + $0xf0] sm:$0xff]  ;;  %v5276_v46 = vld [vmem:[%s5948_s14 + $0x100] sm:$0xff] }
 0x276   : > { %v6756_v19 = vmul.f32 %v1757_v24, %v1757_v24  ;;  %v1760_v13 = vmul.f32 %v5274_v58, %v6730_v29  ;;  %9391 = vst [vmem:[#allocation166_spill] sm:$0xff] %v6760_v57  ;;  %v1761_v22 = vmul.f32 %v5275_v1, %v6745_v54  ;;  %9392 = vst [vmem:[#allocation167_spill] sm:$0xff] %v6765_v52  ;;  %v5277_v6 = vld [vmem:[%s5948_s14 + $0x108] sm:$0xff]  ;;  %v5278_v1 = vld [vmem:[%s5948_s14 + $0x110] sm:$0xff] }
 0x277   : > { %v1763_v49 = vmul.f32 %v5276_v46, %v6480_v47  ;;  %v6769_v27 = vadd.f32 %v1370_v8, %v1338_v23  ;;  %v6771_v26 = vadd.f32 %v3590_v16, %v3558_v28  ;;  %v6773_v24 = vmul.f32 %v1758_v38, %v1758_v38  ;;  %v1078_v29 = vpop.f32.mrf.mxu0  ;;  %v9396_v23 = vld [vmem:[#allocation59_spill] sm:$0xff] }
 0x278   : > { %9390 = vst [vmem:[#allocation165_spill] sm:$0xff] %v6756_v19  ;;  %v6775_v58 = vmul.f32 %v1759_v34, %v1759_v34  ;;  %v1764_v19 = vmul.f32 %v5277_v6, %v6483_v39  ;;  %v1765_v54 = vmul.f32 %v5278_v1, %v6486_v14  ;;  %v1339_v46 = vmul.f32 %v6232_v61, %v6232_v61  ;;  %v5279_v34 = vld [vmem:[%s5948_s14 + $0xf8] sm:$0xff] }
 0x279   : > { %9393 = vst [vmem:[#allocation168_spill] sm:$0xff] %v6769_v27  ;;  %9394 = vst [vmem:[#allocation169_spill] sm:$0xff] %v6771_v26  ;;  %v3559_v8 = vmul.f32 %v6232_v61, %v9396_v23  ;;  %v1371_v28 = vmul.f32 %v1078_v29, %v1078_v29  ;;  %v3591_v38 = vmul.f32 %v1078_v29, %v6760_v57  ;;  %v5280_v26 = vld [vmem:[%s5948_s14 + $0x118] sm:$0xff]  ;;  %v5281_v27 = vld [vmem:[%s5948_s14 + $0x120] sm:$0xff] }
 0x27a   : > { %9395 = vst [vmem:[#allocation170_spill] sm:$0xff] %v6775_v58  ;;  %v6786_v16 = vmul.f32 %v1760_v13, %v1760_v13  ;;  %v1762_v6 = vmul.f32 %v5279_v34, %v6765_v52  ;;  %v1766_v1 = vmul.f32 %v5280_v26, %v6489_v12  ;;  %v1767_v14 = vmul.f32 %v5281_v27, %v6503_v56  ;;  %v6794_v58 = vpop.f32.mrf.mxu0  ;;  %v5283_v26 = vld [vmem:[%s5948_s14 + $0x130] sm:$0xff] }
 0x27b   : > { %9398 = vst [vmem:[#allocation172_spill] sm:$0xff] %v6794_v58  ;;  %v6796_v39 = vmul.f32 %v1761_v22, %v1761_v22  ;;  %v1859_v61 = vmul.f32 %v1763_v49, %v1763_v49  ;;  %v6798_v23 = vadd.f32 %v1371_v28, %v1339_v46  ;;  %v6800_v29 = vadd.f32 %v3591_v38, %v3559_v8  ;;  %v9401_v56 = vld [vmem:[#allocation61_spill] sm:$0xff]  ;;  %v9402_v52 = vld [vmem:[#allocation60_spill] sm:$0xff] }
 0x27c   : > { %9397 = vst [vmem:[#allocation171_spill] sm:$0xff] %v6786_v16  ;;  %v1860_v13 = vmul.f32 %v1764_v19, %v1764_v19  ;;  %v1861_v57 = vmul.f32 %v1765_v54, %v1765_v54  ;;  %v5282_v16 = vld [vmem:[%s5948_s14 + $0x128] sm:$0xff]  ;;  %v1769_v12 = vmul.f32 %v5283_v26, %v6509_v59  ;;  %v1084_v27 = vpop.f32.mrf.mxu0  ;;  %v1340_v22 = vmul.f32 %v9401_v56, %v9401_v56  ;;  %v5284_v38 = vld [vmem:[%s5948_s14 + $0x138] sm:$0xff] }
 0x27d   : > { %9399 = vst [vmem:[#allocation173_spill] sm:$0xff] %v6798_v23  ;;  %9400 = vst [vmem:[#allocation174_spill] sm:$0xff] %v6800_v29  ;;  %v1768_v34 = vmul.f32 %v5282_v16, %v6506_v5  ;;  %v3560_v49 = vmul.f32 %v9401_v56, %v9402_v52  ;;  %v1372_v46 = vmul.f32 %v1084_v27, %v1084_v27  ;;  %v5285_v23 = vld [vmem:[%s5948_s14 + $0x140] sm:$0xff] }
 0x27e   : > { %v3592_v8 = vmul.f32 %v1084_v27, %v6794_v58  ;;  %v6811_v28 = vmul.f32 %v1762_v6, %v1762_v6  ;;  %v1862_v54 = vmul.f32 %v1766_v1, %v1766_v1  ;;  %v1863_v19 = vmul.f32 %v1767_v14, %v1767_v14  ;;  %v6815_v29 = vpop.f32.mrf.mxu0  ;;  %v9407_v58 = vld [vmem:[#allocation62_spill] sm:$0xff] }
 0x27f   : > { %v1770_v16 = vmul.f32 %v5284_v38, %v6520_v33  ;;  %9404 = vst [vmem:[#allocation175_spill] sm:$0xff] %v6815_v29  ;;  %v6818_v26 = vadd.f32 %v1859_v61, %v6538_v20  ;;  %v1771_v59 = vmul.f32 %v5285_v23, %v6523_v3  ;;  %v6822_v56 = vadd.f32 %v1372_v46, %v1340_v22  ;;  %v9406_v20 = vld [vmem:[#allocation63_spill] sm:$0xff] }
 0x280   : > { %9403 = vst [vmem:[#allocation61_spill] sm:$0xff] %v6811_v28  ;;  %v6824_v52 = vadd.f32 %v3592_v8, %v3560_v49  ;;  %v6827_v6 = vadd.f32 %v1860_v13, %v6540_v18  ;;  %v6830_v14 = vadd.f32 %v1861_v57, %v6549_v60  ;;  %v1864_v1 = vmul.f32 %v1768_v34, %v1768_v34  ;;  %v1090_v38 = vpop.f32.mrf.mxu0  ;;  %v5287_v8 = vld [vmem:[%s5948_s14 + $0x150] sm:$0xff] }
 0x281   : > { %v1865_v27 = vmul.f32 %v1769_v12, %v1769_v12  ;;  %v1341_v61 = vmul.f32 %v9406_v20, %v9406_v20  ;;  %v3561_v23 = vmul.f32 %v9406_v20, %v9407_v58  ;;  %v1373_v22 = vmul.f32 %v1090_v38, %v1090_v38  ;;  %v5286_v12 = vld [vmem:[%s5948_s14 + $0x148] sm:$0xff] }
 0x282   : > { %9405 = vst [vmem:[#allocation176_spill] sm:$0xff] %v6824_v52  ;;  %v3593_v49 = vmul.f32 %v1090_v38, %v6815_v29  ;;  %v6838_v18 = vadd.f32 %v1862_v54, %v6551_v25  ;;  %v6841_v60 = vadd.f32 %v1863_v19, %v6574_v2  ;;  %v1866_v57 = vmul.f32 %v1770_v16, %v1770_v16  ;;  %v6845_v34 = vpop.f32.mrf.mxu0  ;;  %v5288_v54 = vld [vmem:[%s5948_s14 + $0x158] sm:$0xff]  ;;  %v5289_v16 = vld [vmem:[%s5948_s14 + $0x160] sm:$0xff]  ;;  %v9441_v28 = vld [vmem:[#allocation148_spill] sm:$0xff] }
 0x283   : > { %v1772_v13 = vmul.f32 %v5286_v12, %v6543_v62  ;;  %9408 = vst [vmem:[#allocation63_spill] sm:$0xff] %v6845_v34  ;;  %v1867_v46 = vmul.f32 %v1771_v59, %v1771_v59  ;;  %v1773_v20 = vmul.f32 %v5287_v8, %v6558_v4  ;;  %v6849_v58 = vadd.f32 %v1373_v22, %v1341_v61  ;;  %v9410_v4 = vld [vmem:[#allocation65_spill] sm:$0xff]  ;;  %v9411_v22 = vld [vmem:[#allocation64_spill] sm:$0xff] }
 0x284   : > { %v6851_v38 = vadd.f32 %v3593_v49, %v3561_v23  ;;  %v6854_v25 = vadd.f32 %v1864_v1, %v6576_v48  ;;  %v6857_v2 = vadd.f32 %v1865_v27, %v6578_v11  ;;  %v1774_v19 = vmul.f32 %v5288_v54, %v6561_v42  ;;  %v1096_v12 = vpop.f32.mrf.mxu0  ;;  %v5290_v42 = vld [vmem:[%s5948_s14 + $0x168] sm:$0xff]  ;;  %v9436_v52 = vld [vmem:[#allocation73_spill] sm:$0xff] }
 0x285   : > { %v1775_v59 = vmul.f32 %v5289_v16, %v6564_v41  ;;  %v1342_v61 = vmul.f32 %v9410_v4, %v9410_v4  ;;  %v3562_v23 = vmul.f32 %v9410_v4, %v9411_v22  ;;  %v1374_v49 = vmul.f32 %v1096_v12, %v1096_v12  ;;  %v5291_v41 = vld [vmem:[%s5948_s14 + $0x170] sm:$0xff] }
 0x286   : > { %9409 = vst [vmem:[#allocation177_spill] sm:$0xff] %v6851_v38  ;;  %v3594_v48 = vmul.f32 %v1096_v12, %v6845_v34  ;;  %v6869_v11 = vadd.f32 %v1866_v57, %v6603_v44  ;;  %v1868_v1 = vmul.f32 %v1772_v13, %v1772_v13  ;;  %v1776_v27 = vmul.f32 %v5290_v42, %v6567_v15  ;;  %v6875_v54 = vpop.f32.mrf.mxu0  ;;  %v5292_v13 = vld [vmem:[%s5948_s14 + $0x178] sm:$0xff]  ;;  %v5293_v42 = vld [vmem:[%s5948_s14 + $0x180] sm:$0xff] }
 0x287   : > { %v1777_v8 = vmul.f32 %v5291_v41, %v6583_v51  ;;  %9412 = vst [vmem:[#allocation65_spill] sm:$0xff] %v6875_v54  ;;  %v6878_v16 = vadd.f32 %v1867_v46, %v6605_v32  ;;  %v1869_v4 = vmul.f32 %v1773_v20, %v1773_v20  ;;  %v6880_v22 = vadd.f32 %v1374_v49, %v1342_v61  ;;  %v9414_v34 = vld [vmem:[#allocation67_spill] sm:$0xff]  ;;  %v9415_v46 = vld [vmem:[#allocation66_spill] sm:$0xff] }
 0x288   : > { %v6882_v12 = vadd.f32 %v3594_v48, %v3562_v23  ;;  %v1870_v44 = vmul.f32 %v1774_v19, %v1774_v19  ;;  %v1871_v57 = vmul.f32 %v1775_v59, %v1775_v59  ;;  %v1778_v15 = vmul.f32 %v5292_v13, %v6592_v50  ;;  %v1102_v41 = vpop.f32.mrf.mxu0  ;;  %v5294_v48 = vld [vmem:[%s5948_s14 + $0x188] sm:$0xff] }
 0x289   : > { %v1779_v51 = vmul.f32 %v5293_v42, %v6595_v63  ;;  %v1343_v32 = vmul.f32 %v9414_v34, %v9414_v34  ;;  %v3563_v20 = vmul.f32 %v9414_v34, %v9415_v46  ;;  %v1375_v61 = vmul.f32 %v1102_v41, %v1102_v41  ;;  %v5295_v42 = vld [vmem:[%s5948_s14 + $0x190] sm:$0xff] }
 0x28a   : > { %9413 = vst [vmem:[#allocation178_spill] sm:$0xff] %v6882_v12  ;;  %v3595_v23 = vmul.f32 %v1102_v41, %v6875_v54  ;;  %v6894_v19 = vadd.f32 %v1868_v1, %v6623_v35  ;;  %v1872_v59 = vmul.f32 %v1776_v27, %v1776_v27  ;;  %v1873_v49 = vmul.f32 %v1777_v8, %v1777_v8  ;;  %v6898_v13 = vpop.f32.mrf.mxu0  ;;  %v9432_v12 = vld [vmem:[#allocation155_spill] sm:$0xff] }
 0x28b   : > { %v1780_v50 = vmul.f32 %v5294_v48, %v6613_v53  ;;  %9416 = vst [vmem:[#allocation67_spill] sm:$0xff] %v6898_v13  ;;  %v6901_v63 = vadd.f32 %v1869_v4, %v6633_v7  ;;  %v1781_v34 = vmul.f32 %v5295_v42, %v6616_v36  ;;  %v6905_v46 = vadd.f32 %v1375_v61, %v1343_v32  ;;  %v9418_v7 = vld [vmem:[#allocation69_spill] sm:$0xff]  ;;  %v9419_v48 = vld [vmem:[#allocation68_spill] sm:$0xff]  ;;  %v5297_v42 = vld [vmem:[%s5948_s14 + $0x1c0] sm:$0xff] }
 0x28c   : > { %v6907_v41 = vadd.f32 %v3595_v23, %v3563_v20  ;;  %v6910_v35 = vadd.f32 %v1870_v44, %v6635_v40  ;;  %v6913_v1 = vadd.f32 %v1871_v57, %v6644_v55  ;;  %v1874_v53 = vmul.f32 %v1778_v15, %v1778_v15  ;;  %v1108_v8 = vpop.f32.mrf.mxu0  ;;  %v5296_v57 = vld [vmem:[%s5948_s14 + $0x198] sm:$0xff] }
 0x28d   : > { %v1875_v27 = vmul.f32 %v1779_v51, %v1779_v51  ;;  %v1344_v4 = vmul.f32 %v9418_v7, %v9418_v7  ;;  %v3564_v36 = vmul.f32 %v9418_v7, %v9419_v48  ;;  %v1376_v32 = vmul.f32 %v1108_v8, %v1108_v8  ;;  %v9420_v15 = vld [vmem:[#allocation142_spill] sm:$0xff] }
 0x28e   : > { %9417 = vst [vmem:[#allocation179_spill] sm:$0xff] %v6907_v41  ;;  %v3596_v20 = vmul.f32 %v1108_v8, %v6898_v13  ;;  %v6921_v40 = vadd.f32 %v1872_v59, %v6646_v45  ;;  %v6924_v55 = vadd.f32 %v1873_v49, %v6669_v9  ;;  %v1876_v44 = vmul.f32 %v1780_v50, %v1780_v50  ;;  %v6928_v61 = vpop.f32.mrf.mxu0  ;;  %v9423_v45 = vld [vmem:[#allocation149_spill] sm:$0xff]  ;;  %v9424_v9 = vld [vmem:[#allocation150_spill] sm:$0xff]  ;;  %v5299_v13 = vld [vmem:[%s5948_s14 + $0x1a8] sm:$0xff] }
 0x28f   : > { %v1782_v51 = vmul.f32 %v5296_v57, %v9420_v15  ;;  %9421 = vst [vmem:[#allocation69_spill] sm:$0xff] %v6928_v61  ;;  %v1877_v23 = vmul.f32 %v1781_v34, %v1781_v34  ;;  %v1787_v7 = vmul.f32 %v5297_v42, %v6684_v17  ;;  %v6932_v48 = vadd.f32 %v1376_v32, %v1344_v4  ;;  %v5298_v50 = vld [vmem:[%s5948_s14 + $0x1a0] sm:$0xff]  ;;  %v9425_v57 = vld [vmem:[#allocation145_spill] sm:$0xff] }
 0x290   : > { %v6934_v8 = vadd.f32 %v3596_v20, %v3564_v36  ;;  %v6937_v59 = vadd.f32 %v1874_v53, %v9423_v45  ;;  %v6940_v49 = vadd.f32 %v1875_v27, %v9424_v9  ;;  %v1783_v15 = vmul.f32 %v5298_v50, %v9425_v57  ;;  %v9426_v34 = vld [vmem:[#allocation146_spill] sm:$0xff]  ;;  %v1114_v54 = vpop.f32.mrf.mxu0  ;;  %v9427_v42 = vld [vmem:[#allocation71_spill] sm:$0xff]  ;;  %v5300_v9 = vld [vmem:[%s5948_s14 + $0x1b0] sm:$0xff] }
 0x291   : > { %v1784_v41 = vmul.f32 %v5299_v13, %v9426_v34  ;;  %v1345_v4 = vmul.f32 %v9427_v42, %v9427_v42  ;;  %v9428_v32 = vld [vmem:[#allocation70_spill] sm:$0xff]  ;;  %v1377_v20 = vmul.f32 %v1114_v54, %v1114_v54  ;;  %v3597_v53 = vmul.f32 %v1114_v54, %v6928_v61  ;;  %v9430_v50 = vld [vmem:[#allocation147_spill] sm:$0xff]  ;;  %v9435_v61 = vld [vmem:[#allocation152_spill] sm:$0xff] }
 0x292   : > { %9422 = vst [vmem:[#allocation142_spill] sm:$0xff] %v6934_v8  ;;  %v3565_v36 = vmul.f32 %v9427_v42, %v9428_v32  ;;  %v6952_v27 = vadd.f32 %v1876_v44, %v6696_v0  ;;  %v1878_v45 = vmul.f32 %v1782_v51, %v1782_v51  ;;  %v1785_v57 = vmul.f32 %v5300_v9, %v9430_v50  ;;  %v5301_v13 = vld [vmem:[%s5948_s14 + $0x1c8] sm:$0xff]  ;;  %v6958_v8 = vpop.f32.mrf.mxu0  ;;  %v5302_v51 = vld [vmem:[%s5948_s14 + $0x2c0] sm:$0xff]  ;;  %v5303_v50 = vld [vmem:[%s5948_s14 + $0x1d0] sm:$0xff] }
 0x293   : > { %v1788_v34 = vmul.f32 %v5301_v13, %v6687_v21  ;;  %9431 = vst [vmem:[#allocation150_spill] sm:$0xff] %v6958_v8  ;;  %v6961_v38 = vadd.f32 %v1877_v23, %v9432_v12  ;;  %v1883_v42 = vmul.f32 %v1787_v7, %v1787_v7  ;;  %v6963_v32 = vadd.f32 %v1377_v20, %v1345_v4  ;;  %v9437_v23 = vld [vmem:[#allocation72_spill] sm:$0xff] }
 0x294   : > { %9429 = vst [vmem:[#allocation149_spill] sm:$0xff] %v6952_v27  ;;  %v6965_v54 = vadd.f32 %v3597_v53, %v3565_v36  ;;  %v1879_v0 = vmul.f32 %v1783_v15, %v1783_v15  ;;  %v1880_v44 = vmul.f32 %v1784_v41, %v1784_v41  ;;  %v1819_v9 = vmul.f32 %v5302_v51, %v6684_v17  ;;  %v1120_v29 = vpop.f32.mrf.mxu0  ;;  %v9438_v15 = vld [vmem:[#allocation157_spill] sm:$0xff]  ;;  %v5304_v53 = vld [vmem:[%s5948_s14 + $0x2c8] sm:$0xff] }
 0x295   : > { %9433 = vst [vmem:[#allocation145_spill] sm:$0xff] %v6961_v38  ;;  %v1789_v13 = vmul.f32 %v5303_v50, %v9435_v61  ;;  %v1346_v12 = vmul.f32 %v9436_v52, %v9436_v52  ;;  %v3566_v7 = vmul.f32 %v9436_v52, %v9437_v23  ;;  %v1378_v4 = vmul.f32 %v1120_v29, %v1120_v29 }
 0x296   : > { %9434 = vst [vmem:[#allocation146_spill] sm:$0xff] %v6965_v54  ;;  %v3598_v36 = vmul.f32 %v1120_v29, %v6958_v8  ;;  %v6977_v41 = vadd.f32 %v1878_v45, %v9438_v15  ;;  %v1881_v20 = vmul.f32 %v1785_v57, %v1785_v57  ;;  %v1884_v17 = vmul.f32 %v1788_v34, %v1788_v34  ;;  %v6981_v50 = vpop.f32.mrf.mxu0  ;;  %v5305_v54 = vld [vmem:[%s5948_s14 + $0x1b8] sm:$0xff]  ;;  %v5306_v57 = vld [vmem:[%s5948_s14 + $0x2d0] sm:$0xff] }
 0x297   : > { %v1820_v51 = vmul.f32 %v5304_v53, %v6687_v21  ;;  %9440 = vst [vmem:[#allocation147_spill] sm:$0xff] %v6981_v50  ;;  %v1786_v38 = vmul.f32 %v5305_v54, %v9441_v28  ;;  %v1915_v52 = vadd.f32 %v1883_v42, %v6752_v31  ;;  %v6986_v23 = vadd.f32 %v1378_v4, %v1346_v12  ;;  %v5307_v8 = vld [vmem:[%s5948_s14 + $0x1d8] sm:$0xff]  ;;  %v9445_v12 = vld [vmem:[#allocation156_spill] sm:$0xff]  ;;  %v9446_v4 = vld [vmem:[#allocation159_spill] sm:$0xff] }
 0x298   : > { %9439 = vst [vmem:[#allocation71_spill] sm:$0xff] %v6977_v41  ;;  %v6988_v29 = vadd.f32 %v3598_v36, %v3566_v7  ;;  %v1947_v45 = vmul.f32 %v1819_v9, %v1819_v9  ;;  %v1885_v15 = vmul.f32 %v1789_v13, %v1789_v13  ;;  %v1821_v34 = vmul.f32 %v5306_v57, %v9435_v61  ;;  %v1126_v53 = vpop.f32.mrf.mxu0  ;;  %v5308_v13 = vld [vmem:[%s5948_s14 + $0x1e0] sm:$0xff]  ;;  %v5309_v7 = vld [vmem:[%s5948_s14 + $0x1e8] sm:$0xff] }
 0x299   : > { %v1790_v21 = vmul.f32 %v5307_v8, %v6705_v30  ;;  %v6995_v41 = vadd.f32 %v1879_v0, %v6725_v43  ;;  %v6998_v31 = vadd.f32 %v1880_v44, %v6727_v37  ;;  %v1411_v28 = vmul.f32 %v1126_v53, %v1126_v53  ;;  %v9448_v43 = vld [vmem:[#allocation162_spill] sm:$0xff]  ;;  %v9449_v44 = vld [vmem:[#allocation76_spill] sm:$0xff] }
 0x29a   : > { %9442 = vst [vmem:[#allocation155_spill] sm:$0xff] %v6988_v29  ;;  %v3631_v42 = vmul.f32 %v1126_v53, %v6981_v50  ;;  %v1916_v54 = vadd.f32 %v1884_v17, %v6754_v10  ;;  %v1948_v9 = vmul.f32 %v1820_v51, %v1820_v51  ;;  %v1791_v61 = vmul.f32 %v5308_v13, %v9445_v12  ;;  %v7006_v36 = vpop.f32.mrf.mxu0  ;;  %v9450_v53 = vld [vmem:[#allocation77_spill] sm:$0xff] }
 0x29b   : > { %9443 = vst [vmem:[#allocation152_spill] sm:$0xff] %v6995_v41  ;;  %9444 = vst [vmem:[#allocation73_spill] sm:$0xff] %v6998_v31  ;;  %v1792_v8 = vmul.f32 %v5309_v7, %v9446_v4  ;;  %v7009_v0 = vadd.f32 %v1881_v20, %v9448_v43  ;;  %v1882_v37 = vmul.f32 %v1786_v38, %v1786_v38  ;;  %v9452_v17 = vld [vmem:[#allocation165_spill] sm:$0xff]  ;;  %v5311_v43 = vld [vmem:[%s5948_s14 + $0x2e0] sm:$0xff] }
 0x29c   : > { %9447 = vst [vmem:[#allocation157_spill] sm:$0xff] %v7006_v36  ;;  %v1443_v57 = vadd.f32 %v1411_v28, %v9449_v44  ;;  %v7013_v29 = vadd.f32 %v3631_v42, %v9450_v53  ;;  %v1979_v10 = vadd.f32 %v1947_v45, %v1915_v52  ;;  %v1917_v51 = vadd.f32 %v1885_v15, %v9452_v17  ;;  %v1132_v31 = vpop.f32.mrf.mxu0  ;;  %v5310_v7 = vld [vmem:[%s5948_s14 + $0x2d8] sm:$0xff] }
 0x29d   : > { %v1949_v13 = vmul.f32 %v1821_v34, %v1821_v34  ;;  %v1886_v50 = vmul.f32 %v1790_v21, %v1790_v21  ;;  %v1822_v41 = vmul.f32 %v5310_v7, %v6705_v30  ;;  %v1412_v20 = vmul.f32 %v1132_v31, %v1132_v31  ;;  %v5312_v34 = vld [vmem:[%s5948_s14 + $0x2e8] sm:$0xff] }
 0x29e   : > { %9451 = vst [vmem:[#allocation148_spill] sm:$0xff] %v7013_v29  ;;  %v7018_v27 = vadd.f32 3e-10, %v1443_v57  ;;  %v3632_v38 = vmul.f32 %v1132_v31, %v7006_v36  ;;  %v1980_v28 = vadd.f32 %v1948_v9, %v1916_v54  ;;  %v1887_v42 = vmul.f32 %v1791_v61, %v1791_v61  ;;  %v7023_v15 = vpop.f32.mrf.mxu0  ;;  %v9454_v30 = vld [vmem:[#allocation79_spill] sm:$0xff]  ;;  %v9455_v57 = vld [vmem:[#allocation80_spill] sm:$0xff] }
 0x29f   : > { %v1823_v52 = vmul.f32 %v5311_v43, %v9445_v12  ;;  %v1888_v45 = vmul.f32 %v1792_v8, %v1792_v8  ;;  %9453 = vst [vmem:[#allocation156_spill] sm:$0xff] %v7023_v15  ;;  %v1824_v21 = vmul.f32 %v5312_v34, %v9446_v4  ;;  %v1444_v44 = vadd.f32 %v1412_v20, %v9454_v30  ;;  %v5313_v9 = vld [vmem:[%s5948_s14 + $0x200] sm:$0xff]  ;;  %v5314_v61 = vld [vmem:[%s5948_s14 + $0x208] sm:$0xff] }
 0x2a0   : > { %4989 = vrsqrt.f32 %v7018_v27  ;;  %v7030_v53 = vadd.f32 %v3632_v38, %v9455_v57  ;;  %v1981_v31 = vadd.f32 %v1949_v13, %v1917_v51  ;;  %v1918_v54 = vadd.f32 %v1886_v50, %v6773_v24  ;;  %v9457_v8 = vld [vmem:[#allocation126_spill] sm:$0xff]  ;;  %v1138_v7 = vpop.f32.mrf.mxu0  ;;  %v9459_v57 = vld [vmem:[#allocation171_spill] sm:$0xff]  ;;  %v5315_v13 = vld [vmem:[%s5948_s14 + $0x1f0] sm:$0xff] }
 0x2a1   : > { %v1795_v12 = vmul.f32 %v5313_v9, %v6480_v47  ;;  %v1796_v17 = vmul.f32 %v5314_v61, %v9457_v8  ;;  %v1950_v43 = vmul.f32 %v1822_v41, %v1822_v41  ;;  %v7037_v4 = vadd.f32 3e-10, %v1444_v44  ;;  %v9458_v30 = vld [vmem:[#allocation170_spill] sm:$0xff]  ;;  %v9460_v24 = vld [vmem:[#allocation164_spill] sm:$0xff]  ;;  %v9463_v44 = vld [vmem:[#allocation83_spill] sm:$0xff] }
 0x2a2   : > { %9456 = vst [vmem:[#allocation159_spill] sm:$0xff] %v7030_v53  ;;  %v1413_v34 = vmul.f32 %v1138_v7, %v1138_v7  ;;  %v3633_v20 = vmul.f32 %v1138_v7, %v7023_v15  ;;  %v1919_v36 = vadd.f32 %v1887_v42, %v9458_v30  ;;  %v1951_v38 = vmul.f32 %v1823_v52, %v1823_v52  ;;  %v7044_v53 = vpop.f32.mrf.mxu0  ;;  %v9462_v9 = vld [vmem:[#allocation82_spill] sm:$0xff]  ;;  %v9465_v8 = vld [vmem:[#allocation163_spill] sm:$0xff] }
 0x2a3   : > { %v1920_v51 = vadd.f32 %v1888_v45, %v9459_v57  ;;  %v1793_v50 = vmul.f32 %v5315_v13, %v9460_v24  ;;  %9461 = vst [vmem:[#allocation162_spill] sm:$0xff] %v7044_v53  ;;  %v1952_v47 = vmul.f32 %v1824_v21, %v1824_v21  ;;  %4991 = vrsqrt.f32 %v7037_v4 }
 0x2a4   : > { %v1445_v41 = vadd.f32 %v1413_v34, %v9462_v9  ;;  %v7049_v61 = vadd.f32 %v3633_v20, %v9463_v44  ;;  %v7052_v7 = vadd.f32 %v1882_v37, %v9465_v8  ;;  %v7054_v42 = vadd.f32 3e-10, %v1979_v10  ;;  %v1144_v30 = vpop.f32.mrf.mxu0 }
 0x2a5   : > { %v1923_v52 = vmul.f32 %v1795_v12, %v1795_v12  ;;  %v1924_v45 = vmul.f32 %v1796_v17, %v1796_v17  ;;  %v1982_v57 = vadd.f32 %v1950_v43, %v1918_v54  ;;  %v1414_v21 = vmul.f32 %v1144_v30, %v1144_v30  ;;  %v9468_v12 = vld [vmem:[#allocation85_spill] sm:$0xff]  ;;  %v9469_v17 = vld [vmem:[#allocation86_spill] sm:$0xff] }
 0x2a6   : > { %9464 = vst [vmem:[#allocation76_spill] sm:$0xff] %v7049_v61  ;;  %v7056_v13 = vadd.f32 3e-10, %v1445_v41  ;;  %v3634_v15 = vmul.f32 %v1144_v30, %v7044_v53  ;;  %v7059_v34 = vadd.f32 3e-10, %v1980_v28  ;;  %v1983_v9 = vadd.f32 %v1951_v38, %v1919_v36  ;;  %v7063_v44 = vpop.f32.mrf.mxu0  ;;  %v5316_v41 = vld [vmem:[%s5948_s14 + $0x2f0] sm:$0xff] }
 0x2a7   : > { %v7061_v20 = vadd.f32 3e-10, %v1981_v31  ;;  %v1889_v37 = vmul.f32 %v1793_v50, %v1793_v50  ;;  %9467 = vst [vmem:[#allocation165_spill] sm:$0xff] %v7063_v44  ;;  %v1984_v10 = vadd.f32 %v1952_v47, %v1920_v51  ;;  %v1446_v54 = vadd.f32 %v1414_v21, %v9468_v12  ;;  %v5317_v38 = vld [vmem:[%s5948_s14 + $0x210] sm:$0xff]  ;;  %v9471_v50 = vld [vmem:[#allocation127_spill] sm:$0xff] }
 0x2a8   : > { %4993 = vrsqrt.f32 %v7056_v13  ;;  %v7068_v43 = vadd.f32 %v3634_v15, %v9469_v17  ;;  %v1825_v28 = vmul.f32 %v5316_v41, %v9460_v24  ;;  %v1955_v31 = vadd.f32 %v1923_v52, %v6818_v26  ;;  %v1150_v51 = vpop.f32.mrf.mxu0  ;;  %v5318_v24 = vld [vmem:[%s5948_s14 + $0x1f8] sm:$0xff]  ;;  %v9474_v26 = vld [vmem:[#allocation167_spill] sm:$0xff] }
 0x2a9   : > { %9466 = vst [vmem:[#allocation77_spill] sm:$0xff] %v7061_v20  ;;  %v1956_v36 = vadd.f32 %v1924_v45, %v6827_v6  ;;  %v1797_v8 = vmul.f32 %v5317_v38, %v9471_v50  ;;  %v7076_v47 = vadd.f32 3e-10, %v1982_v57  ;;  %v7078_v30 = vadd.f32 3e-10, %v1446_v54  ;;  %v5319_v6 = vld [vmem:[%s5948_s14 + $0x218] sm:$0xff] }
 0x2aa   : > { %9470 = vst [vmem:[#allocation79_spill] sm:$0xff] %v7068_v43  ;;  %v1415_v21 = vmul.f32 %v1150_v51, %v1150_v51  ;;  %v3635_v15 = vmul.f32 %v1150_v51, %v7063_v44  ;;  %v7081_v12 = vadd.f32 3e-10, %v1983_v9  ;;  %v7084_v17 = vadd.f32 %v1889_v37, %v6796_v39  ;;  %v9475_v45 = vld [vmem:[#allocation128_spill] sm:$0xff]  ;;  %v7092_v38 = vpop.f32.mrf.mxu0  ;;  %v9479_v9 = vld [vmem:[#allocation89_spill] sm:$0xff] }
 0x2ab   : > { %9472 = vst [vmem:[#allocation80_spill] sm:$0xff] %v7076_v47  ;;  %v7088_v52 = vmul.f32 %v5318_v24, %v9474_v26  ;;  %v1798_v41 = vmul.f32 %v5319_v6, %v9475_v45  ;;  %9476 = vst [vmem:[#allocation170_spill] sm:$0xff] %v7092_v38  ;;  %v7094_v57 = vadd.f32 3e-10, %v1984_v10  ;;  %4995 = vrsqrt.f32 %v7078_v30  ;;  %v9478_v54 = vld [vmem:[#allocation88_spill] sm:$0xff]  ;;  %v7167_v47 = vpop.f32.mrf.mxu1 }
 0x2ac   : > { %9473 = vst [vmem:[#allocation126_spill] sm:$0xff] %v7081_v12  ;;  %v1447_v50 = vadd.f32 %v1415_v21, %v9478_v54  ;;  %v7099_v51 = vadd.f32 %v3635_v15, %v9479_v9  ;;  %v7101_v37 = vmul.f32 %v1825_v28, %v1825_v28  ;;  %v7103_v43 = vadd.f32 3e-10, %v1955_v31  ;;  %v1156_v6 = vpop.f32.mrf.mxu0  ;;  %v9482_v31 = vld [vmem:[#allocation91_spill] sm:$0xff]  ;;  %9496 = vst [vmem:[#allocation167_spill] sm:$0xff] %v7167_v47 }
 0x2ad   : > { %9477 = vst [vmem:[#allocation171_spill] sm:$0xff] %v7094_v57  ;;  %v4990_v39 = vpop.eup %4989  ;;  %v7105_v24 = vadd.f32 3e-10, %v1956_v36  ;;  %v1925_v26 = vmul.f32 %v1797_v8, %v1797_v8  ;;  %v1416_v10 = vmul.f32 %v1156_v6, %v1156_v6  ;;  %v3636_v44 = vmul.f32 %v1156_v6, %v7092_v38  ;;  %v9483_v8 = vld [vmem:[#allocation92_spill] sm:$0xff]  ;;  %v9485_v38 = vld [vmem:[#allocation130_spill] sm:$0xff] }
 0x2ae   : > { %9480 = vst [vmem:[#allocation164_spill] sm:$0xff] %v7099_v51  ;;  %v7107_v45 = vadd.f32 3e-10, %v1447_v50  ;;  %v1508_v21 = vmul.f32 %v4990_v39, %v7018_v27  ;;  %v1926_v54 = vmul.f32 %v1798_v41, %v1798_v41  ;;  %v7111_v15 = vpop.f32.mrf.mxu0  ;;  %vm1509_vm0 = vcmp.eq.f32.partialorder %v7018_v27, inf  ;;  %v5320_v39 = vld [vmem:[%s5948_s14 + $0x220] sm:$0xff] }
 0x2af   : > { %9481 = vst [vmem:[#allocation82_spill] sm:$0xff] %v7111_v15  ;;  %vm1511_vm1 = vcmp.eq.f32.partialorder %v7018_v27, 0.0  ;;  %v1512_v28 = vand.u32 2147483648, %v7018_v27  ;;  %v1448_v36 = vadd.f32 %v1416_v10, %v9482_v31  ;;  %v7119_v50 = vadd.f32 %v3636_v44, %v9483_v8  ;;  %v2255_v12 = vld [vmem:[#allocation8 + $0x60] sm:$0xff] }
 0x2b0   : > { %4997 = vrsqrt.f32 %v7107_v45  ;;  %v1510_v9 = vsel %vm1509_vm0, %v7018_v27, %v1508_v21  ;;  %v4992_v6 = vpop.eup %4991  ;;  %v1957_v41 = vadd.f32 %v1925_v26, %v6830_v14  ;;  %v1799_v51 = vmul.f32 %v5320_v39, %v9485_v38  ;;  %v1162_v53 = vpop.f32.mrf.mxu0  ;;  %v9487_v38 = vld [vmem:[#allocation94_spill] sm:$0xff]  ;;  %v2257_v39 = vld [vmem:[#allocation8 + $0x70] sm:$0xff] }
 0x2b1   : > { %9484 = vst [vmem:[#allocation83_spill] sm:$0xff] %v7119_v50  ;;  %4999 = vrsqrt.f32 %v7105_v24  ;;  %v1513_v61 = vsel %vm1511_vm1, %v1512_v28, %v1510_v9  ;;  %v7126_v29 = vadd.f32 3e-10, %v1448_v36  ;;  %v1417_v57 = vmul.f32 %v1162_v53, %v1162_v53  ;;  %v9488_v28 = vld [vmem:[#allocation95_spill] sm:$0xff] }
 0x2b2   : > { %v3637_v10 = vmul.f32 %v1162_v53, %v7111_v15  ;;  %4601 = vmatprep.mubr.f32.mxu1 %v1513_v61  ;;  %v1515_v44 = vmul.f32 %v4992_v6, %v7037_v4  ;;  %v1958_v27 = vadd.f32 %v1926_v54, %v6838_v18  ;;  %v7131_v21 = vpop.f32.mrf.mxu0  ;;  %vm1516_vm2 = vcmp.eq.f32.partialorder %v7037_v4, inf  ;;  %v5321_v54 = vld [vmem:[%s5948_s14 + $0x228] sm:$0xff] }
 0x2b3   : > { %9486 = vst [vmem:[#allocation163_spill] sm:$0xff] %v7131_v21  ;;  %vm1518_vm3 = vcmp.eq.f32.partialorder %v7037_v4, 0.0  ;;  %v1519_v14 = vand.u32 2147483648, %v7037_v4  ;;  %5001 = vrsqrt.f32 %v7126_v29  ;;  %v1449_v26 = vadd.f32 %v1417_v57, %v9487_v38 }
 0x2b4   : > { %v7139_v31 = vadd.f32 %v3637_v10, %v9488_v28  ;;  %v1517_v53 = vsel %vm1516_vm2, %v7037_v4, %v1515_v44  ;;  %v7142_v36 = vadd.f32 3e-10, %v1957_v41  ;;  %v1927_v18 = vmul.f32 %v1799_v51, %v1799_v51  ;;  %v1168_v9 = vpop.f32.mrf.mxu0  ;;  %v9491_v51 = vld [vmem:[#allocation140_spill] sm:$0xff] }
 0x2b5   : > { %v4994_v61 = vpop.eup %4993  ;;  %v1800_v8 = vmul.f32 %v5321_v54, %v6506_v5  ;;  %v1520_v6 = vsel %vm1518_vm3, %v1519_v14, %v1517_v53  ;;  %v7146_v50 = vadd.f32 3e-10, %v1449_v26  ;;  %v1418_v15 = vmul.f32 %v1168_v9, %v1168_v9  ;;  %v2256_v44 = vld [vmem:[#allocation8 + $0x68] sm:$0xff]  ;;  %v9492_v14 = vld [vmem:[#allocation97_spill] sm:$0xff]  ;;  %v9493_v26 = vld [vmem:[#allocation98_spill] sm:$0xff] }
 0x2b6   : > { %9489 = vst [vmem:[#allocation85_spill] sm:$0xff] %v7139_v31  ;;  %v3638_v57 = vmul.f32 %v1168_v9, %v7131_v21  ;;  %4602 = vmatmul.mubr.f32.vlgmr.msra.gmra.mxu1 %v1520_v6  ;;  %v1522_v10 = vmul.f32 %v4994_v61, %v7056_v13  ;;  %v7150_v4 = vadd.f32 3e-10, %v1958_v27  ;;  %v7152_v41 = vpop.f32.mrf.mxu0  ;;  %vm1523_vm4 = vcmp.eq.f32.partialorder %v7056_v13, inf  ;;  %v5322_v9 = vld [vmem:[%s5948_s14 + $0x230] sm:$0xff]  ;;  %v9495_v6 = vld [vmem:[#allocation131_spill] sm:$0xff] }
 0x2b7   : > { %9490 = vst [vmem:[#allocation86_spill] sm:$0xff] %v7152_v41  ;;  %vm1525_vm5 = vcmp.eq.f32.partialorder %v7056_v13, 0.0  ;;  %v1526_v5 = vand.u32 2147483648, %v7056_v13  ;;  %4650 = vmatpush3.msra.mxu1 %v9491_v51  ;;  %5003 = vrsqrt.f32 %v7146_v50  ;;  %v1450_v38 = vadd.f32 %v1418_v15, %v9492_v14  ;;  %v9498_v14 = vld [vmem:[#allocation100_spill] sm:$0xff] }
 0x2b8   : > { %v7161_v28 = vadd.f32 %v3638_v57, %v9493_v26  ;;  %v1524_v27 = vsel %vm1523_vm4, %v7056_v13, %v1522_v10  ;;  %4651 = vmatprep.subr.mxu1 %v2257_v39  ;;  %v4996_v53 = vpop.eup %4995  ;;  %v1959_v61 = vadd.f32 %v1927_v18, %v6841_v60  ;;  %v1928_v54 = vmul.f32 %v1800_v8, %v1800_v8  ;;  %v1174_v51 = vpop.f32.mrf.mxu0  ;;  %v5323_v60 = vld [vmem:[%s5948_s14 + $0x238] sm:$0xff] }
 0x2b9   : > { %v1801_v21 = vmul.f32 %v5322_v9, %v9495_v6  ;;  %v1527_v31 = vsel %vm1525_vm5, %v1526_v5, %v1524_v27  ;;  %4652 = vmatpush3.msra.mxu1 %v2257_v39  ;;  %v7169_v15 = vadd.f32 3e-10, %v1450_v38  ;;  %v1419_v57 = vmul.f32 %v1174_v51, %v1174_v51  ;;  %v2254_v5 = vld [vmem:[#allocation8 + $0x58] sm:$0xff] }
 0x2ba   : > { %9494 = vst [vmem:[#allocation127_spill] sm:$0xff] %v7161_v28  ;;  %v3639_v13 = vmul.f32 %v1174_v51, %v7152_v41  ;;  %4604 = vmatprep.mubr.f32.mxu1 %v1527_v31  ;;  %v1529_v10 = vmul.f32 %v4996_v53, %v7078_v30  ;;  %4653 = vmatprep.subr.mxu1 %v2256_v44  ;;  %v7175_v8 = vpop.f32.mrf.mxu0  ;;  %vm1530_vm6 = vcmp.eq.f32.partialorder %v7078_v30, inf  ;;  %vm1532_vm7 = vcmp.eq.f32.partialorder %v7078_v30, 0.0  ;;  %v9499_v38 = vld [vmem:[#allocation101_spill] sm:$0xff]  ;;  %v7191_v28 = vpop.f32.mrf.mxu1 }
 0x2bb   : > { %v1802_v18 = vmul.f32 %v5323_v60, %v6520_v33  ;;  %9497 = vst [vmem:[#allocation128_spill] sm:$0xff] %v7175_v8  ;;  %v1533_v39 = vand.u32 2147483648, %v7078_v30  ;;  %4654 = vmatpush3.msra.mxu1 %v2256_v44  ;;  %5005 = vrsqrt.f32 %v7169_v15  ;;  %v1451_v31 = vadd.f32 %v1419_v57, %v9498_v14  ;;  %v2253_v44 = vld [vmem:[#allocation8 + $0x50] sm:$0xff]  ;;  %9501 = vst [vmem:[#allocation89_spill] sm:$0xff] %v7191_v28 }
 0x2bc   : > { %v7183_v26 = vadd.f32 %v3639_v13, %v9499_v38  ;;  %v1531_v27 = vsel %vm1530_vm6, %v7078_v30, %v1529_v10  ;;  %4655 = vmatprep.subr.mxu1 %v2255_v12  ;;  %v7186_v53 = vadd.f32 3e-10, %v1959_v61  ;;  %v1960_v9 = vadd.f32 %v1928_v54, %v6854_v25  ;;  %v1180_v51 = vpop.f32.mrf.mxu0  ;;  %v2252_v54 = vld [vmem:[#allocation8 + $0x48] sm:$0xff]  ;;  %v7213_v41 = vpop.f32.mrf.mxu1 }
 0x2bd   : > { %v4998_v33 = vpop.eup %4997  ;;  %v1929_v6 = vmul.f32 %v1801_v21, %v1801_v21  ;;  %v1534_v60 = vsel %vm1532_vm7, %v1533_v39, %v1531_v27  ;;  %4656 = vmatpush3.msra.mxu1 %v2255_v12  ;;  %v7193_v57 = vadd.f32 3e-10, %v1451_v31  ;;  %v1420_v13 = vmul.f32 %v1180_v51, %v1180_v51  ;;  %v9503_v10 = vld [vmem:[#allocation103_spill] sm:$0xff]  ;;  %v9504_v14 = vld [vmem:[#allocation104_spill] sm:$0xff]  ;;  %9506 = vst [vmem:[#allocation130_spill] sm:$0xff] %v7213_v41 }
 0x2be   : > { %9500 = vst [vmem:[#allocation88_spill] sm:$0xff] %v7183_v26  ;;  %v7189_v47 = vpop.eup %4999  ;;  %v3640_v30 = vmul.f32 %v1180_v51, %v7175_v8  ;;  %4605 = vmatmul.mubr.f32.gmra.mxu1 %v1534_v60  ;;  %v1536_v61 = vmul.f32 %v4998_v33, %v7107_v45  ;;  %4657 = vmatprep.subr.mxu1 %v2254_v5  ;;  %v7197_v21 = vpop.f32.mrf.mxu0  ;;  %vm1537_vm8 = vcmp.eq.f32.partialorder %v7107_v45, inf  ;;  %vm1539_vm9 = vcmp.eq.f32.partialorder %v7107_v45, 0.0  ;;  %v5324_v51 = vld [vmem:[%s5948_s14 + $0x240] sm:$0xff] }
 0x2bf   : > { %v1930_v25 = vmul.f32 %v1802_v18, %v1802_v18  ;;  %9502 = vst [vmem:[#allocation91_spill] sm:$0xff] %v7197_v21  ;;  %v1540_v12 = vand.u32 2147483648, %v7107_v45  ;;  %4658 = vmatpush3.msra.mxu1 %v2254_v5  ;;  %5007 = vrsqrt.f32 %v7193_v57  ;;  %v1452_v39 = vadd.f32 %v1420_v13, %v9503_v10  ;;  %v2251_v26 = vld [vmem:[#allocation8 + $0x40] sm:$0xff]  ;;  %v7235_v41 = vpop.f32.mrf.mxu1 }
 0x2c0   : > { %v7205_v31 = vadd.f32 %v3640_v30, %v9504_v14  ;;  %v1538_v38 = vsel %vm1537_vm8, %v7107_v45, %v1536_v61  ;;  %4659 = vmatprep.subr.mxu1 %v2253_v44  ;;  %v5002_v18 = vpop.eup %5001  ;;  %v7208_v27 = vadd.f32 3e-10, %v1960_v9  ;;  %v1961_v33 = vadd.f32 %v1929_v6, %v6857_v2  ;;  %v1186_v5 = vpop.f32.mrf.mxu0  ;;  %v9508_v61 = vld [vmem:[#allocation106_spill] sm:$0xff]  ;;  %9511 = vst [vmem:[#allocation140_spill] sm:$0xff] %v7235_v41 }
 0x2c1   : > { %v1803_v60 = vmul.f32 %v5324_v51, %v6523_v3  ;;  %v1541_v8 = vsel %vm1539_vm9, %v1540_v12, %v1538_v38  ;;  %4660 = vmatpush3.msra.mxu1 %v2253_v44  ;;  %v7215_v13 = vadd.f32 3e-10, %v1452_v39  ;;  %v1421_v30 = vmul.f32 %v1186_v5, %v1186_v5  ;;  %v2250_v44 = vld [vmem:[#allocation8 + $0x38] sm:$0xff]  ;;  %v9509_v12 = vld [vmem:[#allocation107_spill] sm:$0xff] }
 0x2c2   : > { %9505 = vst [vmem:[#allocation92_spill] sm:$0xff] %v7205_v31  ;;  %v3641_v45 = vmul.f32 %v1186_v5, %v7197_v21  ;;  %4607 = vmatprep.mubr.f32.mxu1 %v1541_v8  ;;  %v1543_v9 = vmul.f32 %v5002_v18, %v7126_v29  ;;  %4661 = vmatprep.subr.mxu1 %v2252_v54  ;;  %v7220_v6 = vpop.f32.mrf.mxu0  ;;  %vm1544_vm10 = vcmp.eq.f32.partialorder %v7126_v29, inf  ;;  %vm1546_vm11 = vcmp.eq.f32.partialorder %v7126_v29, 0.0  ;;  %v5325_v38 = vld [vmem:[%s5948_s14 + $0x248] sm:$0xff]  ;;  %v2249_v5 = vld [vmem:[#allocation8 + $0x30] sm:$0xff] }
 0x2c3   : > { %v1962_v2 = vadd.f32 %v1930_v25, %v6869_v11  ;;  %9507 = vst [vmem:[#allocation94_spill] sm:$0xff] %v7220_v6  ;;  %v1547_v3 = vand.u32 2147483648, %v7126_v29  ;;  %4662 = vmatpush3.msra.mxu1 %v2252_v54  ;;  %5009 = vrsqrt.f32 %v7215_v13  ;;  %v1453_v8 = vadd.f32 %v1421_v30, %v9508_v61 }
 0x2c4   : > { %v7228_v10 = vadd.f32 %v3641_v45, %v9509_v12  ;;  %v1545_v39 = vsel %vm1544_vm10, %v7126_v29, %v1543_v9  ;;  %4663 = vmatprep.subr.mxu1 %v2251_v26  ;;  %v5004_v11 = vpop.eup %5003  ;;  %v7231_v25 = vadd.f32 3e-10, %v1961_v33  ;;  %v1931_v14 = vmul.f32 %v1803_v60, %v1803_v60  ;;  %v1192_v51 = vpop.f32.mrf.mxu0  ;;  %v2248_v60 = vld [vmem:[#allocation8 + $0x28] sm:$0xff]  ;;  %v9513_v9 = vld [vmem:[#allocation109_spill] sm:$0xff] }
 0x2c5   : > { %v1804_v18 = vmul.f32 %v5325_v38, %v6543_v62  ;;  %v1548_v54 = vsel %vm1546_vm11, %v1547_v3, %v1545_v39  ;;  %4664 = vmatpush3.msra.mxu1 %v2251_v26  ;;  %v7237_v30 = vadd.f32 3e-10, %v1453_v8  ;;  %v1422_v45 = vmul.f32 %v1192_v51, %v1192_v51  ;;  %v9514_v8 = vld [vmem:[#allocation110_spill] sm:$0xff] }
 0x2c6   : > { %9510 = vst [vmem:[#allocation95_spill] sm:$0xff] %v7228_v10  ;;  %v3642_v61 = vmul.f32 %v1192_v51, %v7220_v6  ;;  %4608 = vmatmul.mubr.f32.gmra.mxu1 %v1548_v54  ;;  %v1550_v29 = vmul.f32 %v5004_v11, %v7146_v50  ;;  %4665 = vmatprep.subr.mxu1 %v2250_v44  ;;  %v7241_v33 = vadd.f32 3e-10, %v1962_v2  ;;  %v7243_v62 = vpop.f32.mrf.mxu0  ;;  %vm1551_vm12 = vcmp.eq.f32.partialorder %v7146_v50, inf  ;;  %v5326_v51 = vld [vmem:[%s5948_s14 + $0x250] sm:$0xff] }
 0x2c7   : > { %9512 = vst [vmem:[#allocation97_spill] sm:$0xff] %v7243_v62  ;;  %vm1553_vm13 = vcmp.eq.f32.partialorder %v7146_v50, 0.0  ;;  %v1554_v26 = vand.u32 2147483648, %v7146_v50  ;;  %4666 = vmatpush3.msra.mxu1 %v2250_v44  ;;  %5011 = vrsqrt.f32 %v7237_v30  ;;  %v1454_v3 = vadd.f32 %v1422_v45, %v9513_v9  ;;  %v5327_v54 = vld [vmem:[%s5938_s27 + $0x50] sm:$0xff]  ;;  %v2247_v45 = vld [vmem:[#allocation8 + $0x20] sm:$0xff] }
 0x2c8   : > { %v7251_v12 = vadd.f32 %v3642_v61, %v9514_v8  ;;  %v1552_v2 = vsel %vm1551_vm12, %v7146_v50, %v1550_v29  ;;  %4667 = vmatprep.subr.mxu1 %v2249_v5  ;;  %v5006_v39 = vpop.eup %5005  ;;  %v1963_v11 = vadd.f32 %v1931_v14, %v6878_v16  ;;  %v1932_v38 = vmul.f32 %v1804_v18, %v1804_v18  ;;  %v1198_v6 = vpop.f32.mrf.mxu0  ;;  %v5328_v14 = vld [vmem:[%s5948_s14 + $0x258] sm:$0xff] }
 0x2c9   : > { %v1805_v44 = vmul.f32 %v5327_v54, %v5326_v51  ;;  %v1555_v10 = vsel %vm1553_vm13, %v1554_v26, %v1552_v2  ;;  %4668 = vmatpush3.msra.mxu1 %v2249_v5  ;;  %v7259_v61 = vpop.f32.mrf.mxu1  ;;  %v7261_v9 = vadd.f32 3e-10, %v1454_v3  ;;  %v1423_v29 = vmul.f32 %v1198_v6, %v1198_v6  ;;  %v5329_v18 = vld [vmem:[%s5938_s27 + $0x58] sm:$0xff] }
 0x2ca   : > { %9515 = vst [vmem:[#allocation98_spill] sm:$0xff] %v7251_v12  ;;  %9516 = vst [vmem:[#allocation131_spill] sm:$0xff] %v7259_v61  ;;  %v3643_v8 = vmul.f32 %v1198_v6, %v7243_v62  ;;  %4610 = vmatprep.mubr.f32.mxu1 %v1555_v10  ;;  %v1557_v16 = vmul.f32 %v5006_v39, %v7169_v15  ;;  %4669 = vmatprep.subr.mxu1 %v2248_v60  ;;  %v7267_v54 = vpop.f32.mrf.mxu0  ;;  %vm1558_vm14 = vcmp.eq.f32.partialorder %v7169_v15, inf  ;;  %v2246_v5 = vld [vmem:[#allocation8 + $0x18] sm:$0xff]  ;;  %v9518_v6 = vld [vmem:[#allocation112_spill] sm:$0xff] }
 0x2cb   : > { %v1806_v51 = vmul.f32 %v5329_v18, %v5328_v14  ;;  %9517 = vst [vmem:[#allocation100_spill] sm:$0xff] %v7267_v54  ;;  %vm1560_vm15 = vcmp.eq.f32.partialorder %v7169_v15, 0.0  ;;  %v1561_v50 = vand.u32 2147483648, %v7169_v15  ;;  %4670 = vmatpush3.msra.mxu1 %v2248_v60  ;;  %5013 = vrsqrt.f32 %v7261_v9  ;;  %v9519_v26 = vld [vmem:[#allocation113_spill] sm:$0xff]  ;;  %v7281_v31 = vpop.f32.mrf.mxu1 }
 0x2cc   : > { %v1455_v10 = vadd.f32 %v1423_v29, %v9518_v6  ;;  %v7275_v3 = vadd.f32 %v3643_v8, %v9519_v26  ;;  %v1559_v2 = vsel %vm1558_vm14, %v7169_v15, %v1557_v16  ;;  %4671 = vmatprep.subr.mxu1 %v2247_v45  ;;  %v5008_v39 = vpop.eup %5007  ;;  %v7278_v14 = vadd.f32 3e-10, %v1963_v11  ;;  %v1204_v12 = vpop.f32.mrf.mxu0  ;;  %v2245_v60 = vld [vmem:[#allocation8 + $0x10] sm:$0xff]  ;;  %9521 = vst [vmem:[#allocation103_spill] sm:$0xff] %v7281_v31  ;;  %v5330_v26 = vld [vmem:[%s5948_s14 + $0x260] sm:$0xff] }
 0x2cd   : > { %v1964_v18 = vadd.f32 %v1932_v38, %v6894_v19  ;;  %v1933_v61 = vmul.f32 %v1805_v44, %v1805_v44  ;;  %v1562_v62 = vsel %vm1560_vm15, %v1561_v50, %v1559_v2  ;;  %4672 = vmatpush3.msra.mxu1 %v2247_v45  ;;  %v1424_v29 = vmul.f32 %v1204_v12, %v1204_v12  ;;  %v2244_v44 = vld [vmem:[#allocation8 + $0x8] sm:$0xff]  ;;  %v5331_v2 = vld [vmem:[%s5938_s27 + $0x60] sm:$0xff] }
 0x2ce   : > { %9520 = vst [vmem:[#allocation101_spill] sm:$0xff] %v7275_v3  ;;  %v7283_v21 = vadd.f32 3e-10, %v1455_v10  ;;  %v3644_v8 = vmul.f32 %v1204_v12, %v7267_v54  ;;  %4611 = vmatmul.mubr.f32.gmra.mxu1 %v1562_v62  ;;  %v1564_v15 = vmul.f32 %v5008_v39, %v7193_v57  ;;  %4673 = vmatprep.subr.mxu1 %v2246_v5  ;;  %v7287_v19 = vpop.f32.mrf.mxu0  ;;  %vm1565_vm0 = vcmp.eq.f32.partialorder %v7193_v57, inf  ;;  %v9523_v12 = vld [vmem:[#allocation115_spill] sm:$0xff]  ;;  %v9524_v45 = vld [vmem:[#allocation116_spill] sm:$0xff] }
 0x2cf   : > { %v1934_v11 = vmul.f32 %v1806_v51, %v1806_v51  ;;  %9522 = vst [vmem:[#allocation104_spill] sm:$0xff] %v7287_v19  ;;  %vm1567_vm1 = vcmp.eq.f32.partialorder %v7193_v57, 0.0  ;;  %v1568_v38 = vand.u32 2147483648, %v7193_v57  ;;  %4674 = vmatpush3.msra.mxu1 %v2246_v5  ;;  %v1456_v62 = vadd.f32 %v1424_v29, %v9523_v12  ;;  %v2243_v29 = vld [vmem:[#allocation8] sm:$0xff]  ;;  %v7305_v12 = vpop.f32.mrf.mxu1 }
 0x2d0   : > { %5015 = vrsqrt.f32 %v7283_v21  ;;  %v7295_v16 = vadd.f32 %v3644_v8, %v9524_v45  ;;  %v1566_v51 = vsel %vm1565_vm0, %v7193_v57, %v1564_v15  ;;  %4675 = vmatprep.subr.mxu1 %v2245_v60  ;;  %v5010_v50 = vpop.eup %5009  ;;  %v7298_v6 = vadd.f32 3e-10, %v1964_v18  ;;  %v1210_v5 = vpop.f32.mrf.mxu0  ;;  %9526 = vst [vmem:[#allocation107_spill] sm:$0xff] %v7305_v12 }
 0x2d1   : > { %v1965_v10 = vadd.f32 %v1933_v61, %v6901_v63  ;;  %v1807_v39 = vmul.f32 %v5331_v2, %v5330_v26  ;;  %v1569_v54 = vsel %vm1567_vm1, %v1568_v38, %v1566_v51  ;;  %4676 = vmatpush3.msra.mxu1 %v2245_v60  ;;  %v7307_v8 = vadd.f32 3e-10, %v1456_v62  ;;  %v9528_v60 = vld [vmem:[#allocation118_spill] sm:$0xff]  ;;  %v9529_v38 = vld [vmem:[#allocation119_spill] sm:$0xff] }
 0x2d2   : > { %9525 = vst [vmem:[#allocation106_spill] sm:$0xff] %v7295_v16  ;;  %v1425_v15 = vmul.f32 %v1210_v5, %v1210_v5  ;;  %v3645_v45 = vmul.f32 %v1210_v5, %v7287_v19  ;;  %4613 = vmatprep.mubr.f32.mxu1 %v1569_v54  ;;  %v1571_v18 = vmul.f32 %v5010_v50, %v7215_v13  ;;  %v7312_v61 = vpop.f32.mrf.mxu0  ;;  %vm1572_vm2 = vcmp.eq.f32.partialorder %v7215_v13, inf  ;;  %v5332_v26 = vld [vmem:[%s5948_s14 + $0x268] sm:$0xff] }
 0x2d3   : > { %4677 = vmatprep.subr.mxu1 %v2244_v44  ;;  %v1966_v63 = vadd.f32 %v1934_v11, %v6910_v35  ;;  %9527 = vst [vmem:[#allocation109_spill] sm:$0xff] %v7312_v61  ;;  %vm1574_vm3 = vcmp.eq.f32.partialorder %v7215_v13, 0.0  ;;  %v1575_v57 = vand.u32 2147483648, %v7215_v13  ;;  %5017 = vrsqrt.f32 %v7307_v8  ;;  %v5333_v2 = vld [vmem:[%s5938_s27 + $0x68] sm:$0xff] }
 0x2d4   : > { %4678 = vmatpush3.msra.mxu1 %v2244_v44  ;;  %v1457_v54 = vadd.f32 %v1425_v15, %v9528_v60  ;;  %v7320_v62 = vadd.f32 %v3645_v45, %v9529_v38  ;;  %v1573_v51 = vsel %vm1572_vm2, %v7215_v13, %v1571_v18  ;;  %v5012_v35 = vpop.eup %5011  ;;  %v7323_v11 = vadd.f32 3e-10, %v1965_v10  ;;  %v1216_v12 = vpop.f32.mrf.mxu0  ;;  %v9533_v18 = vld [vmem:[#allocation121_spill] sm:$0xff]  ;;  %v9534_v60 = vld [vmem:[#allocation122_spill] sm:$0xff] }
 0x2d5   : > { %4679 = vmatprep.subr.mxu1 %v2243_v29  ;;  %v1935_v50 = vmul.f32 %v1807_v39, %v1807_v39  ;;  %v1808_v5 = vmul.f32 %v5333_v2, %v5332_v26  ;;  %v1576_v16 = vsel %vm1574_vm3, %v1575_v57, %v1573_v51  ;;  %v7327_v44 = vpop.f32.mrf.mxu1  ;;  %v1426_v15 = vmul.f32 %v1216_v12, %v1216_v12  ;;  %v5334_v51 = vld [vmem:[%s5948_s14 + $0x270] sm:$0xff] }
 0x2d6   : > { %9530 = vst [vmem:[#allocation110_spill] sm:$0xff] %v7320_v62  ;;  %4680 = vmatpush3.msra.mxu1 %v2243_v29  ;;  %9531 = vst [vmem:[#allocation112_spill] sm:$0xff] %v7327_v44  ;;  %v7329_v19 = vadd.f32 3e-10, %v1457_v54  ;;  %v3646_v45 = vmul.f32 %v1216_v12, %v7312_v61  ;;  %v1578_v13 = vmul.f32 %v5012_v35, %v7237_v30  ;;  %v7333_v10 = vadd.f32 3e-10, %v1966_v63  ;;  %v7335_v39 = vpop.f32.mrf.mxu0 }
 0x2d7   : > { %4614 = vmatmul.mubr.f32.gmra.mxu1 %v1576_v16  ;;  %9532 = vst [vmem:[#allocation113_spill] sm:$0xff] %v7335_v39  ;;  %vm1579_vm4 = vcmp.eq.f32.partialorder %v7237_v30, inf  ;;  %vm1581_vm5 = vcmp.eq.f32.partialorder %v7237_v30, 0.0  ;;  %v1582_v29 = vand.u32 2147483648, %v7237_v30  ;;  %v1458_v57 = vadd.f32 %v1426_v15, %v9533_v18  ;;  %v5335_v35 = vld [vmem:[%s5938_s27 + $0x70] sm:$0xff]  ;;  %v7349_v62 = vpop.f32.mrf.mxu1  ;;  %v5337_v18 = vld [vmem:[%s5938_s27 + $0x78] sm:$0xff] }
 0x2d8   : > { %5019 = vrsqrt.f32 %v7329_v19  ;;  %v7343_v12 = vadd.f32 %v3646_v45, %v9534_v60  ;;  %v1580_v16 = vsel %vm1579_vm4, %v7237_v30, %v1578_v13  ;;  %v5014_v63 = vpop.eup %5013  ;;  %v1967_v54 = vadd.f32 %v1935_v50, %v6913_v1  ;;  %v1222_v2 = vpop.f32.mrf.mxu0  ;;  %9536 = vst [vmem:[#allocation116_spill] sm:$0xff] %v7349_v62  ;;  %v5336_v13 = vld [vmem:[%s5948_s14 + $0x278] sm:$0xff] }
 0x2d9   : > { %v1936_v38 = vmul.f32 %v1808_v5, %v1808_v5  ;;  %v1809_v26 = vmul.f32 %v5335_v35, %v5334_v51  ;;  %v1583_v61 = vsel %vm1581_vm5, %v1582_v29, %v1580_v16  ;;  %v7351_v3 = vadd.f32 3e-10, %v1458_v57  ;;  %v9538_v5 = vld [vmem:[#allocation124_spill] sm:$0xff]  ;;  %v9539_v57 = vld [vmem:[#allocation125_spill] sm:$0xff]  ;;  %v7371_v62 = vpop.f32.mrf.mxu1 }
 0x2da   : > { %9535 = vst [vmem:[#allocation115_spill] sm:$0xff] %v7343_v12  ;;  %v1427_v15 = vmul.f32 %v1222_v2, %v1222_v2  ;;  %v3647_v45 = vmul.f32 %v1222_v2, %v7335_v39  ;;  %4616 = vmatprep.mubr.f32.mxu1 %v1583_v61  ;;  %v1585_v30 = vmul.f32 %v5014_v63, %v7261_v9  ;;  %v7357_v1 = vpop.f32.mrf.mxu0  ;;  %vm1586_vm6 = vcmp.eq.f32.partialorder %v7261_v9, inf }
 0x2db   : > { %v1810_v60 = vmul.f32 %v5337_v18, %v5336_v13  ;;  %9537 = vst [vmem:[#allocation118_spill] sm:$0xff] %v7357_v1  ;;  %vm1588_vm7 = vcmp.eq.f32.partialorder %v7261_v9, 0.0  ;;  %v1589_v50 = vand.u32 2147483648, %v7261_v9  ;;  %5021 = vrsqrt.f32 %v7351_v3  ;;  %9541 = vst [vmem:[#allocation121_spill] sm:$0xff] %v7371_v62 }
 0x2dc   : > { %v1459_v29 = vadd.f32 %v1427_v15, %v9538_v5  ;;  %v7365_v16 = vadd.f32 %v3647_v45, %v9539_v57  ;;  %v1587_v61 = vsel %vm1586_vm6, %v7261_v9, %v1585_v30  ;;  %v7368_v51 = vadd.f32 3e-10, %v1967_v54  ;;  %v1228_v13 = vpop.f32.mrf.mxu0  ;;  %v9544_v30 = vld [vmem:[#allocation133_spill] sm:$0xff] }
 0x2dd   : > { %v5016_v63 = vpop.eup %5015  ;;  %v1968_v35 = vadd.f32 %v1936_v38, %v6921_v40  ;;  %v1937_v2 = vmul.f32 %v1809_v26, %v1809_v26  ;;  %v1590_v18 = vsel %vm1588_vm7, %v1589_v50, %v1587_v61  ;;  %v1428_v39 = vmul.f32 %v1228_v13, %v1228_v13  ;;  %v9543_v38 = vld [vmem:[#allocation132_spill] sm:$0xff]  ;;  %v5338_v61 = vld [vmem:[%s5948_s14 + $0x280] sm:$0xff] }
 0x2de   : > { %9540 = vst [vmem:[#allocation119_spill] sm:$0xff] %v7365_v16  ;;  %v7373_v12 = vadd.f32 3e-10, %v1459_v29  ;;  %v3648_v15 = vmul.f32 %v1228_v13, %v7357_v1  ;;  %4617 = vmatmul.mubr.f32.gmra.mxu1 %v1590_v18  ;;  %v1592_v9 = vmul.f32 %v5016_v63, %v7283_v21  ;;  %v1938_v45 = vmul.f32 %v1810_v60, %v1810_v60  ;;  %v7377_v54 = vpop.f32.mrf.mxu0  ;;  %v5339_v63 = vld [vmem:[%s5938_s27 + $0x80] sm:$0xff]  ;;  %v7395_v16 = vpop.f32.mrf.mxu1 }
 0x2df   : > { %9542 = vst [vmem:[#allocation122_spill] sm:$0xff] %v7377_v54  ;;  %vm1593_vm8 = vcmp.eq.f32.partialorder %v7283_v21, inf  ;;  %vm1595_vm9 = vcmp.eq.f32.partialorder %v7283_v21, 0.0  ;;  %v1596_v40 = vand.u32 2147483648, %v7283_v21  ;;  %v1460_v26 = vadd.f32 %v1428_v39, %v9543_v38  ;;  %9546 = vst [vmem:[#allocation125_spill] sm:$0xff] %v7395_v16 }
 0x2e0   : > { %5023 = vrsqrt.f32 %v7373_v12  ;;  %v7385_v50 = vadd.f32 %v3648_v15, %v9544_v30  ;;  %v1594_v5 = vsel %vm1593_vm8, %v7283_v21, %v1592_v9  ;;  %v5018_v29 = vpop.eup %5017  ;;  %v7388_v57 = vadd.f32 3e-10, %v1968_v35  ;;  %v1234_v18 = vpop.f32.mrf.mxu0  ;;  %v9548_v9 = vld [vmem:[#allocation135_spill] sm:$0xff] }
 0x2e1   : > { %v7391_v60 = vadd.f32 %v1937_v2, %v6924_v55  ;;  %v1811_v13 = vmul.f32 %v5339_v63, %v5338_v61  ;;  %v1597_v1 = vsel %vm1595_vm9, %v1596_v40, %v1594_v5  ;;  %v7397_v20 = vadd.f32 3e-10, %v1460_v26  ;;  %v5341_v5 = vld [vmem:[%s5938_s27 + $0x88] sm:$0xff]  ;;  %v5342_v61 = vld [vmem:[%s5948_s14 + $0x290] sm:$0xff] }
 0x2e2   : > { %9545 = vst [vmem:[#allocation124_spill] sm:$0xff] %v7385_v50  ;;  %v1429_v39 = vmul.f32 %v1234_v18, %v1234_v18  ;;  %v3649_v21 = vmul.f32 %v1234_v18, %v7377_v54  ;;  %4619 = vmatprep.mubr.f32.mxu1 %v1597_v1  ;;  %v1599_v35 = vmul.f32 %v5018_v29, %v7307_v8  ;;  %v7404_v2 = vpop.f32.mrf.mxu0  ;;  %vm1600_vm10 = vcmp.eq.f32.partialorder %v7307_v8, inf  ;;  %v9549_v1 = vld [vmem:[#allocation136_spill] sm:$0xff]  ;;  %v7425_v54 = vpop.f32.mrf.mxu1 }
 0x2e3   : > { %v7402_v55 = vadd.f32 %v1938_v45, %v6937_v59  ;;  %9547 = vst [vmem:[#allocation132_spill] sm:$0xff] %v7404_v2  ;;  %vm1602_vm11 = vcmp.eq.f32.partialorder %v7307_v8, 0.0  ;;  %v1603_v15 = vand.u32 2147483648, %v7307_v8  ;;  %5025 = vrsqrt.f32 %v7397_v20  ;;  %v5340_v45 = vld [vmem:[%s5948_s14 + $0x288] sm:$0xff]  ;;  %v5343_v63 = vld [vmem:[%s5938_s27 + $0x90] sm:$0xff]  ;;  %9551 = vst [vmem:[#allocation135_spill] sm:$0xff] %v7425_v54 }
 0x2e4   : > { %v1461_v40 = vadd.f32 %v1429_v39, %v9548_v9  ;;  %v7412_v38 = vadd.f32 %v3649_v21, %v9549_v1  ;;  %v1601_v26 = vsel %vm1600_vm10, %v7307_v8, %v1599_v35  ;;  %v7415_v59 = vmul.f32 %v1811_v13, %v1811_v13  ;;  %v1240_v16 = vpop.f32.mrf.mxu0 }
 0x2e5   : > { %v5020_v30 = vpop.eup %5019  ;;  %v7419_v29 = vmul.f32 %v5341_v5, %v5340_v45  ;;  %v7423_v18 = vmul.f32 %v5343_v63, %v5342_v61  ;;  %v1604_v50 = vsel %vm1602_vm11, %v1603_v15, %v1601_v26  ;;  %v1430_v21 = vmul.f32 %v1240_v16, %v1240_v16  ;;  %v9554_v26 = vld [vmem:[#allocation139_spill] sm:$0xff] }
 0x2e6   : > { %9550 = vst [vmem:[#allocation133_spill] sm:$0xff] %v7412_v38  ;;  %v7427_v39 = vadd.f32 3e-10, %v1461_v40  ;;  %v3650_v8 = vmul.f32 %v1240_v16, %v7404_v2  ;;  %4620 = vmatmul.mubr.f32.gmra.mxu1 %v1604_v50  ;;  %v1606_v13 = vmul.f32 %v5020_v30, %v7329_v19  ;;  %v1435_v35 = vmul.f32 %v7191_v28, %v7191_v28  ;;  %v7433_v9 = vpop.f32.mrf.mxu0  ;;  %v9553_v40 = vld [vmem:[#allocation138_spill] sm:$0xff]  ;;  %v7450_v2 = vpop.f32.mrf.mxu1 }
 0x2e7   : > { %9552 = vst [vmem:[#allocation136_spill] sm:$0xff] %v7433_v9  ;;  %vm1607_vm12 = vcmp.eq.f32.partialorder %v7329_v19, inf  ;;  %vm1609_vm13 = vcmp.eq.f32.partialorder %v7329_v19, 0.0  ;;  %v1610_v15 = vand.u32 2147483648, %v7329_v19  ;;  %v1462_v1 = vadd.f32 %v1430_v21, %v9553_v40  ;;  %9556 = vst [vmem:[#allocation139_spill] sm:$0xff] %v7450_v2  ;;  %v9560_v2 = vld [vmem:[#allocation144_spill] sm:$0xff] }
 0x2e8   : > { %5027 = vrsqrt.f32 %v7427_v39  ;;  %v7441_v16 = vadd.f32 %v3650_v8, %v9554_v26  ;;  %v1608_v50 = vsel %vm1607_vm12, %v7329_v19, %v1606_v13  ;;  %v5022_v30 = vpop.eup %5021  ;;  %v1436_v45 = vmul.f32 %v7235_v41, %v7235_v41  ;;  %v1246_v63 = vpop.f32.mrf.mxu0  ;;  %v9557_v13 = vld [vmem:[#allocation173_spill] sm:$0xff] }
 0x2e9   : > { %v1437_v5 = vmul.f32 %v7281_v31, %v7281_v31  ;;  %v1438_v61 = vmul.f32 %v7327_v44, %v7327_v44  ;;  %v1611_v28 = vsel %vm1609_vm13, %v1610_v15, %v1608_v50  ;;  %v7452_v21 = vadd.f32 3e-10, %v1462_v1  ;;  %v9559_v1 = vld [vmem:[#allocation143_spill] sm:$0xff] }
 0x2ea   : > { %9555 = vst [vmem:[#allocation138_spill] sm:$0xff] %v7441_v16  ;;  %v1431_v8 = vmul.f32 %v1246_v63, %v1246_v63  ;;  %v3651_v40 = vmul.f32 %v1246_v63, %v7433_v9  ;;  %4622 = vmatprep.mubr.f32.mxu1 %v1611_v28  ;;  %v1613_v19 = vmul.f32 %v5022_v30, %v7351_v3  ;;  %v7457_v41 = vpop.f32.mrf.mxu0  ;;  %vm1614_vm14 = vcmp.eq.f32.partialorder %v7351_v3, inf  ;;  %v7475_v9 = vpop.f32.mrf.mxu1 }
 0x2eb   : > { %v1467_v26 = vadd.f32 %v1435_v35, %v9557_v13  ;;  %9558 = vst [vmem:[#allocation173_spill] sm:$0xff] %v7457_v41  ;;  %vm1616_vm15 = vcmp.eq.f32.partialorder %v7351_v3, 0.0  ;;  %v1617_v15 = vand.u32 2147483648, %v7351_v3  ;;  %5029 = vrsqrt.f32 %v7452_v21  ;;  %9562 = vst [vmem:[#allocation144_spill] sm:$0xff] %v7475_v9 }
 0x2ec   : > { %v1463_v50 = vadd.f32 %v1431_v8, %v9559_v1  ;;  %v7465_v44 = vadd.f32 %v3651_v40, %v9560_v2  ;;  %v1615_v28 = vsel %vm1614_vm14, %v7351_v3, %v1613_v19  ;;  %v1468_v35 = vadd.f32 %v1436_v45, %v6822_v56  ;;  %v1252_v31 = vpop.f32.mrf.mxu0 }
 0x2ed   : > { %v5024_v30 = vpop.eup %5023  ;;  %v1439_v63 = vmul.f32 %v7371_v62, %v7371_v62  ;;  %v7473_v13 = vmul.f32 %v7425_v54, %v7425_v54  ;;  %v1618_v16 = vsel %vm1616_vm15, %v1617_v15, %v1615_v28  ;;  %v1432_v2 = vmul.f32 %v1252_v31, %v1252_v31  ;;  %v9563_v15 = vld [vmem:[#allocation153_spill] sm:$0xff] }
 0x2ee   : > { %9561 = vst [vmem:[#allocation143_spill] sm:$0xff] %v7465_v44  ;;  %v7477_v8 = vadd.f32 3e-10, %v1463_v50  ;;  %v3652_v40 = vmul.f32 %v1252_v31, %v7457_v41  ;;  %4623 = vmatmul.mubr.f32.gmra.mxu1 %v1618_v16  ;;  %v1620_v3 = vmul.f32 %v5024_v30, %v7373_v12  ;;  %v7481_v56 = vadd.f32 3e-10, %v1467_v26  ;;  %v7483_v45 = vpop.f32.mrf.mxu0  ;;  %v9564_v50 = vld [vmem:[#allocation154_spill] sm:$0xff]  ;;  %v7499_v44 = vpop.f32.mrf.mxu1 }
 0x2ef   : > { %vm1621_vm0 = vcmp.eq.f32.partialorder %v7373_v12, inf  ;;  %vm1623_vm1 = vcmp.eq.f32.partialorder %v7373_v12, 0.0  ;;  %v1624_v19 = vand.u32 2147483648, %v7373_v12  ;;  %v1464_v1 = vadd.f32 %v1432_v2, %v9563_v15  ;;  %9565 = vst [vmem:[#allocation153_spill] sm:$0xff] %v7499_v44 }
 0x2f0   : > { %5031 = vrsqrt.f32 %v7477_v8  ;;  %v7491_v28 = vadd.f32 %v3652_v40, %v9564_v50  ;;  %v1622_v31 = vsel %vm1621_vm0, %v7373_v12, %v1620_v3  ;;  %v5026_v16 = vpop.eup %5025  ;;  %v7494_v26 = vadd.f32 3e-10, %v1468_v35  ;;  %v1258_v62 = vpop.f32.mrf.mxu0 }
 0x2f1   : > { %v1469_v30 = vadd.f32 %v1437_v5, %v6849_v58  ;;  %v1441_v54 = vmul.f32 %v7475_v9, %v7475_v9  ;;  %v1625_v41 = vsel %vm1623_vm1, %v1624_v19, %v1622_v31  ;;  %v7501_v38 = vadd.f32 3e-10, %v1464_v1  ;;  %v9566_v5 = vld [vmem:[#allocation160_spill] sm:$0xff]  ;;  %v9567_v19 = vld [vmem:[#allocation161_spill] sm:$0xff]  ;;  %v7521_v44 = vpop.f32.mrf.mxu1 }
 0x2f2   : > { %v1433_v2 = vmul.f32 %v1258_v62, %v1258_v62  ;;  %v3653_v40 = vmul.f32 %v1258_v62, %v7483_v45  ;;  %4625 = vmatprep.mubr.f32.mxu1 %v1625_v41  ;;  %v1627_v12 = vmul.f32 %v5026_v16, %v7397_v20  ;;  %v7505_v3 = vpop.f32.mrf.mxu0  ;;  %vm1628_vm2 = vcmp.eq.f32.partialorder %v7397_v20, inf  ;;  %9568 = vst [vmem:[#allocation154_spill] sm:$0xff] %v7521_v44 }
 0x2f3   : > { %vm1630_vm3 = vcmp.eq.f32.partialorder %v7397_v20, 0.0  ;;  %v1631_v58 = vand.u32 2147483648, %v7397_v20  ;;  %5033 = vrsqrt.f32 %v7481_v56  ;;  %v7517_v1 = vadd.f32 3e-10, %v1469_v30 }
 0x2f4   : > { %5035 = vrsqrt.f32 %v7501_v38  ;;  %v1465_v35 = vadd.f32 %v1433_v2, %v9566_v5  ;;  %v7514_v15 = vadd.f32 %v3653_v40, %v9567_v19  ;;  %v1629_v41 = vsel %vm1628_vm2, %v7397_v20, %v1627_v12  ;;  %v1264_v31 = vpop.f32.mrf.mxu0 }
 0x2f5   : > { %v5028_v62 = vpop.eup %5027  ;;  %v1470_v50 = vadd.f32 %v1438_v61, %v6880_v22  ;;  %v1632_v16 = vsel %vm1630_vm3, %v1631_v58, %v1629_v41  ;;  %5037 = vrsqrt.f32 %v7494_v26  ;;  %v1434_v2 = vmul.f32 %v1264_v31, %v1264_v31  ;;  %v9569_v61 = vld [vmem:[#allocation168_spill] sm:$0xff]  ;;  %v9570_v58 = vld [vmem:[#allocation169_spill] sm:$0xff] }
 0x2f6   : > { %v7523_v9 = vadd.f32 3e-10, %v1465_v35  ;;  %v3654_v40 = vmul.f32 %v1264_v31, %v7505_v3  ;;  %4626 = vmatmul.mubr.f32.gmra.mxu1 %v1632_v16  ;;  %v1634_v20 = vmul.f32 %v5028_v62, %v7427_v39  ;;  %v1471_v30 = vadd.f32 %v1439_v63, %v6905_v46  ;;  %v5344_v41 = vld [vmem:[%s5948_s14 + $0x298] sm:$0xff] }
 0x2f7   : > { %vm1635_vm4 = vcmp.eq.f32.partialorder %v7427_v39, inf  ;;  %vm1637_vm5 = vcmp.eq.f32.partialorder %v7427_v39, 0.0  ;;  %v1638_v22 = vand.u32 2147483648, %v7427_v39  ;;  %v1466_v12 = vadd.f32 %v1434_v2, %v9569_v61  ;;  %v5345_v62 = vld [vmem:[%s5938_s27 + $0x98] sm:$0xff] }
 0x2f8   : > { %5039 = vrsqrt.f32 %v7523_v9  ;;  %v7534_v5 = vadd.f32 %v3654_v40, %v9570_v58  ;;  %v1636_v35 = vsel %vm1635_vm4, %v7427_v39, %v1634_v20  ;;  %v5030_v19 = vpop.eup %5029  ;;  %v1814_v31 = vmul.f32 %v5345_v62, %v5344_v41  ;;  %v5346_v58 = vld [vmem:[%s5948_s14 + $0x2a0] sm:$0xff] }
 0x2f9   : > { %v1442_v46 = vmul.f32 %v7521_v44, %v7521_v44  ;;  %v1639_v63 = vsel %vm1637_vm5, %v1638_v22, %v1636_v35  ;;  %5041 = vrsqrt.f32 %v7517_v1  ;;  %v7542_v16 = vadd.f32 3e-10, %v1470_v50  ;;  %v9666_v44 = vld [vmem:[#allocation138_spill] sm:$0xff] }
 0x2fa   : > { %v1472_v2 = vadd.f32 %v7473_v13, %v6932_v48  ;;  %v7546_v40 = vadd.f32 3e-10, %v1466_v12  ;;  %4628 = vmatprep.mubr.f32.mxu1 %v1639_v63  ;;  %v1641_v39 = vmul.f32 %v5030_v19, %v7452_v21  ;;  %v7549_v20 = vadd.f32 3e-10, %v1471_v30  ;;  %v9571_v63 = vld [vmem:[#allocation149_spill] sm:$0xff] }
 0x2fb   : > { %v1473_v61 = vadd.f32 %v1441_v54, %v6963_v32  ;;  %vm1642_vm6 = vcmp.eq.f32.partialorder %v7452_v21, inf  ;;  %v1645_v22 = vand.u32 2147483648, %v7452_v21  ;;  %v1940_v50 = vmul.f32 %v7419_v29, %v7419_v29  ;;  %v5347_v32 = vld [vmem:[%s5938_s27 + $0xa0] sm:$0xff] }
 0x2fc   : > { %5043 = vrsqrt.f32 %v7546_v40  ;;  %v1643_v48 = vsel %vm1642_vm6, %v7452_v21, %v1641_v39  ;;  %vm1644_vm7 = vcmp.eq.f32.partialorder %v7452_v21, 0.0  ;;  %v1941_v30 = vmul.f32 %v7423_v18, %v7423_v18  ;;  %v9572_v39 = vld [vmem:[#allocation145_spill] sm:$0xff] }
 0x2fd   : > { %v5032_v13 = vpop.eup %5031  ;;  %v1942_v12 = vmul.f32 %v1814_v31, %v1814_v31  ;;  %v1815_v54 = vmul.f32 %v5347_v32, %v5346_v58  ;;  %v1646_v35 = vsel %vm1644_vm7, %v1645_v22, %v1643_v48  ;;  %v7563_v19 = vadd.f32 3e-10, %v1472_v2  ;;  %v9573_v22 = vld [vmem:[#allocation71_spill] sm:$0xff] }
 0x2fe   : > { %v1474_v41 = vadd.f32 %v1442_v46, %v6986_v23  ;;  %4629 = vmatmul.mubr.f32.gmra.mxu1 %v1646_v35  ;;  %v1648_v29 = vmul.f32 %v5032_v13, %v7477_v8  ;;  %5045 = vrsqrt.f32 %v7542_v16  ;;  %v7568_v62 = vadd.f32 3e-10, %v1473_v61 }
 0x2ff   : > { %vm1649_vm8 = vcmp.eq.f32.partialorder %v7477_v8, inf  ;;  %v1652_v18 = vand.u32 2147483648, %v7477_v8  ;;  %5047 = vrsqrt.f32 %v7549_v20  ;;  %v1971_v31 = vadd.f32 %v7415_v59, %v6940_v49  ;;  %v5348_v59 = vld [vmem:[%s5948_s14 + $0x2a8] sm:$0xff] }
 0x300   : > { %v5034_v21 = vpop.eup %5033  ;;  %v1972_v23 = vadd.f32 %v1940_v50, %v9571_v63  ;;  %v1650_v46 = vsel %vm1649_vm8, %v7477_v8, %v1648_v29  ;;  %vm1651_vm9 = vcmp.eq.f32.partialorder %v7477_v8, 0.0  ;;  %v1973_v61 = vadd.f32 %v1941_v30, %v9572_v39  ;;  %v5349_v50 = vld [vmem:[%s5938_s27 + $0xa8] sm:$0xff] }
 0x301   : > { %v5036_v2 = vpop.eup %5035  ;;  %v1974_v48 = vadd.f32 %v1942_v12, %v9573_v22  ;;  %v1653_v13 = vsel %vm1651_vm9, %v1652_v18, %v1650_v46  ;;  %5049 = vrsqrt.f32 %v7103_v43  ;;  %v1943_v32 = vmul.f32 %v1815_v54, %v1815_v54 }
 0x302   : > { %v5038_v58 = vpop.eup %5037  ;;  %v7581_v35 = vadd.f32 3e-10, %v1474_v41  ;;  %4631 = vmatprep.mubr.f32.mxu1 %v1653_v13  ;;  %v1655_v49 = vmul.f32 %v5036_v2, %v7501_v38  ;;  %5051 = vrsqrt.f32 %v7563_v19  ;;  %v1816_v8 = vmul.f32 %v5349_v50, %v5348_v59 }
 0x303   : > { %vm1656_vm10 = vcmp.eq.f32.partialorder %v7501_v38, inf  ;;  %v1659_v30 = vand.u32 2147483648, %v7501_v38  ;;  %5053 = vrsqrt.f32 %v7568_v62  ;;  %v7591_v12 = vadd.f32 3e-10, %v7391_v60 }
 0x304   : > { %v7594_v54 = vadd.f32 3e-10, %v7402_v55  ;;  %v1657_v41 = vsel %vm1656_vm10, %v7501_v38, %v1655_v49  ;;  %vm1658_vm11 = vcmp.eq.f32.partialorder %v7501_v38, 0.0  ;;  %v7598_v18 = vadd.f32 3e-10, %v1971_v31  ;;  %v9574_v38 = vld [vmem:[#allocation152_spill] sm:$0xff] }
 0x305   : > { %v5040_v29 = vpop.eup %5039  ;;  %v7600_v63 = vadd.f32 3e-10, %v1972_v23  ;;  %v7602_v46 = vadd.f32 3e-10, %v1973_v61  ;;  %v1660_v2 = vsel %vm1658_vm11, %v1659_v30, %v1657_v41  ;;  %v7604_v60 = vadd.f32 3e-10, %v1974_v48 }
 0x306   : > { %v5042_v39 = vpop.eup %5041  ;;  %4632 = vmatmul.mubr.f32.gmra.mxu1 %v1660_v2  ;;  %v1662_v55 = vmul.f32 %v5040_v29, %v7523_v9  ;;  %v1676_v22 = vmul.f32 %v5034_v21, %v7481_v56  ;;  %5055 = vrsqrt.f32 %v7581_v35  ;;  %v7610_v13 = vadd.f32 %v1943_v32, %v9574_v38  ;;  %v5350_v61 = vld [vmem:[%s5948_s14 + $0x2b0] sm:$0xff] }
 0x307   : > { %v7612_v31 = vmul.f32 %v1816_v8, %v1816_v8  ;;  %vm1663_vm12 = vcmp.eq.f32.partialorder %v7523_v9, inf  ;;  %v1666_v23 = vand.u32 2147483648, %v7523_v9  ;;  %v5351_v49 = vld [vmem:[%s5938_s27 + $0xb0] sm:$0xff]  ;;  %vm1665_vm13 = vcmp.eq.f32.partialorder %v7523_v9, 0.0 }
 0x308   : > { %v7618_v48 = vmul.f32 %v5351_v49, %v5350_v61  ;;  %v1664_v59 = vsel %vm1663_vm12, %v7523_v9, %v1662_v55  ;;  %5057 = vrsqrt.f32 %v7142_v36  ;;  %vm1677_vm14 = vcmp.eq.f32.partialorder %v7481_v56, inf }
 0x309   : > { %v5044_v21 = vpop.eup %5043  ;;  %v1667_v50 = vsel %vm1665_vm13, %v1666_v23, %v1664_v59  ;;  %vm1679_vm15 = vcmp.eq.f32.partialorder %v7481_v56, 0.0  ;;  %v1680_v32 = vand.u32 2147483648, %v7481_v56  ;;  %v1678_v30 = vsel %vm1677_vm14, %v7481_v56, %v1676_v22 }
 0x30a   : > { %4634 = vmatprep.mubr.f32.mxu1 %v1667_v50  ;;  %v1669_v8 = vmul.f32 %v5044_v21, %v7546_v40  ;;  %v1683_v41 = vmul.f32 %v5038_v58, %v7494_v26  ;;  %vm1684_vm0 = vcmp.eq.f32.partialorder %v7494_v26, inf  ;;  %vm1670_vm1 = vcmp.eq.f32.partialorder %v7546_v40, inf }
 0x30b   : > { %v5046_v9 = vpop.eup %5045  ;;  %v1673_v29 = vand.u32 2147483648, %v7546_v40  ;;  %v1690_v2 = vmul.f32 %v5042_v39, %v7517_v1  ;;  %5059 = vrsqrt.f32 %v7150_v4  ;;  %vm1672_vm2 = vcmp.eq.f32.partialorder %v7546_v40, 0.0 }
 0x30c   : > { %v5048_v55 = vpop.eup %5047  ;;  %v1671_v38 = vsel %vm1670_vm1, %v7546_v40, %v1669_v8  ;;  %vm1686_vm3 = vcmp.eq.f32.partialorder %v7494_v26, 0.0  ;;  %v1687_v58 = vand.u32 2147483648, %v7494_v26  ;;  %vm1691_vm4 = vcmp.eq.f32.partialorder %v7517_v1, inf }
 0x30d   : > { %v1674_v22 = vsel %vm1672_vm2, %v1673_v29, %v1671_v38  ;;  %vm1693_vm5 = vcmp.eq.f32.partialorder %v7517_v1, 0.0  ;;  %5061 = vrsqrt.f32 %v7186_v53  ;;  %v1681_v39 = vsel %vm1679_vm15, %v1680_v32, %v1678_v30 }
 0x30e   : > { %v5050_v23 = vpop.eup %5049  ;;  %4635 = vmatmul.mubr.f32.gmra.mxu1 %v1674_v22  ;;  %v1685_v40 = vsel %vm1684_vm0, %v7494_v26, %v1683_v41  ;;  %v1694_v61 = vand.u32 2147483648, %v7517_v1  ;;  %v1697_v49 = vmul.f32 %v5046_v9, %v7542_v16  ;;  %v1692_v21 = vsel %vm1691_vm4, %v7517_v1, %v1690_v2 }
 0x30f   : > { %v5052_v59 = vpop.eup %5051  ;;  %4637 = vmatprep.mubr.f32.mxu1 %v1681_v39  ;;  %vm1698_vm6 = vcmp.eq.f32.partialorder %v7542_v16, inf  ;;  %vm1700_vm7 = vcmp.eq.f32.partialorder %v7542_v16, 0.0  ;;  %v1704_v50 = vmul.f32 %v5048_v55, %v7549_v20  ;;  %v1701_v32 = vand.u32 2147483648, %v7542_v16 }
 0x310   : > { %v5054_v56 = vpop.eup %5053  ;;  %vm1705_vm8 = vcmp.eq.f32.partialorder %v7549_v20, inf  ;;  %vm1707_vm9 = vcmp.eq.f32.partialorder %v7549_v20, 0.0  ;;  %5063 = vrsqrt.f32 %v7208_v27  ;;  %v1688_v8 = vsel %vm1686_vm3, %v1687_v58, %v1685_v40 }
 0x311   : > { %v1708_v30 = vand.u32 2147483648, %v7549_v20  ;;  %vm1712_vm10 = vcmp.eq.f32.partialorder %v7563_v19, inf  ;;  %5065 = vrsqrt.f32 %v7231_v25  ;;  %v1695_v41 = vsel %vm1693_vm5, %v1694_v61, %v1692_v21 }
 0x312   : > { %4638 = vmatmul.mubr.f32.gmra.mxu1 %v1688_v8  ;;  %v1699_v9 = vsel %vm1698_vm6, %v7542_v16, %v1697_v49  ;;  %v1711_v29 = vmul.f32 %v5052_v59, %v7563_v19  ;;  %vm1714_vm11 = vcmp.eq.f32.partialorder %v7563_v19, 0.0  ;;  %v1706_v26 = vsel %vm1705_vm8, %v7549_v20, %v1704_v50 }
 0x313   : > { %v5056_v2 = vpop.eup %5055  ;;  %4640 = vmatprep.mubr.f32.mxu1 %v1695_v41  ;;  %v1718_v55 = vmul.f32 %v5054_v56, %v7568_v62  ;;  %v2020_v38 = vmul.f32 %v5050_v23, %v7103_v43  ;;  %5067 = vrsqrt.f32 %v7241_v33  ;;  %v1715_v58 = vand.u32 2147483648, %v7563_v19 }
 0x314   : > { %vm1719_vm12 = vcmp.eq.f32.partialorder %v7568_v62, inf  ;;  %vm2021_vm13 = vcmp.eq.f32.partialorder %v7103_v43, inf  ;;  %5069 = vrsqrt.f32 %v7278_v14  ;;  %v1702_v22 = vsel %vm1700_vm7, %v1701_v32, %v1699_v9 }
 0x315   : > { %v5058_v1 = vpop.eup %5057  ;;  %vm1721_vm14 = vcmp.eq.f32.partialorder %v7568_v62, 0.0  ;;  %v1722_v39 = vand.u32 2147483648, %v7568_v62  ;;  %v2024_v23 = vand.u32 2147483648, %v7103_v43  ;;  %v1709_v40 = vsel %vm1707_vm9, %v1708_v30, %v1706_v26 }
 0x316   : > { %4641 = vmatmul.mubr.f32.gmra.mxu1 %v1702_v22  ;;  %v1713_v61 = vsel %vm1712_vm10, %v7563_v19, %v1711_v29  ;;  %v1725_v49 = vmul.f32 %v5056_v2, %v7581_v35  ;;  %v2027_v16 = vmul.f32 %v7189_v47, %v7105_v24  ;;  %v1720_v59 = vsel %vm1719_vm12, %v7568_v62, %v1718_v55 }
 0x317   : > { %4643 = vmatprep.mubr.f32.mxu1 %v1709_v40  ;;  %v2022_v21 = vsel %vm2021_vm13, %v7103_v43, %v2020_v38  ;;  %vm2023_vm15 = vcmp.eq.f32.partialorder %v7103_v43, 0.0  ;;  %vm2028_vm0 = vcmp.eq.f32.partialorder %v7105_v24, inf  ;;  %vm1726_vm1 = vcmp.eq.f32.partialorder %v7581_v35, inf }
 0x318   : > { %v5060_v20 = vpop.eup %5059  ;;  %vm1728_vm2 = vcmp.eq.f32.partialorder %v7581_v35, 0.0  ;;  %v2034_v50 = vmul.f32 %v5058_v1, %v7142_v36  ;;  %5071 = vrsqrt.f32 %v7298_v6  ;;  %v1716_v47 = vsel %vm1714_vm11, %v1715_v58, %v1713_v61  ;;  %v9575_v1 = vld [vmem:[#allocation73_spill] sm:$0xff] }
 0x319   : > { %v1729_v56 = vand.u32 2147483648, %v7581_v35  ;;  %vm2035_vm3 = vcmp.eq.f32.partialorder %v7142_v36, inf  ;;  %5073 = vrsqrt.f32 %v7323_v11  ;;  %v1723_v32 = vsel %vm1721_vm14, %v1722_v39, %v1720_v59 }
 0x31a   : > { %v5062_v43 = vpop.eup %5061  ;;  %4644 = vmatmul.mubr.f32.gmra.mxu1 %v1716_v47  ;;  %v1727_v8 = vsel %vm1726_vm1, %v7581_v35, %v1725_v49  ;;  %v2025_v30 = vsel %vm2023_vm15, %v2024_v23, %v2022_v21  ;;  %v2029_v41 = vsel %vm2028_vm0, %v7105_v24, %v2027_v16  ;;  %vm2030_vm4 = vcmp.eq.f32.partialorder %v7105_v24, 0.0  ;;  %v5352_v16 = vld [vmem:[%s5948_s14 + $0x2b8] sm:$0xff] }
 0x31b   : > { %4646 = vmatprep.mubr.f32.mxu1 %v1723_v32  ;;  %v2031_v19 = vand.u32 2147483648, %v7105_v24  ;;  %v2038_v9 = vand.u32 2147483648, %v7142_v36  ;;  %v2041_v29 = vmul.f32 %v5060_v20, %v7150_v4  ;;  %v2036_v2 = vsel %vm2035_vm3, %v7142_v36, %v2034_v50 }
 0x31c   : > { %vm2037_vm5 = vcmp.eq.f32.partialorder %v7142_v36, 0.0  ;;  %vm2042_vm6 = vcmp.eq.f32.partialorder %v7150_v4, inf  ;;  %5075 = vrsqrt.f32 %v7333_v10  ;;  %v7713_v26 = vadd.f32 3e-10, %v7610_v13 }
 0x31d   : > { %v5064_v62 = vpop.eup %5063  ;;  %v1730_v55 = vsel %vm1728_vm2, %v1729_v56, %v1727_v8  ;;  %v2048_v38 = vmul.f32 %v5062_v43, %v7186_v53  ;;  %5077 = vrsqrt.f32 %v7368_v51  ;;  %v1976_v22 = vadd.f32 %v7612_v31, %v9575_v1 }
 0x31e   : > { %v5066_v58 = vpop.eup %5065  ;;  %v1945_v39 = vmul.f32 %v7618_v48, %v7618_v48  ;;  %4647 = vmatmul.mubr.f32.gmra.mxu1 %v1730_v55  ;;  %v2045_v23 = vand.u32 2147483648, %v7150_v4  ;;  %vm2049_vm7 = vcmp.eq.f32.partialorder %v7186_v53, inf  ;;  %v2032_v35 = vsel %vm2030_vm4, %v2031_v19, %v2029_v41 }
 0x31f   : > { %4681 = vmatprep.mubr.f32.mxu1 %v2025_v30  ;;  %v2039_v13 = vsel %vm2037_vm5, %v2038_v9, %v2036_v2  ;;  %v2043_v31 = vsel %vm2042_vm6, %v7150_v4, %v2041_v29  ;;  %vm2044_vm8 = vcmp.eq.f32.partialorder %v7150_v4, 0.0  ;;  %vm2051_vm9 = vcmp.eq.f32.partialorder %v7186_v53, 0.0  ;;  %v5353_v4 = vld [vmem:[%s5938_s27 + $0xb8] sm:$0xff] }
 0x320   : > { %v5068_v48 = vpop.eup %5067  ;;  %v2052_v40 = vand.u32 2147483648, %v7186_v53  ;;  %v2055_v61 = vmul.f32 %v5064_v62, %v7208_v27  ;;  %5079 = vrsqrt.f32 %v7388_v57  ;;  %v2050_v49 = vsel %vm2049_vm7, %v7186_v53, %v2048_v38 }
 0x321   : > { %v5070_v24 = vpop.eup %5069  ;;  %vm2056_vm10 = vcmp.eq.f32.partialorder %v7208_v27, inf  ;;  %v2062_v36 = vmul.f32 %v5066_v58, %v7231_v25  ;;  %5081 = vrsqrt.f32 %v7591_v12  ;;  %v1818_v59 = vmul.f32 %v5353_v4, %v5352_v16 }
 0x322   : > { %4682 = vmatmul.mubr.f32.vlgmr.msra.gmra.mxu1 %v2032_v35  ;;  %v2046_v21 = vsel %vm2044_vm8, %v2045_v23, %v2043_v31  ;;  %vm2058_vm11 = vcmp.eq.f32.partialorder %v7208_v27, 0.0  ;;  %vm2063_vm12 = vcmp.eq.f32.partialorder %v7231_v25, inf  ;;  %v2059_v20 = vand.u32 2147483648, %v7208_v27 }
 0x323   : > { %4684 = vmatprep.mubr.f32.mxu1 %v2039_v13  ;;  %v2066_v50 = vand.u32 2147483648, %v7231_v25  ;;  %v2069_v47 = vmul.f32 %v5068_v48, %v7241_v33  ;;  %vm2070_vm13 = vcmp.eq.f32.partialorder %v7241_v33, inf  ;;  %v2053_v56 = vsel %vm2051_vm9, %v2052_v40, %v2050_v49 }
 0x324   : > { %v2057_v43 = vsel %vm2056_vm10, %v7208_v27, %v2055_v61  ;;  %v2076_v32 = vmul.f32 %v5070_v24, %v7278_v14  ;;  %5083 = vrsqrt.f32 %v7594_v54  ;;  %v2064_v30 = vsel %vm2063_vm12, %v7231_v25, %v2062_v36 }
 0x325   : > { %v5072_v8 = vpop.eup %5071  ;;  %vm2065_vm14 = vcmp.eq.f32.partialorder %v7231_v25, 0.0  ;;  %vm2077_vm15 = vcmp.eq.f32.partialorder %v7278_v14, inf  ;;  %5085 = vrsqrt.f32 %v7598_v18  ;;  %v1977_v53 = vadd.f32 %v1945_v39, %v7009_v0 }
 0x326   : > { %v5074_v41 = vpop.eup %5073  ;;  %v1946_v19 = vmul.f32 %v1818_v59, %v1818_v59  ;;  %4685 = vmatmul.mubr.f32.gmra.mxu1 %v2046_v21  ;;  %vm2072_vm0 = vcmp.eq.f32.partialorder %v7241_v33, 0.0  ;;  %v2073_v9 = vand.u32 2147483648, %v7241_v33  ;;  %v2060_v29 = vsel %vm2058_vm11, %v2059_v20, %v2057_v43  ;;  %v5355_v43 = vld [vmem:[%s5938_s27 + $0xf8] sm:$0xff] }
 0x327   : > { %4687 = vmatprep.mubr.f32.mxu1 %v2053_v56  ;;  %v2071_v25 = vsel %vm2070_vm13, %v7241_v33, %v2069_v47  ;;  %vm2079_vm1 = vcmp.eq.f32.partialorder %v7278_v14, 0.0  ;;  %v2080_v2 = vand.u32 2147483648, %v7278_v14  ;;  %v2067_v62 = vsel %vm2065_vm14, %v2066_v50, %v2064_v30  ;;  %v5354_v56 = vld [vmem:[%s5948_s14 + $0x2f8] sm:$0xff] }
 0x328   : > { %v2078_v0 = vsel %vm2077_vm15, %v7278_v14, %v2076_v32  ;;  %v2083_v55 = vmul.f32 %v5072_v8, %v7298_v6  ;;  %5087 = vrsqrt.f32 %v7600_v63  ;;  %v7773_v58 = vadd.f32 3e-10, %v1976_v22 }
 0x329   : > { %v5076_v38 = vpop.eup %5075  ;;  %vm2084_vm2 = vcmp.eq.f32.partialorder %v7298_v6, inf  ;;  %v2090_v27 = vmul.f32 %v5074_v41, %v7323_v11  ;;  %5089 = vrsqrt.f32 %v7602_v46  ;;  %v7778_v39 = vadd.f32 3e-10, %v1977_v53 }
 0x32a   : > { %v5078_v1 = vpop.eup %5077  ;;  %v1978_v23 = vadd.f32 %v1946_v19, %v7052_v7  ;;  %4688 = vmatmul.mubr.f32.gmra.mxu1 %v2060_v29  ;;  %v2074_v35 = vsel %vm2072_vm0, %v2073_v9, %v2071_v25  ;;  %vm2091_vm3 = vcmp.eq.f32.partialorder %v7323_v11, inf  ;;  %v2081_v22 = vsel %vm2079_vm1, %v2080_v2, %v2078_v0 }
 0x32b   : > { %4690 = vmatprep.mubr.f32.mxu1 %v2067_v62  ;;  %vm2086_vm4 = vcmp.eq.f32.partialorder %v7298_v6, 0.0  ;;  %v2087_v13 = vand.u32 2147483648, %v7298_v6  ;;  %vm2093_vm5 = vcmp.eq.f32.partialorder %v7323_v11, 0.0  ;;  %v2085_v31 = vsel %vm2084_vm2, %v7298_v6, %v2083_v55 }
 0x32c   : > { %v2094_v7 = vand.u32 2147483648, %v7323_v11  ;;  %v2097_v48 = vmul.f32 %v5076_v38, %v7333_v10  ;;  %5091 = vrsqrt.f32 %v7604_v60  ;;  %v2092_v40 = vsel %vm2091_vm3, %v7323_v11, %v2090_v27 }
 0x32d   : > { %v5080_v33 = vpop.eup %5079  ;;  %vm2098_vm6 = vcmp.eq.f32.partialorder %v7333_v10, inf  ;;  %v2104_v14 = vmul.f32 %v5078_v1, %v7368_v51  ;;  %5093 = vrsqrt.f32 %v7713_v26  ;;  %v1890_v24 = vmul.f32 %v7088_v52, %v7088_v52 }
 0x32e   : > { %v5082_v61 = vpop.eup %5081  ;;  %v7799_v49 = vadd.f32 3e-10, %v1978_v23  ;;  %4691 = vmatmul.mubr.f32.gmra.mxu1 %v2074_v35  ;;  %vm2100_vm7 = vcmp.eq.f32.partialorder %v7333_v10, 0.0  ;;  %vm2105_vm8 = vcmp.eq.f32.partialorder %v7368_v51, inf  ;;  %v2088_v36 = vsel %vm2086_vm4, %v2087_v13, %v2085_v31 }
 0x32f   : > { %4693 = vmatprep.mubr.f32.mxu1 %v2081_v22  ;;  %v2101_v16 = vand.u32 2147483648, %v7333_v10  ;;  %vm2107_vm9 = vcmp.eq.f32.partialorder %v7368_v51, 0.0  ;;  %v2108_v4 = vand.u32 2147483648, %v7368_v51  ;;  %v2095_v52 = vsel %vm2093_vm5, %v2094_v7, %v2092_v40  ;;  %v9577_v22 = vld [vmem:[#allocation77_spill] sm:$0xff] }
 0x330   : > { %v2099_v59 = vsel %vm2098_vm6, %v7333_v10, %v2097_v48  ;;  %v2111_v21 = vmul.f32 %v5080_v33, %v7388_v57  ;;  %5095 = vrsqrt.f32 %v7773_v58  ;;  %v2106_v6 = vsel %vm2105_vm8, %v7368_v51, %v2104_v14  ;;  %v9576_v51 = vld [vmem:[#allocation61_spill] sm:$0xff] }
 0x331   : > { %v5084_v20 = vpop.eup %5083  ;;  %vm2112_vm10 = vcmp.eq.f32.partialorder %v7388_v57, inf  ;;  %v2118_v50 = vmul.f32 %v5082_v61, %v7591_v12  ;;  %5097 = vrsqrt.f32 %v7778_v39  ;;  %v1985_v11 = vadd.f32 %v7101_v37, %v7084_v17 }
 0x332   : > { %v5086_v47 = vpop.eup %5085  ;;  %v1826_v32 = vmul.f32 %v5355_v43, %v5354_v56  ;;  %4694 = vmatmul.mubr.f32.gmra.mxu1 %v2088_v36  ;;  %vm2114_vm11 = vcmp.eq.f32.partialorder %v7388_v57, 0.0  ;;  %vm2119_vm12 = vcmp.eq.f32.partialorder %v7591_v12, inf  ;;  %v2102_v8 = vsel %vm2100_vm7, %v2101_v16, %v2099_v59 }
 0x333   : > { %4696 = vmatprep.mubr.f32.mxu1 %v2095_v52  ;;  %v2115_v30 = vand.u32 2147483648, %v7388_v57  ;;  %vm2121_vm13 = vcmp.eq.f32.partialorder %v7591_v12, 0.0  ;;  %v2122_v41 = vand.u32 2147483648, %v7591_v12  ;;  %v2109_v17 = vsel %vm2107_vm9, %v2108_v4, %v2106_v6  ;;  %v9579_v4 = vld [vmem:[#allocation126_spill] sm:$0xff] }
 0x334   : > { %v2113_v37 = vsel %vm2112_vm10, %v7388_v57, %v2111_v21  ;;  %v2125_v53 = vmul.f32 %v5084_v20, %v7594_v54  ;;  %5099 = vrsqrt.f32 %v7799_v49  ;;  %v2120_v10 = vsel %vm2119_vm12, %v7591_v12, %v2118_v50 }
 0x335   : > { %v5088_v19 = vpop.eup %5087  ;;  %vm2126_vm14 = vcmp.eq.f32.partialorder %v7594_v54, inf  ;;  %v2132_v9 = vmul.f32 %v5086_v47, %v7598_v18  ;;  %5101 = vrsqrt.f32 %v7054_v42  ;;  %v1922_v25 = vadd.f32 %v1890_v24, %v9576_v51  ;;  %v9578_v24 = vld [vmem:[#allocation80_spill] sm:$0xff] }
 0x336   : > { %v5090_v29 = vpop.eup %5089  ;;  %v1954_v2 = vmul.f32 %v1826_v32, %v1826_v32  ;;  %4697 = vmatmul.mubr.f32.gmra.mxu1 %v2102_v8  ;;  %vm2128_vm15 = vcmp.eq.f32.partialorder %v7594_v54, 0.0  ;;  %vm2133_vm0 = vcmp.eq.f32.partialorder %v7598_v18, inf  ;;  %v2116_v62 = vsel %vm2114_vm11, %v2115_v30, %v2113_v37 }
 0x337   : > { %4699 = vmatprep.mubr.f32.mxu1 %v2109_v17  ;;  %v2129_v0 = vand.u32 2147483648, %v7594_v54  ;;  %vm2135_vm1 = vcmp.eq.f32.partialorder %v7598_v18, 0.0  ;;  %v2136_v55 = vand.u32 2147483648, %v7598_v18  ;;  %v2123_v38 = vsel %vm2121_vm13, %v2122_v41, %v2120_v10 }
 0x338   : > { %v2127_v27 = vsel %vm2126_vm14, %v7594_v54, %v2125_v53  ;;  %v2139_v1 = vmul.f32 %v5088_v19, %v7600_v63  ;;  %5103 = vrsqrt.f32 %v7059_v34  ;;  %v2134_v35 = vsel %vm2133_vm0, %v7598_v18, %v2132_v9 }
 0x339   : > { %v5092_v23 = vpop.eup %5091  ;;  %vm2140_vm2 = vcmp.eq.f32.partialorder %v7600_v63, inf  ;;  %v2146_v57 = vmul.f32 %v5090_v29, %v7602_v46  ;;  %5105 = vrsqrt.f32 %v9577_v22  ;;  %v7856_v31 = vadd.f32 3e-10, %v1985_v11  ;;  %v9580_v11 = vld [vmem:[#allocation171_spill] sm:$0xff] }
 0x33a   : > { %v5094_v13 = vpop.eup %5093  ;;  %v1986_v12 = vadd.f32 %v1954_v2, %v1922_v25  ;;  %4700 = vmatmul.mubr.f32.gmra.mxu1 %v2116_v62  ;;  %vm2142_vm3 = vcmp.eq.f32.partialorder %v7600_v63, 0.0  ;;  %vm2147_vm4 = vcmp.eq.f32.partialorder %v7602_v46, inf  ;;  %v2130_v7 = vsel %vm2128_vm15, %v2129_v0, %v2127_v27  ;;  %v3034_v2 = vld [vmem:[#allocation13 + $0x170] sm:$0xff]  ;;  %v3033_v62 = vld [vmem:[#allocation13 + $0x168] sm:$0xff] }
 0x33b   : > { %4702 = vmatprep.mubr.f32.mxu1 %v2123_v38  ;;  %v2143_v48 = vand.u32 2147483648, %v7600_v63  ;;  %vm2149_vm5 = vcmp.eq.f32.partialorder %v7602_v46, 0.0  ;;  %v2150_v33 = vand.u32 2147483648, %v7602_v46  ;;  %v2137_v40 = vsel %vm2135_vm1, %v2136_v55, %v2134_v35  ;;  %3053 = vmatprep.subr.mxu1 %v3034_v2  ;;  %v3001_v2 = vld [vmem:[#allocation13 + $0x68] sm:$0xff] }
 0x33c   : > { %v2141_v14 = vsel %vm2140_vm2, %v7600_v63, %v2139_v1  ;;  %v2153_v61 = vmul.f32 %v5092_v23, %v7604_v60  ;;  %5107 = vrsqrt.f32 %v9578_v24  ;;  %v2148_v16 = vsel %vm2147_vm4, %v7602_v46, %v2146_v57  ;;  %3054 = vmatpush1.msra.mxu1 %v3033_v62  ;;  %v3000_v62 = vld [vmem:[#allocation13 + $0x60] sm:$0xff] }
 0x33d   : > { %v5096_v36 = vpop.eup %5095  ;;  %vm2154_vm6 = vcmp.eq.f32.partialorder %v7604_v60, inf  ;;  %v2160_v54 = vmul.f32 %v5094_v13, %v7713_v26  ;;  %5109 = vrsqrt.f32 %v9579_v4  ;;  %v7874_v59 = vadd.f32 3e-10, %v1986_v12 }
 0x33e   : > { %v5098_v52 = vpop.eup %5097  ;;  %4703 = vmatmul.mubr.f32.gmra.mxu1 %v2130_v7  ;;  %vm2156_vm7 = vcmp.eq.f32.partialorder %v7604_v60, 0.0  ;;  %vm2161_vm8 = vcmp.eq.f32.partialorder %v7713_v26, inf  ;;  %v2144_v18 = vsel %vm2142_vm3, %v2143_v48, %v2141_v14  ;;  %v2157_v21 = vand.u32 2147483648, %v7604_v60  ;;  %v3031_v48 = vld [vmem:[#allocation13 + $0x158] sm:$0xff] }
 0x33f   : > { %4705 = vmatprep.mubr.f32.mxu1 %v2137_v40  ;;  %vm2163_vm9 = vcmp.eq.f32.partialorder %v7713_v26, 0.0  ;;  %v2164_v20 = vand.u32 2147483648, %v7713_v26  ;;  %v2151_v6 = vsel %vm2149_vm5, %v2150_v33, %v2148_v16  ;;  %v2155_v50 = vsel %vm2154_vm6, %v7604_v60, %v2153_v61  ;;  %v3030_v33 = vld [vmem:[#allocation13 + $0x150] sm:$0xff]  ;;  %3055 = vmatprep.subr.mxu1 %v3031_v48 }
 0x340   : > { %v2167_v47 = vmul.f32 %v5096_v36, %v7773_v58  ;;  %5111 = vrsqrt.f32 %v9580_v11  ;;  %v2162_v43 = vsel %vm2161_vm8, %v7713_v26, %v2160_v54  ;;  %vm2168_vm10 = vcmp.eq.f32.partialorder %v7773_v58, inf  ;;  %3056 = vmatpush1.msra.mxu1 %v3030_v33 }
 0x341   : > { %v5100_v56 = vpop.eup %5099  ;;  %v2174_v63 = vmul.f32 %v5098_v52, %v7778_v39  ;;  %5113 = vrsqrt.f32 %v7856_v31  ;;  %vm2175_vm11 = vcmp.eq.f32.partialorder %v7778_v39, inf  ;;  %v2158_v46 = vsel %vm2156_vm7, %v2157_v21, %v2155_v50  ;;  %v3027_v21 = vld [vmem:[#allocation13 + $0x138] sm:$0xff] }
 0x342   : > { %v5102_v32 = vpop.eup %5101  ;;  %4706 = vmatmul.mubr.f32.gmra.mxu1 %v2144_v18  ;;  %vm2170_vm12 = vcmp.eq.f32.partialorder %v7773_v58, 0.0  ;;  %v2171_v8 = vand.u32 2147483648, %v7773_v58  ;;  %v2178_v30 = vand.u32 2147483648, %v7778_v39  ;;  %v2165_v41 = vsel %vm2163_vm9, %v2164_v20, %v2162_v43  ;;  %v3028_v18 = vld [vmem:[#allocation13 + $0x140] sm:$0xff] }
 0x343   : > { %4708 = vmatprep.mubr.f32.mxu1 %v2151_v6  ;;  %v2169_v17 = vsel %vm2168_vm10, %v7773_v58, %v2167_v47  ;;  %v2181_v37 = vmul.f32 %v5100_v56, %v7799_v49  ;;  %5115 = vrsqrt.f32 %v7874_v59  ;;  %v2176_v19 = vsel %vm2175_vm11, %v7778_v39, %v2174_v63  ;;  %3057 = vmatprep.subr.mxu1 %v3028_v18  ;;  %v3024_v63 = vld [vmem:[#allocation13 + $0x120] sm:$0xff] }
 0x344   : > { %vm2177_vm13 = vcmp.eq.f32.partialorder %v7778_v39, 0.0  ;;  %vm2182_vm14 = vcmp.eq.f32.partialorder %v7799_v49, inf  ;;  %v2188_v60 = vmul.f32 %v5102_v32, %v7054_v42  ;;  %vm2189_vm15 = vcmp.eq.f32.partialorder %v7054_v42, inf  ;;  %3058 = vmatpush1.msra.mxu1 %v3027_v21 }
 0x345   : > { %v5104_v53 = vpop.eup %5103  ;;  %v2172_v26 = vsel %vm2170_vm12, %v2171_v8, %v2169_v17  ;;  %vm2184_vm0 = vcmp.eq.f32.partialorder %v7799_v49, 0.0  ;;  %v2185_v9 = vand.u32 2147483648, %v7799_v49  ;;  %v2179_v29 = vsel %vm2177_vm13, %v2178_v30, %v2176_v19  ;;  %v3022_v30 = vld [vmem:[#allocation13 + $0x110] sm:$0xff]  ;;  %v3019_v17 = vld [vmem:[#allocation13 + $0xf8] sm:$0xff]  ;;  %v3016_v19 = vld [vmem:[#allocation13 + $0xe0] sm:$0xff] }
 0x346   : > { %v5106_v10 = vpop.eup %5105  ;;  %4709 = vmatmul.mubr.f32.gmra.mxu1 %v2158_v46  ;;  %v2183_v51 = vsel %vm2182_vm14, %v7799_v49, %v2181_v37  ;;  %v2192_v39 = vand.u32 2147483648, %v7054_v42  ;;  %v2195_v25 = vmul.f32 %v5104_v53, %v7059_v34  ;;  %v2190_v55 = vsel %vm2189_vm15, %v7054_v42, %v2188_v60  ;;  %v3018_v37 = vld [vmem:[#allocation13 + $0xf0] sm:$0xff]  ;;  %v3015_v60 = vld [vmem:[#allocation13 + $0xd8] sm:$0xff] }
 0x347   : > { %4711 = vmatprep.mubr.f32.mxu1 %v2165_v41  ;;  %vm2191_vm1 = vcmp.eq.f32.partialorder %v7054_v42, 0.0  ;;  %vm2196_vm2 = vcmp.eq.f32.partialorder %v7059_v34, inf  ;;  %v2202_v58 = vmul.f32 %v5106_v10, %v9577_v22  ;;  %vm2203_vm3 = vcmp.eq.f32.partialorder %v9577_v22, inf  ;;  %v3021_v41 = vld [vmem:[#allocation13 + $0x108] sm:$0xff]  ;;  %v3012_v10 = vld [vmem:[#allocation13 + $0xc0] sm:$0xff] }
 0x348   : > { %v2186_v27 = vsel %vm2184_vm0, %v2185_v9, %v2183_v51  ;;  %vm2198_vm4 = vcmp.eq.f32.partialorder %v7059_v34, 0.0  ;;  %v2199_v1 = vand.u32 2147483648, %v7059_v34  ;;  %v2193_v23 = vsel %vm2191_vm1, %v2192_v39, %v2190_v55  ;;  %v3009_v9 = vld [vmem:[#allocation13 + $0xa8] sm:$0xff]  ;;  %v3006_v51 = vld [vmem:[#allocation13 + $0x90] sm:$0xff]  ;;  %v3004_v39 = vld [vmem:[#allocation13 + $0x80] sm:$0xff] }
 0x349   : > { %v5108_v0 = vpop.eup %5107  ;;  %v2197_v42 = vsel %vm2196_vm2, %v7059_v34, %v2195_v25  ;;  %v2206_v35 = vand.u32 2147483648, %v9577_v22  ;;  %v2204_v12 = vsel %vm2203_vm3, %v9577_v22, %v2202_v58  ;;  %vm2205_vm5 = vcmp.eq.f32.partialorder %v9577_v22, 0.0  ;;  %v3003_v25 = vld [vmem:[#allocation13 + $0x78] sm:$0xff]  ;;  %v2997_v55 = vld [vmem:[#allocation13 + $0x48] sm:$0xff] }
 0x34a   : > { %v5110_v38 = vpop.eup %5109  ;;  %4712 = vmatmul.mubr.f32.gmra.mxu1 %v2172_v26  ;;  %v2209_v57 = vmul.f32 %v5108_v0, %v9578_v24  ;;  %vm2210_vm6 = vcmp.eq.f32.partialorder %v9578_v24, inf  ;;  %vm2217_vm7 = vcmp.eq.f32.partialorder %v9579_v4, inf  ;;  %v2200_v40 = vsel %vm2198_vm4, %v2199_v1, %v2197_v42  ;;  %v3010_v26 = vld [vmem:[#allocation13 + $0xb0] sm:$0xff]  ;;  %v2995_v58 = vld [vmem:[#allocation13 + $0x38] sm:$0xff]  ;;  %v2989_v42 = vld [vmem:[#allocation13 + $0x8] sm:$0xff] }
 0x34b   : > { %4714 = vmatprep.mubr.f32.mxu1 %v2179_v29  ;;  %v2216_v49 = vmul.f32 %v5110_v38, %v9579_v4  ;;  %vm2212_vm8 = vcmp.eq.f32.partialorder %v9578_v24, 0.0  ;;  %v2213_v14 = vand.u32 2147483648, %v9578_v24  ;;  %v2207_v22 = vsel %vm2205_vm5, %v2206_v35, %v2204_v12  ;;  %v3007_v29 = vld [vmem:[#allocation13 + $0x98] sm:$0xff]  ;;  %v2998_v0 = vld [vmem:[#allocation13 + $0x50] sm:$0xff]  ;;  %v2988_v35 = vld [vmem:[#allocation13] sm:$0xff] }
 0x34c   : > { %v2211_v61 = vsel %vm2210_vm6, %v9578_v24, %v2209_v57  ;;  %v2220_v36 = vand.u32 2147483648, %v9579_v4  ;;  %vm2219_vm9 = vcmp.eq.f32.partialorder %v9579_v4, 0.0  ;;  %vm2224_vm10 = vcmp.eq.f32.partialorder %v9580_v11, inf  ;;  %v3025_v24 = vld [vmem:[#allocation13 + $0x128] sm:$0xff]  ;;  %v2994_v38 = vld [vmem:[#allocation13 + $0x30] sm:$0xff]  ;;  %v2991_v1 = vld [vmem:[#allocation13 + $0x18] sm:$0xff] }
 0x34d   : > { %v5112_v13 = vpop.eup %5111  ;;  %v2218_v52 = vsel %vm2217_vm7, %v9579_v4, %v2216_v49  ;;  %vm2231_vm11 = vcmp.eq.f32.partialorder %v7856_v31, inf  ;;  %v2214_v20 = vsel %vm2212_vm8, %v2213_v14, %v2211_v61  ;;  %vm2226_vm12 = vcmp.eq.f32.partialorder %v9580_v11, 0.0  ;;  %3059 = vmatprep.subr.mxu1 %v3025_v24 }
 0x34e   : > { %v5114_v7 = vpop.eup %5113  ;;  %4715 = vmatmul.mubr.f32.gmra.mxu1 %v2186_v27  ;;  %v2223_v16 = vmul.f32 %v5112_v13, %v9580_v11  ;;  %v2227_v6 = vand.u32 2147483648, %v9580_v11  ;;  %v2221_v50 = vsel %vm2219_vm9, %v2220_v36, %v2218_v52  ;;  %v2234_v47 = vand.u32 2147483648, %v7856_v31  ;;  %v2992_v27 = vld [vmem:[#allocation13 + $0x20] sm:$0xff] }
 0x34f   : > { %4717 = vmatprep.mubr.f32.mxu1 %v2193_v23  ;;  %v2230_v34 = vmul.f32 %v5114_v7, %v7856_v31  ;;  %vm2233_vm13 = vcmp.eq.f32.partialorder %v7856_v31, 0.0  ;;  %vm2238_vm14 = vcmp.eq.f32.partialorder %v7874_v59, inf  ;;  %v2241_v46 = vand.u32 2147483648, %v7874_v59  ;;  %3060 = vmatpush1.msra.mxu1 %v3024_v63 }
 0x350   : > { %v5116_v54 = vpop.eup %5115  ;;  %v2225_v4 = vsel %vm2224_vm10, %v9580_v11, %v2223_v16  ;;  %vm2240_vm15 = vcmp.eq.f32.partialorder %v7874_v59, 0.0  ;;  %3061 = vmatprep.subr.mxu1 %v3022_v30  ;;  %v9581_v53 = vmov 0.0   ;;  %v7968_v16 = vld [vmem:[#allocation13 + $0x178] sm:$0xff] }
 0x351   : > { %v2237_v56 = vmul.f32 %v5116_v54, %v7874_v59  ;;  %v2232_v43 = vsel %vm2231_vm11, %v7856_v31, %v2230_v34  ;;  %v2228_v32 = vsel %vm2226_vm12, %v2227_v6, %v2225_v4  ;;  %3062 = vmatpush1.msra.mxu1 %v3021_v41 }
 0x352   : > { %4718 = vmatmul.mubr.f32.gmra.mxu1 %v2200_v40  ;;  %v2235_v11 = vsel %vm2233_vm13, %v2234_v47, %v2232_v43  ;;  %3063 = vmatprep.subr.mxu1 %v3019_v17 }
 0x353   : > { %4720 = vmatprep.mubr.f32.mxu1 %v2207_v22  ;;  %v2239_v8 = vsel %vm2238_vm14, %v7874_v59, %v2237_v56  ;;  %3064 = vmatpush1.msra.mxu1 %v3018_v37  ;;  %v3013_v59 = vld [vmem:[#allocation13 + $0xc8] sm:$0xff] }
 0x354   : > { %v2242_v31 = vsel %vm2240_vm15, %v2241_v46, %v2239_v8  ;;  %3065 = vmatprep.subr.mxu1 %v3016_v19 }
 0x355   : > { %3066 = vmatpush1.msra.mxu1 %v3015_v60 }
 0x356   : > { %4721 = vmatmul.mubr.f32.gmra.mxu1 %v2214_v20  ;;  %3067 = vmatprep.subr.mxu1 %v3013_v59 }
 0x357   : > { %4723 = vmatprep.mubr.f32.mxu1 %v2221_v50  ;;  %3068 = vmatpush1.msra.mxu1 %v3012_v10 }
 0x358   : > { %3069 = vmatprep.subr.mxu1 %v3010_v26 }
 0x359   : > { %3070 = vmatpush1.msra.mxu1 %v3009_v9 }
 0x35a   : > { %4724 = vmatmul.mubr.f32.gmra.mxu1 %v2228_v32  ;;  %3071 = vmatprep.subr.mxu1 %v3007_v29 }
 0x35b   : > { %4726 = vmatprep.mubr.f32.mxu1 %v2235_v11  ;;  %3072 = vmatpush1.msra.mxu1 %v3006_v51 }
 0x35c   : > { %3073 = vmatprep.subr.mxu1 %v3004_v39 }
 0x35d   : > { %3074 = vmatpush1.msra.mxu1 %v3003_v25 }
 0x35e   : > { %4727 = vmatmul.mubr.f32.gmra.mxu1 %v2242_v31  ;;  %3075 = vmatprep.subr.mxu1 %v3001_v2  ;;  %v8009_v31 = vld [vmem:[#allocation11] ss:$0 sm:$0xff] }
 0x35f   : > { %3117 = vmatprep.mubr.f32.mxu1 %v9581_v53  ;;  %3076 = vmatpush1.msra.mxu1 %v3000_v62 }
 0x360   : > { %3077 = vmatprep.subr.mxu1 %v2998_v0 }
 0x361   : > { %3078 = vmatpush1.msra.mxu1 %v2997_v55 }
 0x362   : > { %3079 = vmatprep.subr.mxu1 %v2995_v58 }
 0x363   : > { %3080 = vmatpush1.msra.mxu1 %v2994_v38 }
 0x364   : > { %3081 = vmatprep.subr.mxu1 %v2992_v27 }
 0x365   : > { %3082 = vmatpush1.msra.mxu1 %v2991_v1 }
 0x366   : > { %3083 = vmatprep.subr.mxu1 %v2989_v42 }
 0x367   : > { %3084 = vmatpush1.msra.mxu1 %v2988_v35 }
 0x368   : > { %4729 = vmatprep.subr.mxu1 %v7968_v16 }
 0x376   : > { %v4603_v23 = vpop.f32.mrf.mxu1 }
 0x378   : > { %v2341_v57 = vpop.f32.mrf.mxu1 }
 0x37e   : > { %v4606_v13 = vpop.f32.mrf.mxu1 }
 0x380   : > { %v2351_v12 = vpop.f32.mrf.mxu1 }
 0x386   : > { %v4609_v49 = vpop.f32.mrf.mxu1 }
 0x388   : > { %v2361_v7 = vpop.f32.mrf.mxu1 }
 0x38e   : > { %v4612_v48 = vpop.f32.mrf.mxu1 }
 0x390   : > { %v2371_v33 = vpop.f32.mrf.mxu1 }
 0x397   : > { %v7958_v40 = vpop.f32.mrf.mxu1 }
 0x399   : > { %v7960_v14 = vpop.f32.mrf.mxu1 }
 0x39e   : > { %v7962_v22 = vpop.f32.mrf.mxu1 }
 0x3a0   : > { %v7964_v61 = vpop.f32.mrf.mxu1 }
 0x3a6   : > { %v7966_v36 = vpop.f32.mrf.mxu1 }
 0x3a8   : > { %v7971_v54 = vpop.f32.mrf.mxu1 }
 0x3ae   : > { %v7973_v52 = vpop.f32.mrf.mxu1 }
 0x3b0   : > { %v7975_v34 = vpop.f32.mrf.mxu1 }
 0x3b6   : > { %v7977_v18 = vpop.f32.mrf.mxu1 }
 0x3b8   : > { %v7979_v21 = vpop.f32.mrf.mxu1 }
 0x3be   : > { %v7981_v20 = vpop.f32.mrf.mxu1 }
 0x3c0   : > { %v7983_v6 = vpop.f32.mrf.mxu1 }
 0x3c6   : > { %v7985_v50 = vpop.f32.mrf.mxu1 }
 0x3c8   : > { %v7987_v4 = vpop.f32.mrf.mxu1 }
 0x3ce   : > { %v7989_v47 = vpop.f32.mrf.mxu1 }
 0x3d0   : > { %v7991_v56 = vpop.f32.mrf.mxu1 }
 0x3d2   : > { %v7993_v43 = vpop.f32.mrf.mxu1 }
 0x3d4   : > { %v7995_v24 = vpop.f32.mrf.mxu1 }
 0x3d6   : > { %v7997_v63 = vpop.f32.mrf.mxu1 }
 0x3d8   : > { %v7999_v32 = vpop.f32.mrf.mxu1 }
 0x3da   : > { %v8001_v46 = vpop.f32.mrf.mxu1 }
 0x3dc   : > { %v8003_v11 = vpop.f32.mrf.mxu1 }
 0x3de   : > { %v8005_v8 = vpop.f32.mrf.mxu1 }
 0x3e0   : > { %v8007_v30 = vpop.f32.mrf.mxu1 }
 0x3e2   : > { %v4683_v41 = vpop.f32.mrf.mxu1 }
 0x3e3   : > { %v2572_v17 = vadd.f32 %v4683_v41, %v4603_v23 }
 0x3e4   : > { %v2566_v37 = vpop.f32.mrf.mxu1 }
 0x3e5   : > { %v8012_v19 = vadd.f32 %v8009_v31, %v2572_v17  ;;  %v2567_v60 = vadd.f32 %v2566_v37, %v2341_v57 }
 0x3e6   : > { %v4686_v59 = vpop.f32.mrf.mxu1 }
 0x3e7   : > { %v4319_v10 = vmul.f32 -1.442695, %v8012_v19  ;;  %v8016_v26 = vadd.f32 %v8009_v31, %v2567_v60  ;;  %v2582_v9 = vadd.f32 %v4686_v59, %v4606_v13 }
 0x3e8   : > { %v2576_v29 = vpop.f32.mrf.mxu1 }
 0x3e9   : > { %5117 = vpow2.f32 %v4319_v10  ;;  %v4318_v51 = vmul.f32 -1.442695, %v8016_v26  ;;  %v8020_v39 = vadd.f32 %v8009_v31, %v2582_v9  ;;  %v2577_v25 = vadd.f32 %v2576_v29, %v2351_v12 }
 0x3ea   : > { %v4689_v2 = vpop.f32.mrf.mxu1 }
 0x3eb   : > { %5119 = vpow2.f32 %v4318_v51  ;;  %v8023_v62 = vadd.f32 %v8009_v31, %v2577_v25  ;;  %v4321_v55 = vmul.f32 -1.442695, %v8020_v39  ;;  %v2592_v38 = vadd.f32 %v4689_v2, %v4609_v49 }
 0x3ec   : > { %v2586_v0 = vpop.f32.mrf.mxu1 }
 0x3ed   : > { %v4320_v58 = vmul.f32 -1.442695, %v8023_v62  ;;  %v2587_v27 = vadd.f32 %v2586_v0, %v2361_v7  ;;  %v8031_v35 = vadd.f32 %v8009_v31, %v2592_v38 }
 0x3ee   : > { %v4692_v1 = vpop.f32.mrf.mxu1 }
 0x3ef   : > { %5121 = vpow2.f32 %v4320_v58  ;;  %v8028_v23 = vadd.f32 %v8009_v31, %v2587_v27  ;;  %v2602_v41 = vadd.f32 %v4692_v1, %v4612_v48  ;;  %v4323_v7 = vmul.f32 -1.442695, %v8031_v35 }
 0x3f0   : > { %v2596_v42 = vpop.f32.mrf.mxu1  ;;  %5123 = vpow2.f32 %v4321_v55 }
 0x3f1   : > { %v4322_v57 = vmul.f32 -1.442695, %v8028_v23  ;;  %v2597_v13 = vadd.f32 %v2596_v42, %v2371_v33  ;;  %v8039_v10 = vadd.f32 %v8009_v31, %v2602_v41 }
 0x3f2   : > { %v4695_v12 = vpop.f32.mrf.mxu1 }
 0x3f3   : > { %v8035_v17 = vadd.f32 %v8009_v31, %v2597_v13  ;;  %5125 = vpow2.f32 %v4322_v57  ;;  %v4325_v0 = vmul.f32 -1.442695, %v8039_v10  ;;  %v2612_v55 = vadd.f32 %v4695_v12, %v7958_v40 }
 0x3f4   : > { %v2606_v49 = vpop.f32.mrf.mxu1  ;;  %5127 = vpow2.f32 %v4323_v7 }
 0x3f5   : > { %v4324_v9 = vmul.f32 -1.442695, %v8035_v17  ;;  %v2607_v29 = vadd.f32 %v2606_v49, %v7960_v14  ;;  %v8051_v42 = vadd.f32 %v8009_v31, %v2612_v55 }
 0x3f6   : > { %v5118_v37 = vpop.eup %5117  ;;  %v4698_v60 = vpop.f32.mrf.mxu1 }
 0x3f7   : > { %v2861_v51 = vadd.f32 1.0, %v5118_v37  ;;  %v8046_v58 = vadd.f32 %v8009_v31, %v2607_v29  ;;  %v4327_v7 = vmul.f32 -1.442695, %v8051_v42  ;;  %v2622_v37 = vadd.f32 %v4698_v60, %v7962_v22 }
 0x3f8   : > { %v5120_v59 = vpop.eup %5119  ;;  %v2616_v33 = vpop.f32.mrf.mxu1 }
 0x3f9   : > { %v2860_v48 = vadd.f32 1.0, %v5120_v59  ;;  %v4326_v57 = vmul.f32 -1.442695, %v8046_v58  ;;  %v2617_v13 = vadd.f32 %v2616_v33, %v7964_v61 }
 0x3fa   : > { %v4701_v25 = vpop.f32.mrf.mxu1 }
 0x3fb   : > { %5129 = vrcp.f32 %v2860_v48  ;;  %v8060_v59 = vadd.f32 %v8009_v31, %v2617_v13  ;;  %v8067_v48 = vadd.f32 %v8009_v31, %v2622_v37  ;;  %v3032_v13 = vld [vmem:[#allocation13 + $0x160] sm:$0xff] }
 0x3fc   : > { %v5122_v2 = vpop.eup %5121  ;;  %5131 = vpow2.f32 %v4324_v9  ;;  %v2626_v38 = vpop.f32.mrf.mxu1 }
 0x3fd   : > { %5133 = vrcp.f32 %v2861_v51  ;;  %v2862_v27 = vadd.f32 1.0, %v5122_v2  ;;  %v5124_v1 = vpop.eup %5123  ;;  %v4328_v2 = vmul.f32 -1.442695, %v8060_v59 }
 0x3fe   : > { %v8048_v14 = vpop.f32.mrf.mxu1  ;;  %5135 = vpow2.f32 %v4325_v0  ;;  %v2863_v49 = vadd.f32 1.0, %v5124_v1  ;;  %v2627_v0 = vadd.f32 %v2626_v38, %v7971_v54  ;;  %v3029_v38 = vld [vmem:[#allocation13 + $0x148] sm:$0xff] }
 0x3ff   : > { %5137 = vrcp.f32 %v2862_v27 }
 0x400   : > { %v2636_v41 = vpop.f32.mrf.mxu1  ;;  %v5126_v40 = vpop.eup %5125  ;;  %5139 = vpow2.f32 %v4326_v57  ;;  %v8082_v54 = vadd.f32 %v8009_v31, %v2627_v0 }
 0x401   : > { %5141 = vrcp.f32 %v2863_v49  ;;  %v2864_v29 = vadd.f32 1.0, %v5126_v40  ;;  %v5128_v51 = vpop.eup %5127  ;;  %v4329_v49 = vmul.f32 -1.442695, %v8067_v48  ;;  %v2632_v40 = vadd.f32 %v4701_v25, %v7966_v36  ;;  %v3026_v36 = vld [vmem:[#allocation13 + $0x130] sm:$0xff] }
 0x402   : > { %v8055_v12 = vpop.f32.mrf.mxu1  ;;  %5143 = vpow2.f32 %v4327_v7  ;;  %v2865_v27 = vadd.f32 1.0, %v5128_v51  ;;  %v2637_v0 = vadd.f32 %v2636_v41, %v7975_v34  ;;  %v3020_v34 = vld [vmem:[#allocation13 + $0x100] sm:$0xff]  ;;  %v2642_v41 = vadd.f32 %v8048_v14, %v7973_v52 }
 0x403   : > { %5145 = vrcp.f32 %v2864_v29 }
 0x404   : > { %v8062_v9 = vpop.f32.mrf.mxu1  ;;  %5147 = vpow2.f32 %v4328_v2  ;;  %v4330_v2 = vmul.f32 -1.442695, %v8082_v54 }
 0x405   : > { %5149 = vrcp.f32 %v2865_v27 }
 0x406   : > { %v8064_v61 = vpop.f32.mrf.mxu1  ;;  %5151 = vpow2.f32 %v4329_v49 }
 0x408   : > { %v5130_v33 = vpop.eup %5129  ;;  %v8071_v22 = vpop.f32.mrf.mxu1 }
 0x409   : > { %v5132_v60 = vpop.eup %5131  ;;  %v8074_v55 = vmul.f32 %v5130_v33, %v8016_v26 }
 0x40a   : > { %v5134_v1 = vpop.eup %5133  ;;  %v8076_v57 = vpop.f32.mrf.mxu1  ;;  %v2866_v37 = vadd.f32 1.0, %v5132_v60  ;;  %v3023_v60 = vld [vmem:[#allocation13 + $0x118] sm:$0xff] }
 0x40b   : > { %3118 = vmatmul.mubr.f32.vlgmr.msra.gmra.mxu1 %v8074_v55  ;;  %v5136_v7 = vpop.eup %5135  ;;  %v8089_v29 = vmul.f32 %v5134_v1, %v8012_v19 }
 0x40c   : > { %4730 = vmatpush3.msra.mxu1 %v7968_v16  ;;  %v8085_v26 = vpop.f32.mrf.mxu1  ;;  %3123 = vmatprep.mubr.f32.mxu1 %v9581_v53  ;;  %v5138_v51 = vpop.eup %5137  ;;  %v8094_v16 = vadd.f32 %v8009_v31, %v2632_v40  ;;  %v2867_v1 = vadd.f32 1.0, %v5136_v7  ;;  %5153 = vrcp.f32 %v2866_v37  ;;  %v8113_v37 = vadd.f32 %v8009_v31, %v2637_v0 }
 0x40d   : > { %4731 = vmatprep.subr.mxu1 %v3032_v13  ;;  %v5140_v27 = vpop.eup %5139  ;;  %5155 = vpow2.f32 %v4330_v2  ;;  %v3014_v2 = vld [vmem:[#allocation13 + $0xd0] sm:$0xff]  ;;  %v8125_v0 = vadd.f32 %v8009_v31, %v2642_v41 }
 0x40e   : > { %v4716_v33 = vpop.f32.mrf.mxu1  ;;  %4732 = vmatpush3.msra.mxu1 %v3032_v13  ;;  %v8105_v13 = vmul.f32 %v5138_v51, %v8023_v62  ;;  %v5142_v49 = vpop.eup %5141  ;;  %v4331_v7 = vmul.f32 -1.442695, %v8094_v16  ;;  %v3017_v51 = vld [vmem:[#allocation13 + $0xe8] sm:$0xff]  ;;  %5157 = vrcp.f32 %v2867_v1  ;;  %v2868_v52 = vadd.f32 1.0, %v5140_v27 }
 0x40f   : > { %v2682_v25 = vadd.f32 %v4716_v33, %v7989_v47  ;;  %3124 = vmatmul.mubr.f32.gmra.mxu1 %v8089_v29  ;;  %4733 = vmatprep.subr.mxu1 %v3029_v38  ;;  %v5144_v33 = vpop.eup %5143  ;;  %v8122_v14 = vmul.f32 %v5142_v49, %v8020_v39  ;;  %v4332_v27 = vmul.f32 -1.442695, %v8113_v37  ;;  %v2647_v39 = vadd.f32 %v8062_v9, %v7979_v21  ;;  %v3011_v49 = vld [vmem:[#allocation13 + $0xb8] sm:$0xff]  ;;  %v3008_v21 = vld [vmem:[#allocation13 + $0xa0] sm:$0xff] }
 0x410   : > { %v8098_v19 = vpop.f32.mrf.mxu1  ;;  %3129 = vmatprep.mubr.f32.mxu1 %v9581_v53  ;;  %4734 = vmatpush3.msra.mxu1 %v3029_v38  ;;  %5159 = vpow2.f32 %v4331_v7  ;;  %v4333_v9 = vmul.f32 -1.442695, %v8125_v0 }
 0x411   : > { %v8102_v47 = vadd.f32 %v8009_v31, %v2682_v25  ;;  %4735 = vmatprep.subr.mxu1 %v3026_v36  ;;  %5161 = vrcp.f32 %v2868_v52  ;;  %v3005_v52 = vld [vmem:[#allocation13 + $0x88] sm:$0xff] }
 0x412   : > { %v4719_v40 = vpop.f32.mrf.mxu1  ;;  %4736 = vmatpush3.msra.mxu1 %v3026_v36  ;;  %v5146_v36 = vpop.eup %5145  ;;  %5163 = vpow2.f32 %v4332_v27  ;;  %v3002_v27 = vld [vmem:[#allocation13 + $0x70] sm:$0xff] }
 0x413   : > { %v2692_v38 = vadd.f32 %v4719_v40, %v7993_v43  ;;  %3130 = vmatmul.mubr.f32.gmra.mxu1 %v8105_v13  ;;  %4737 = vmatprep.subr.mxu1 %v3023_v60  ;;  %v5148_v40 = vpop.eup %5147  ;;  %v8139_v41 = vmul.f32 %v5146_v36, %v8028_v23 }
 0x414   : > { %v8115_v62 = vpop.f32.mrf.mxu1  ;;  %3135 = vmatprep.mubr.f32.mxu1 %v9581_v53  ;;  %4738 = vmatpush3.msra.mxu1 %v3023_v60 }
 0x415   : > { %v8119_v43 = vadd.f32 %v8009_v31, %v2692_v38  ;;  %4739 = vmatprep.subr.mxu1 %v3020_v34  ;;  %v5150_v38 = vpop.eup %5149 }
 0x416   : > { %v4722_v25 = vpop.f32.mrf.mxu1  ;;  %4740 = vmatpush3.msra.mxu1 %v3020_v34  ;;  %v2869_v34 = vadd.f32 1.0, %v5144_v33  ;;  %v8147_v33 = vadd.f32 %v8009_v31, %v2647_v39  ;;  %v5152_v36 = vpop.eup %5151 }
 0x417   : > { %v2702_v60 = vadd.f32 %v4722_v25, %v7997_v63  ;;  %3136 = vmatmul.mubr.f32.gmra.mxu1 %v8122_v14  ;;  %4741 = vmatprep.subr.mxu1 %v3017_v51 }
 0x418   : > { %v8132_v1 = vpop.f32.mrf.mxu1  ;;  %3141 = vmatprep.mubr.f32.mxu1 %v9581_v53  ;;  %4742 = vmatpush3.msra.mxu1 %v3017_v51  ;;  %v2652_v51 = vadd.f32 %v8055_v12, %v7977_v18  ;;  %5165 = vrcp.f32 %v2869_v34  ;;  %v2999_v34 = vld [vmem:[#allocation13 + $0x58] sm:$0xff] }
 0x419   : > { %v8136_v63 = vadd.f32 %v8009_v31, %v2702_v60  ;;  %4743 = vmatprep.subr.mxu1 %v3014_v2  ;;  %v8156_v60 = vmul.f32 %v5150_v38, %v8031_v35  ;;  %v5154_v18 = vpop.eup %5153  ;;  %5167 = vpow2.f32 %v4333_v9 }
 0x41a   : > { %v4725_v7 = vpop.f32.mrf.mxu1  ;;  %4744 = vmatpush3.msra.mxu1 %v3014_v2  ;;  %v2870_v2 = vadd.f32 1.0, %v5148_v40  ;;  %v8160_v39 = vadd.f32 %v8009_v31, %v2652_v51  ;;  %v2657_v40 = vadd.f32 %v8071_v22, %v7983_v6  ;;  %v5156_v38 = vpop.eup %5155  ;;  %v2996_v51 = vld [vmem:[#allocation13 + $0x40] sm:$0xff] }
 0x41b   : > { %v2712_v25 = vadd.f32 %v4725_v7, %v8001_v46  ;;  %3142 = vmatmul.mubr.f32.gmra.mxu1 %v8139_v41  ;;  %4745 = vmatprep.subr.mxu1 %v3011_v49  ;;  %v2871_v7 = vadd.f32 1.0, %v5152_v36  ;;  %v5158_v9 = vpop.eup %5157  ;;  %v2872_v36 = vadd.f32 1.0, %v5156_v38 }
 0x41c   : > { %v8149_v23 = vpop.f32.mrf.mxu1  ;;  %3147 = vmatprep.mubr.f32.mxu1 %v9581_v53  ;;  %4746 = vmatpush3.msra.mxu1 %v3011_v49  ;;  %v4334_v49 = vmul.f32 -1.442695, %v8147_v33  ;;  %5169 = vrcp.f32 %v2870_v2  ;;  %v4335_v6 = vmul.f32 -1.442695, %v8160_v39  ;;  %v8178_v22 = vadd.f32 %v8009_v31, %v2657_v40 }
 0x41d   : > { %v8153_v46 = vadd.f32 %v8009_v31, %v2712_v25  ;;  %4747 = vmatprep.subr.mxu1 %v3008_v21  ;;  %v8182_v2 = vmul.f32 %v5158_v9, %v8039_v10 }
 0x41e   : > { %v4728_v12 = vpop.f32.mrf.mxu1  ;;  %4748 = vmatpush3.msra.mxu1 %v3008_v21  ;;  %v8168_v21 = vmul.f32 %v5154_v18, %v8035_v17  ;;  %5171 = vpow2.f32 %v4334_v49  ;;  %v2993_v17 = vld [vmem:[#allocation13 + $0x28] sm:$0xff] }
 0x41f   : > { %3148 = vmatmul.mubr.f32.gmra.mxu1 %v8156_v60  ;;  %4749 = vmatprep.subr.mxu1 %v3005_v52  ;;  %v2722_v35 = vadd.f32 %v4728_v12, %v8005_v8  ;;  %v2662_v8 = vadd.f32 %v8064_v61, %v7981_v20  ;;  %5173 = vrcp.f32 %v2871_v7  ;;  %v2990_v12 = vld [vmem:[#allocation13 + $0x10] sm:$0xff]  ;;  %v4336_v61 = vmul.f32 -1.442695, %v8178_v22 }
 0x420   : > { %3153 = vmatprep.mubr.f32.mxu1 %v9581_v53  ;;  %4750 = vmatpush3.msra.mxu1 %v3005_v52  ;;  %v5160_v52 = vpop.eup %5159  ;;  %5175 = vpow2.f32 %v4335_v6 }
 0x421   : > { %4751 = vmatprep.subr.mxu1 %v3002_v27  ;;  %v8171_v25 = vadd.f32 %v8009_v31, %v2722_v35  ;;  %v5162_v18 = vpop.eup %5161  ;;  %v8186_v20 = vadd.f32 %v8009_v31, %v2662_v8  ;;  %v2873_v49 = vadd.f32 1.0, %v5160_v52  ;;  %5177 = vrcp.f32 %v2872_v36 }
 0x422   : > { %4752 = vmatpush3.msra.mxu1 %v3002_v27  ;;  %v2667_v27 = vadd.f32 %v8085_v26, %v7987_v4  ;;  %v5164_v10 = vpop.eup %5163  ;;  %v8193_v40 = vmul.f32 %v5162_v18, %v8046_v58  ;;  %5179 = vpow2.f32 %v4336_v61  ;;  %v2672_v4 = vadd.f32 %v8076_v57, %v7985_v50 }
 0x423   : > { %3154 = vmatmul.mubr.f32.gmra.mxu1 %v8168_v21  ;;  %4753 = vmatprep.subr.mxu1 %v2999_v34  ;;  %v4337_v38 = vmul.f32 -1.442695, %v8186_v20  ;;  %5181 = vrcp.f32 %v2873_v49  ;;  %v2874_v58 = vadd.f32 1.0, %v5164_v10  ;;  %v2677_v50 = vadd.f32 %v8098_v19, %v7991_v56 }
 0x424   : > { %3159 = vmatprep.mubr.f32.mxu1 %v9581_v53  ;;  %4754 = vmatpush3.msra.mxu1 %v2999_v34  ;;  %v8200_v26 = vadd.f32 %v8009_v31, %v2667_v27  ;;  %v2687_v61 = vadd.f32 %v8115_v62, %v7995_v24 }
 0x425   : > { %4755 = vmatprep.subr.mxu1 %v2996_v51  ;;  %v5166_v35 = vpop.eup %5165  ;;  %5183 = vpow2.f32 %v4337_v38  ;;  %v8220_v36 = vadd.f32 %v8009_v31, %v2677_v50 }
 0x426   : > { %4756 = vmatpush3.msra.mxu1 %v2996_v51  ;;  %v5168_v34 = vpop.eup %5167  ;;  %v8204_v7 = vmul.f32 %v5166_v35, %v8051_v42  ;;  %v8208_v51 = vadd.f32 %v8009_v31, %v2672_v4  ;;  %v4338_v6 = vmul.f32 -1.442695, %v8200_v26  ;;  %5185 = vrcp.f32 %v2874_v58 }
 0x427   : > { %3160 = vmatmul.mubr.f32.gmra.mxu1 %v8182_v2  ;;  %4757 = vmatprep.subr.mxu1 %v2993_v17  ;;  %v2875_v8 = vadd.f32 1.0, %v5168_v34  ;;  %v8237_v34 = vadd.f32 %v8009_v31, %v2687_v61  ;;  %v2697_v58 = vadd.f32 %v8132_v1, %v7999_v32 }
 0x428   : > { %3165 = vmatprep.mubr.f32.mxu1 %v9581_v53  ;;  %4758 = vmatpush3.msra.mxu1 %v2993_v17  ;;  %v4339_v52 = vmul.f32 -1.442695, %v8208_v51  ;;  %5187 = vpow2.f32 %v4338_v6 }
 0x429   : > { %4759 = vmatprep.subr.mxu1 %v2990_v12  ;;  %v5170_v9 = vpop.eup %5169  ;;  %5189 = vrcp.f32 %v2875_v8  ;;  %v8254_v8 = vadd.f32 %v8009_v31, %v2697_v58  ;;  %v4347_v58 = vmul.f32 -1.442695, %v8153_v46 }
 0x42a   : > { %4760 = vmatpush3.msra.mxu1 %v2990_v12  ;;  %v8215_v42 = vmul.f32 %v5170_v9, %v8060_v59  ;;  %5191 = vpow2.f32 %v4339_v52  ;;  %v4340_v59 = vmul.f32 -1.442695, %v8220_v36 }
 0x42b   : > { %3166 = vmatmul.mubr.f32.gmra.mxu1 %v8193_v40  ;;  %v5172_v57 = vpop.eup %5171 }
 0x42c   : > { %3171 = vmatprep.mubr.f32.mxu1 %v9581_v53  ;;  %v5174_v17 = vpop.eup %5173  ;;  %v2876_v19 = vadd.f32 1.0, %v5172_v57 }
 0x42d   : > { %v5176_v56 = vpop.eup %5175  ;;  %v8224_v18 = vmul.f32 %v5174_v17, %v8067_v48  ;;  %v4341_v48 = vmul.f32 -1.442695, %v8102_v47 }
 0x42e   : > { %v5178_v12 = vpop.eup %5177  ;;  %v2877_v10 = vadd.f32 1.0, %v5176_v56  ;;  %5193 = vrcp.f32 %v2876_v19  ;;  %v2707_v56 = vadd.f32 %v8149_v23, %v8003_v11 }
 0x42f   : > { %3172 = vmatmul.mubr.f32.gmra.mxu1 %v8204_v7  ;;  %v5180_v27 = vpop.eup %5179  ;;  %v8232_v49 = vmul.f32 %v5178_v12, %v8082_v54  ;;  %5195 = vpow2.f32 %v4340_v59  ;;  %v4342_v54 = vmul.f32 -1.442695, %v8237_v34 }
 0x430   : > { %3177 = vmatprep.mubr.f32.mxu1 %v9581_v53  ;;  %v5182_v35 = vpop.eup %5181  ;;  %5197 = vrcp.f32 %v2877_v10  ;;  %v2878_v62 = vadd.f32 1.0, %v5180_v27  ;;  %v8271_v27 = vadd.f32 %v8009_v31, %v2707_v56  ;;  %v2716_v10 = vpop.f32.mrf.mxu1 }
 0x431   : > { %v8241_v38 = vmul.f32 %v5182_v35, %v8094_v16  ;;  %5199 = vpow2.f32 %v4341_v48  ;;  %v4343_v16 = vmul.f32 -1.442695, %v8119_v43 }
 0x432   : > { %v5184_v24 = vpop.eup %5183  ;;  %5201 = vrcp.f32 %v2878_v62  ;;  %v4346_v48 = vmul.f32 -1.442695, %v8271_v27 }
 0x433   : > { %3178 = vmatmul.mubr.f32.gmra.mxu1 %v8215_v42  ;;  %v5186_v4 = vpop.eup %5185  ;;  %v2879_v6 = vadd.f32 1.0, %v5184_v24  ;;  %5203 = vpow2.f32 %v4342_v54  ;;  %v2717_v24 = vadd.f32 %v2716_v10, %v8007_v30 }
 0x434   : > { %3183 = vmatprep.mubr.f32.mxu1 %v9581_v53  ;;  %v8249_v50 = vmul.f32 %v5186_v4, %v8113_v37  ;;  %v4344_v37 = vmul.f32 -1.442695, %v8254_v8 }
 0x435   : > { %v5188_v9 = vpop.eup %5187  ;;  %5205 = vrcp.f32 %v2879_v6 }
 0x436   : > { %v5190_v57 = vpop.eup %5189  ;;  %v2880_v1 = vadd.f32 1.0, %v5188_v9  ;;  %5207 = vpow2.f32 %v4343_v16  ;;  %v8287_v9 = vadd.f32 %v8009_v31, %v2717_v24 }
 0x437   : > { %3184 = vmatmul.mubr.f32.gmra.mxu1 %v8224_v18  ;;  %v5192_v32 = vpop.eup %5191  ;;  %v8258_v17 = vmul.f32 %v5190_v57, %v8125_v0  ;;  %v4345_v0 = vmul.f32 -1.442695, %v8136_v63 }
 0x438   : > { %3189 = vmatprep.mubr.f32.mxu1 %v9581_v53  ;;  %v2881_v59 = vadd.f32 1.0, %v5192_v32  ;;  %5209 = vrcp.f32 %v2880_v1  ;;  %v4348_v16 = vmul.f32 -1.442695, %v8287_v9 }
 0x439   : > { %5211 = vpow2.f32 %v4344_v37 }
 0x43a   : > { %5213 = vrcp.f32 %v2881_v59 }
 0x43b   : > { %3190 = vmatmul.mubr.f32.gmra.mxu1 %v8232_v49  ;;  %v5194_v52 = vpop.eup %5193  ;;  %5215 = vpow2.f32 %v4345_v0 }
 0x43c   : > { %3195 = vmatprep.mubr.f32.mxu1 %v9581_v53  ;;  %v5196_v19 = vpop.eup %5195  ;;  %v8266_v12 = vmul.f32 %v5194_v52, %v8147_v33 }
 0x43d   : > { %v5198_v61 = vpop.eup %5197  ;;  %v2882_v33 = vadd.f32 1.0, %v5196_v19 }
 0x43e   : > { %v5200_v11 = vpop.eup %5199  ;;  %v8275_v23 = vmul.f32 %v5198_v61, %v8160_v39 }
 0x43f   : > { %3196 = vmatmul.mubr.f32.gmra.mxu1 %v8241_v38  ;;  %v5202_v35 = vpop.eup %5201  ;;  %v2883_v54 = vadd.f32 1.0, %v5200_v11  ;;  %5217 = vrcp.f32 %v2882_v33 }
 0x440   : > { %3201 = vmatprep.mubr.f32.mxu1 %v9581_v53  ;;  %v5204_v62 = vpop.eup %5203  ;;  %v8282_v4 = vmul.f32 %v5202_v35, %v8178_v22  ;;  %5219 = vpow2.f32 %v4346_v48 }
 0x441   : > { %5221 = vrcp.f32 %v2883_v54  ;;  %v2884_v22 = vadd.f32 1.0, %v5204_v62 }
 0x442   : > { %v5206_v39 = vpop.eup %5205  ;;  %5223 = vpow2.f32 %v4347_v58 }
 0x443   : > { %3202 = vmatmul.mubr.f32.gmra.mxu1 %v8249_v50  ;;  %v5208_v30 = vpop.eup %5207  ;;  %v8291_v6 = vmul.f32 %v5206_v39, %v8186_v20  ;;  %5225 = vrcp.f32 %v2884_v22  ;;  %v4349_v20 = vmul.f32 -1.442695, %v8171_v25 }
 0x444   : > { %3207 = vmatprep.mubr.f32.mxu1 %v9581_v53  ;;  %v2885_v1 = vadd.f32 1.0, %v5208_v30  ;;  %5227 = vpow2.f32 %v4348_v16 }
 0x445   : > { %v5210_v57 = vpop.eup %5209 }
 0x446   : > { %v5212_v32 = vpop.eup %5211  ;;  %v8297_v31 = vmul.f32 %v5210_v57, %v8200_v26  ;;  %5229 = vrcp.f32 %v2885_v1 }
 0x447   : > { %3208 = vmatmul.mubr.f32.gmra.mxu1 %v8258_v17  ;;  %v5214_v52 = vpop.eup %5213  ;;  %v2886_v19 = vadd.f32 1.0, %v5212_v32  ;;  %5231 = vpow2.f32 %v4349_v20 }
 0x448   : > { %3213 = vmatprep.mubr.f32.mxu1 %v9581_v53  ;;  %v5216_v37 = vpop.eup %5215  ;;  %v8303_v56 = vmul.f32 %v5214_v52, %v8208_v51 }
 0x449   : > { %v2887_v0 = vadd.f32 1.0, %v5216_v37  ;;  %5233 = vrcp.f32 %v2886_v19  ;;  %v9587_v37 = vld [vmem:[#allocation75_spill] sm:$0xff]  ;;  %v9588_v19 = vld [vmem:[#allocation157_spill] sm:$0xff] }
 0x44b   : > { %3214 = vmatmul.mubr.f32.gmra.mxu1 %v8266_v12  ;;  %5235 = vrcp.f32 %v2887_v0 }
 0x44c   : > { %3219 = vmatprep.mubr.f32.mxu1 %v9581_v53  ;;  %v5218_v59 = vpop.eup %5217 }
 0x44d   : > { %v5220_v26 = vpop.eup %5219  ;;  %v8308_v61 = vmul.f32 %v5218_v59, %v8220_v36 }
 0x44e   : > { %v5222_v11 = vpop.eup %5221  ;;  %v2888_v10 = vadd.f32 1.0, %v5220_v26 }
 0x44f   : > { %3220 = vmatmul.mubr.f32.gmra.mxu1 %v8275_v23  ;;  %v5224_v51 = vpop.eup %5223  ;;  %v8313_v33 = vmul.f32 %v5222_v11, %v8102_v47  ;;  %v8397_v11 = vld [vmem:[%s5938_s27 + $0x8] sm:$0xff] }
 0x450   : > { %3225 = vmatprep.mubr.f32.mxu1 %v9581_v53  ;;  %v5226_v35 = vpop.eup %5225  ;;  %v2889_v24 = vadd.f32 1.0, %v5224_v51  ;;  %5237 = vrcp.f32 %v2888_v10  ;;  %v9589_v10 = vld [vmem:[#allocation37_spill] sm:$0xff] }
 0x451   : > { %v5228_v36 = vpop.eup %5227  ;;  %v2980_v48 = vmul.f32 %v5226_v35, %v8237_v34 }
 0x452   : > { %5239 = vrcp.f32 %v2889_v24  ;;  %v2890_v39 = vadd.f32 1.0, %v5228_v36  ;;  %v9590_v36 = vld [vmem:[#allocation78_spill] sm:$0xff]  ;;  %v9591_v24 = vld [vmem:[#allocation156_spill] sm:$0xff] }
 0x453   : > { %3226 = vmatmul.mubr.f32.gmra.mxu1 %v8282_v4  ;;  %v5230_v62 = vpop.eup %5229 }
 0x454   : > { %3231 = vmatprep.mubr.f32.mxu1 %v9581_v53  ;;  %v5232_v54 = vpop.eup %5231  ;;  %v2981_v47 = vmul.f32 %v5230_v62, %v8119_v43  ;;  %5241 = vrcp.f32 %v2890_v39 }
 0x455   : > { %v2891_v22 = vadd.f32 1.0, %v5232_v54 }
 0x456   : > { %v5234_v58 = vpop.eup %5233 }
 0x457   : > { %3232 = vmatmul.mubr.f32.gmra.mxu1 %v8291_v6  ;;  %v2982_v30 = vmul.f32 %v5234_v58, %v8254_v8  ;;  %5243 = vrcp.f32 %v2891_v22 }
 0x458   : > { %3237 = vmatprep.mubr.f32.mxu1 %v9581_v53  ;;  %v5236_v34 = vpop.eup %5235 }
 0x459   : > { %v2983_v57 = vmul.f32 %v5236_v34, %v8136_v63 }
 0x45b   : > { %3238 = vmatmul.mubr.f32.gmra.mxu1 %v8297_v31 }
 0x45c   : > { %3243 = vmatprep.mubr.f32.mxu1 %v9581_v53 }
 0x45d   : > { %v5238_v16 = vpop.eup %5237 }
 0x45e   : > { %v2984_v43 = vmul.f32 %v5238_v16, %v8271_v27  ;;  %v9593_v16 = vld [vmem:[#allocation76_spill] sm:$0xff] }
 0x45f   : > { %3244 = vmatmul.mubr.f32.gmra.mxu1 %v8303_v56  ;;  %v5240_v32 = vpop.eup %5239 }
 0x460   : > { %3249 = vmatprep.mubr.f32.mxu1 %v9581_v53  ;;  %v2985_v8 = vmul.f32 %v5240_v32, %v8153_v46  ;;  %v9594_v32 = vld [vmem:[#allocation38_spill] sm:$0xff] }
 0x461   : > { %v5242_v1 = vpop.eup %5241 }
 0x462   : > { %v2986_v52 = vmul.f32 %v5242_v1, %v8287_v9  ;;  %v9595_v1 = vld [vmem:[#allocation81_spill] sm:$0xff] }
 0x463   : > { %3250 = vmatmul.mubr.f32.gmra.mxu1 %v8308_v61 }
 0x464   : > { %3255 = vmatprep.mubr.f32.mxu1 %v9581_v53  ;;  %v5244_v63 = vpop.eup %5243 }
 0x465   : > { %v2987_v20 = vmul.f32 %v5244_v63, %v8171_v25  ;;  %v9596_v63 = vld [vmem:[#allocation162_spill] sm:$0xff] }
 0x467   : > { %3256 = vmatmul.mubr.f32.gmra.mxu1 %v8313_v33 }
 0x468   : > { %3261 = vmatprep.mubr.f32.mxu1 %v9581_v53 }
 0x46b   : > { %3262 = vmatmul.mubr.f32.gmra.mxu1 %v2980_v48 }
 0x46c   : > { %3267 = vmatprep.mubr.f32.mxu1 %v9581_v53 }
 0x46f   : > { %3268 = vmatmul.mubr.f32.gmra.mxu1 %v2981_v47 }
 0x470   : > { %3273 = vmatprep.mubr.f32.mxu1 %v9581_v53 }
 0x473   : > { %3274 = vmatmul.mubr.f32.gmra.mxu1 %v2982_v30 }
 0x474   : > { %3279 = vmatprep.mubr.f32.mxu1 %v9581_v53 }
 0x477   : > { %3280 = vmatmul.mubr.f32.gmra.mxu1 %v2983_v57 }
 0x478   : > { %3285 = vmatprep.mubr.f32.mxu1 %v9581_v53 }
 0x47b   : > { %3286 = vmatmul.mubr.f32.gmra.mxu1 %v2984_v43 }
 0x47c   : > { %3291 = vmatprep.mubr.f32.mxu1 %v9581_v53 }
 0x47f   : > { %3292 = vmatmul.mubr.f32.gmra.mxu1 %v2985_v8 }
 0x480   : > { %3297 = vmatprep.mubr.f32.mxu1 %v9581_v53 }
 0x483   : > { %3298 = vmatmul.mubr.f32.gmra.mxu1 %v2986_v52 }
 0x484   : > { %3303 = vmatprep.mubr.f32.mxu1 %v9581_v53  ;;  %v3038_v53 = vlaneseq }
 0x487   : > { %3304 = vmatmul.mubr.f32.gmra.mxu1 %v2987_v20 }
 0x488   : > { %4761 = vmatprep.mubr.f32.mxu1 %v8074_v55  ;;  %v8356_v55 = vshrl.u32 %v3038_v53, 7 }
 0x48b   : > { %4762 = vmatmul.mubr.f32.vlgmr.msra.gmra.mxu1 %v8089_v29  ;;  %v3040_v29 = vsub.s32 0, %v8356_v55 }
 0x48c   : > { %4764 = vmatprep.mubr.f32.mxu1 %v8105_v13  ;;  %v8359_v13 = vld [vmem:[#allocation14] sm:$0x7] }
 0x48f   : > { %4765 = vmatmul.mubr.f32.gmra.mxu1 %v8122_v14  ;;  %v3044_v14 = vsub.s32 1, %v8356_v55 }
 0x490   : > { %4767 = vmatprep.mubr.f32.mxu1 %v8139_v41  ;;  %v8363_v41 = vrot.slane %v8359_v13, %v3040_v29 }
 0x491   : > { %v8366_v46 = vrot.slane %v8359_v13, %v3044_v14 }
 0x493   : > { %4768 = vmatmul.mubr.f32.gmra.mxu1 %v8156_v60 }
 0x494   : > { %4770 = vmatprep.mubr.f32.mxu1 %v8168_v21 }
 0x497   : > { %4771 = vmatmul.mubr.f32.gmra.mxu1 %v8182_v2  ;;  %v9582_v2 = vld [vmem:[#allocation35_spill] sm:$0xff] }
 0x498   : > { %4773 = vmatprep.mubr.f32.mxu1 %v8193_v40 }
 0x49b   : > { %4774 = vmatmul.mubr.f32.gmra.mxu1 %v8204_v7  ;;  %v9583_v7 = vld [vmem:[#allocation74_spill] sm:$0xff] }
 0x49c   : > { %4776 = vmatprep.mubr.f32.mxu1 %v8215_v42 }
 0x49f   : > { %4777 = vmatmul.mubr.f32.gmra.mxu1 %v8224_v18  ;;  %v9584_v18 = vld [vmem:[#allocation147_spill] sm:$0xff] }
 0x4a0   : > { %4779 = vmatprep.mubr.f32.mxu1 %v8232_v49 }
 0x4a3   : > { %4780 = vmatmul.mubr.f32.gmra.mxu1 %v8241_v38 }
 0x4a4   : > { %4782 = vmatprep.mubr.f32.mxu1 %v8249_v50 }
 0x4a7   : > { %4783 = vmatmul.mubr.f32.gmra.mxu1 %v8258_v17  ;;  %v8381_v17 = vld [vmem:[%s5938_s27] sm:$0xff] }
 0x4a8   : > { %4785 = vmatprep.mubr.f32.mxu1 %v8266_v12 }
 0x4ab   : > { %4786 = vmatmul.mubr.f32.gmra.mxu1 %v8275_v23 }
 0x4ac   : > { %4788 = vmatprep.mubr.f32.mxu1 %v8282_v4  ;;  %v9585_v4 = vld [vmem:[#allocation148_spill] sm:$0xff] }
 0x4af   : > { %4789 = vmatmul.mubr.f32.gmra.mxu1 %v8291_v6  ;;  %v9586_v6 = vld [vmem:[#allocation36_spill] sm:$0xff] }
 0x4b0   : > { %4791 = vmatprep.mubr.f32.mxu1 %v8297_v31 }
 0x4b3   : > { %4792 = vmatmul.mubr.f32.gmra.mxu1 %v8303_v56 }
 0x4b4   : > { %4794 = vmatprep.mubr.f32.mxu1 %v8308_v61 }
 0x4b7   : > { %4795 = vmatmul.mubr.f32.gmra.mxu1 %v8313_v33 }
 0x4b8   : > { %4797 = vmatprep.mubr.f32.mxu1 %v2980_v48 }
 0x4bb   : > { %4798 = vmatmul.mubr.f32.gmra.mxu1 %v2981_v47  ;;  %v9592_v47 = vld [vmem:[#allocation159_spill] sm:$0xff] }
 0x4bc   : > { %4800 = vmatprep.mubr.f32.mxu1 %v2982_v30  ;;  %v8411_v30 = vld [vmem:[%s5938_s27 + $0x10] sm:$0xff] }
 0x4bf   : > { %4801 = vmatmul.mubr.f32.gmra.mxu1 %v2983_v57 }
 0x4c0   : > { %4803 = vmatprep.mubr.f32.mxu1 %v2984_v43 }
 0x4c3   : > { %4804 = vmatmul.mubr.f32.gmra.mxu1 %v2985_v8 }
 0x4c4   : > { %4806 = vmatprep.mubr.f32.mxu1 %v2986_v52 }
 0x4c7   : > { %4807 = vmatmul.mubr.f32.gmra.mxu1 %v2987_v20 }
 0x4cb   : > { %v3119_v60 = vpop.f32.mrf.mxu1 }
 0x4cc   : > { %v3120_v21 = vadd.f32 %v3119_v60, %v8363_v41  ;;  %v8427_v60 = vld [vmem:[%s5938_s27 + $0x18] sm:$0xff] }
 0x4cd   : > { %v3121_v25 = vpop.f32.mrf.mxu1 }
 0x4ce   : > { %v3855_v40 = vmul.f32 %v3120_v21, %v9582_v2  ;;  %v3919_v42 = vmul.f32 %v3120_v21, %v9583_v7  ;;  %v3984_v49 = vmul.f32 %v3120_v21, %v9584_v18  ;;  %v3122_v38 = vadd.f32 %v3121_v25, %v8366_v46  ;;  %v9597_v2 = vld [vmem:[#allocation39_spill] sm:$0xff]  ;;  %v9598_v7 = vld [vmem:[#allocation84_spill] sm:$0xff]  ;;  %v9599_v18 = vld [vmem:[#allocation165_spill] sm:$0xff] }
 0x4cf   : > { %v3125_v50 = vpop.f32.mrf.mxu1 }
 0x4d0   : > { %3887 = vst [vmem:[%s8375_s20] sm:$0xff] %v3855_v40  ;;  %4350 = vst [vmem:[%s8375_s20 + $0x100] sm:$0xff] %v3919_v42  ;;  %v3695_v12 = vmul.f32 %v8381_v17, %v3122_v38  ;;  %v3126_v27 = vadd.f32 %v3125_v50, %v8363_v41  ;;  %v9600_v50 = vld [vmem:[#allocation79_spill] sm:$0xff] }
 0x4d1   : > { %4382 = vst [vmem:[%s8375_s20 + $0x200] sm:$0xff] %v3984_v49  ;;  %v3127_v23 = vpop.f32.mrf.mxu1 }
 0x4d2   : > { %v8386_v9 = vmul.f32 %v3695_v12, %v9585_v4  ;;  %v3856_v31 = vmul.f32 %v3126_v27, %v9586_v6  ;;  %v3920_v56 = vmul.f32 %v3126_v27, %v9587_v37  ;;  %v3985_v59 = vmul.f32 %v3126_v27, %v9588_v19  ;;  %v9601_v37 = vld [vmem:[#allocation164_spill] sm:$0xff] }
 0x4d3   : > { %v3128_v26 = vadd.f32 %v3127_v23, %v8366_v46  ;;  %v3131_v61 = vpop.f32.mrf.mxu1  ;;  %v8441_v23 = vld [vmem:[%s5938_s27 + $0x20] sm:$0xff]  ;;  %v9602_v19 = vld [vmem:[#allocation40_spill] sm:$0xff] }
 0x4d4   : > { %3888 = vst [vmem:[%s8375_s20 + $0x8] sm:$0xff] %v3856_v31  ;;  %4351 = vst [vmem:[%s8375_s20 + $0x108] sm:$0xff] %v3920_v56  ;;  %v3132_v0 = vadd.f32 %v3131_v61, %v8363_v41 }
 0x4d5   : > { %4383 = vst [vmem:[%s8375_s20 + $0x208] sm:$0xff] %v3985_v59  ;;  %v3696_v51 = vmul.f32 %v8397_v11, %v3128_v26  ;;  %v3133_v33 = vpop.f32.mrf.mxu1  ;;  %v9603_v26 = vld [vmem:[#allocation87_spill] sm:$0xff] }
 0x4d6   : > { %v3857_v35 = vmul.f32 %v3132_v0, %v9589_v10  ;;  %v3921_v48 = vmul.f32 %v3132_v0, %v9590_v36  ;;  %v3986_v62 = vmul.f32 %v3132_v0, %v9591_v24  ;;  %v3134_v54 = vadd.f32 %v3133_v33, %v8366_v46  ;;  %v9604_v0 = vld [vmem:[#allocation170_spill] sm:$0xff]  ;;  %v8457_v36 = vld [vmem:[%s5938_s27 + $0x28] sm:$0xff] }
 0x4d7   : > { %v8405_v39 = vmul.f32 %v3696_v51, %v9592_v47  ;;  %v3137_v58 = vpop.f32.mrf.mxu1  ;;  %v9606_v47 = vld [vmem:[#allocation90_spill] sm:$0xff] }
 0x4d8   : > { %3889 = vst [vmem:[%s8375_s20 + $0x10] sm:$0xff] %v3857_v35  ;;  %4352 = vst [vmem:[%s8375_s20 + $0x110] sm:$0xff] %v3921_v48  ;;  %v3697_v22 = vmul.f32 %v8411_v30, %v3134_v54  ;;  %v3138_v34 = vadd.f32 %v3137_v58, %v8363_v41 }
 0x4d9   : > { %4384 = vst [vmem:[%s8375_s20 + $0x210] sm:$0xff] %v3986_v62  ;;  %v3139_v57 = vpop.f32.mrf.mxu1  ;;  %v9605_v62 = vld [vmem:[#allocation41_spill] sm:$0xff] }
 0x4da   : > { %v8416_v43 = vmul.f32 %v3697_v22, %v9593_v16  ;;  %v3858_v8 = vmul.f32 %v3138_v34, %v9594_v32  ;;  %v3922_v52 = vmul.f32 %v3138_v34, %v9595_v1  ;;  %v3987_v20 = vmul.f32 %v3138_v34, %v9596_v63  ;;  %v9607_v22 = vld [vmem:[#allocation82_spill] sm:$0xff]  ;;  %v9608_v16 = vld [vmem:[#allocation83_spill] sm:$0xff]  ;;  %v8471_v1 = vld [vmem:[%s5938_s27 + $0x30] sm:$0xff] }
 0x4db   : > { %v3140_v53 = vadd.f32 %v3139_v57, %v8366_v46  ;;  %v3143_v29 = vpop.f32.mrf.mxu1 }
 0x4dc   : > { %3890 = vst [vmem:[%s8375_s20 + $0x18] sm:$0xff] %v3858_v8  ;;  %4353 = vst [vmem:[%s8375_s20 + $0x118] sm:$0xff] %v3922_v52  ;;  %v3144_v14 = vadd.f32 %v3143_v29, %v8363_v41 }
 0x4dd   : > { %4385 = vst [vmem:[%s8375_s20 + $0x218] sm:$0xff] %v3987_v20  ;;  %v3698_v21 = vmul.f32 %v8427_v60, %v3140_v53  ;;  %v3145_v25 = vpop.f32.mrf.mxu1  ;;  %v9609_v53 = vld [vmem:[#allocation85_spill] sm:$0xff] }
 0x4de   : > { %v3859_v40 = vmul.f32 %v3144_v14, %v9597_v2  ;;  %v3923_v42 = vmul.f32 %v3144_v14, %v9598_v7  ;;  %v3988_v49 = vmul.f32 %v3144_v14, %v9599_v18  ;;  %v3146_v38 = vadd.f32 %v3145_v25, %v8366_v46  ;;  %v9610_v14 = vld [vmem:[#allocation42_spill] sm:$0xff]  ;;  %v9611_v25 = vld [vmem:[#allocation93_spill] sm:$0xff] }
 0x4df   : > { %v8435_v12 = vmul.f32 %v3698_v21, %v9600_v50  ;;  %v3149_v27 = vpop.f32.mrf.mxu1 }
 0x4e0   : > { %3891 = vst [vmem:[%s8375_s20 + $0x20] sm:$0xff] %v3859_v40  ;;  %4354 = vst [vmem:[%s8375_s20 + $0x120] sm:$0xff] %v3923_v42  ;;  %v3699_v4 = vmul.f32 %v8441_v23, %v3146_v38  ;;  %v3150_v6 = vadd.f32 %v3149_v27, %v8363_v41  ;;  %v9612_v40 = vld [vmem:[#allocation163_spill] sm:$0xff]  ;;  %v8487_v38 = vld [vmem:[%s5938_s27 + $0x38] sm:$0xff] }
 0x4e1   : > { %4386 = vst [vmem:[%s8375_s20 + $0x220] sm:$0xff] %v3988_v49  ;;  %v3151_v31 = vpop.f32.mrf.mxu1 }
 0x4e2   : > { %v8446_v56 = vmul.f32 %v3699_v4, %v9601_v37  ;;  %v3860_v59 = vmul.f32 %v3150_v6, %v9602_v19  ;;  %v3924_v61 = vmul.f32 %v3150_v6, %v9603_v26  ;;  %v3989_v51 = vmul.f32 %v3150_v6, %v9604_v0  ;;  %v9613_v4 = vld [vmem:[#allocation43_spill] sm:$0xff]  ;;  %v9615_v19 = vld [vmem:[#allocation86_spill] sm:$0xff] }
 0x4e3   : > { %v3152_v33 = vadd.f32 %v3151_v31, %v8366_v46  ;;  %v3155_v10 = vpop.f32.mrf.mxu1  ;;  %v9614_v31 = vld [vmem:[#allocation96_spill] sm:$0xff] }
 0x4e4   : > { %3892 = vst [vmem:[%s8375_s20 + $0x28] sm:$0xff] %v3860_v59  ;;  %4355 = vst [vmem:[%s8375_s20 + $0x128] sm:$0xff] %v3924_v61  ;;  %v3156_v35 = vadd.f32 %v3155_v10, %v8363_v41  ;;  %v9616_v61 = vld [vmem:[#allocation127_spill] sm:$0xff] }
 0x4e5   : > { %4387 = vst [vmem:[%s8375_s20 + $0x228] sm:$0xff] %v3989_v51  ;;  %v3700_v48 = vmul.f32 %v8457_v36, %v3152_v33  ;;  %v3157_v24 = vpop.f32.mrf.mxu1  ;;  %v8501_v33 = vld [vmem:[%s5938_s27 + $0x40] sm:$0xff] }
 0x4e6   : > { %v3861_v54 = vmul.f32 %v3156_v35, %v9605_v62  ;;  %v3925_v58 = vmul.f32 %v3156_v35, %v9606_v47  ;;  %v3990_v34 = vmul.f32 %v3156_v35, %v9607_v22  ;;  %v3158_v57 = vadd.f32 %v3157_v24, %v8366_v46  ;;  %v9617_v24 = vld [vmem:[#allocation88_spill] sm:$0xff] }
 0x4e7   : > { %v8465_v32 = vmul.f32 %v3700_v48, %v9608_v16  ;;  %v3161_v8 = vpop.f32.mrf.mxu1 }
 0x4e8   : > { %3893 = vst [vmem:[%s8375_s20 + $0x30] sm:$0xff] %v3861_v54  ;;  %4356 = vst [vmem:[%s8375_s20 + $0x130] sm:$0xff] %v3925_v58  ;;  %v3701_v52 = vmul.f32 %v8471_v1, %v3158_v57  ;;  %v3162_v63 = vadd.f32 %v3161_v8, %v8363_v41  ;;  %v9618_v54 = vld [vmem:[#allocation44_spill] sm:$0xff]  ;;  %v9619_v58 = vld [vmem:[#allocation99_spill] sm:$0xff] }
 0x4e9   : > { %4388 = vst [vmem:[%s8375_s20 + $0x230] sm:$0xff] %v3990_v34  ;;  %v3163_v20 = vpop.f32.mrf.mxu1  ;;  %v9620_v34 = vld [vmem:[#allocation128_spill] sm:$0xff] }
 0x4ea   : > { %v8476_v29 = vmul.f32 %v3701_v52, %v9609_v53  ;;  %v3862_v21 = vmul.f32 %v3162_v63, %v9610_v14  ;;  %v3926_v2 = vmul.f32 %v3162_v63, %v9611_v25  ;;  %v3991_v7 = vmul.f32 %v3162_v63, %v9612_v40  ;;  %v8517_v63 = vld [vmem:[%s5938_s27 + $0x48] sm:$0xff]  ;;  %v9621_v14 = vld [vmem:[#allocation45_spill] sm:$0xff]  ;;  %v9622_v25 = vld [vmem:[#allocation102_spill] sm:$0xff] }
 0x4eb   : > { %v3164_v42 = vadd.f32 %v3163_v20, %v8366_v46  ;;  %v3167_v18 = vpop.f32.mrf.mxu1  ;;  %v9623_v40 = vld [vmem:[#allocation91_spill] sm:$0xff] }
 0x4ec   : > { %3894 = vst [vmem:[%s8375_s20 + $0x38] sm:$0xff] %v3862_v21  ;;  %4357 = vst [vmem:[%s8375_s20 + $0x138] sm:$0xff] %v3926_v2  ;;  %v3168_v49 = vadd.f32 %v3167_v18, %v8363_v41  ;;  %v9624_v18 = vld [vmem:[#allocation92_spill] sm:$0xff] }
 0x4ed   : > { %4389 = vst [vmem:[%s8375_s20 + $0x238] sm:$0xff] %v3991_v7  ;;  %v3702_v50 = vmul.f32 %v8487_v38, %v3164_v42  ;;  %v3169_v27 = vpop.f32.mrf.mxu1 }
 0x4ee   : > { %v3863_v6 = vmul.f32 %v3168_v49, %v9613_v4  ;;  %v3927_v37 = vmul.f32 %v3168_v49, %v9614_v31  ;;  %v3992_v59 = vmul.f32 %v3168_v49, %v9615_v19  ;;  %v3170_v26 = vadd.f32 %v3169_v27, %v8366_v46  ;;  %v8531_v27 = vld [vmem:[%s5938_s27 + $0x50] sm:$0xff] }
 0x4ef   : > { %v8495_v0 = vmul.f32 %v3702_v50, %v9616_v61  ;;  %v3173_v51 = vpop.f32.mrf.mxu1  ;;  %v9627_v61 = vld [vmem:[#allocation105_spill] sm:$0xff] }
 0x4f0   : > { %3895 = vst [vmem:[%s8375_s20 + $0x40] sm:$0xff] %v3863_v6  ;;  %4358 = vst [vmem:[%s8375_s20 + $0x140] sm:$0xff] %v3927_v37  ;;  %v3703_v10 = vmul.f32 %v8501_v33, %v3170_v26  ;;  %v3174_v35 = vadd.f32 %v3173_v51, %v8363_v41  ;;  %v9625_v37 = vld [vmem:[#allocation95_spill] sm:$0xff] }
 0x4f1   : > { %4390 = vst [vmem:[%s8375_s20 + $0x240] sm:$0xff] %v3992_v59  ;;  %v3175_v48 = vpop.f32.mrf.mxu1  ;;  %v9626_v59 = vld [vmem:[#allocation46_spill] sm:$0xff] }
 0x4f2   : > { %v8506_v62 = vmul.f32 %v3703_v10, %v9617_v24  ;;  %v3864_v47 = vmul.f32 %v3174_v35, %v9618_v54  ;;  %v3928_v22 = vmul.f32 %v3174_v35, %v9619_v58  ;;  %v3993_v57 = vmul.f32 %v3174_v35, %v9620_v34  ;;  %v9628_v10 = vld [vmem:[#allocation94_spill] sm:$0xff]  ;;  %v9629_v34 = vld [vmem:[#allocation47_spill] sm:$0xff] }
 0x4f3   : > { %v3176_v16 = vadd.f32 %v3175_v48, %v8366_v46  ;;  %v3179_v8 = vpop.f32.mrf.mxu1 }
 0x4f4   : > { %3896 = vst [vmem:[%s8375_s20 + $0x48] sm:$0xff] %v3864_v47  ;;  %4359 = vst [vmem:[%s8375_s20 + $0x148] sm:$0xff] %v3928_v22  ;;  %v3180_v52 = vadd.f32 %v3179_v8, %v8363_v41  ;;  %v8547_v47 = vld [vmem:[%s5938_s27 + $0x58] sm:$0xff] }
 0x4f5   : > { %4391 = vst [vmem:[%s8375_s20 + $0x248] sm:$0xff] %v3993_v57  ;;  %v3704_v20 = vmul.f32 %v8517_v63, %v3176_v16  ;;  %v3181_v53 = vpop.f32.mrf.mxu1  ;;  %v9630_v16 = vld [vmem:[#allocation108_spill] sm:$0xff] }
 0x4f6   : > { %v3865_v21 = vmul.f32 %v3180_v52, %v9621_v14  ;;  %v3929_v2 = vmul.f32 %v3180_v52, %v9622_v25  ;;  %v3994_v7 = vmul.f32 %v3180_v52, %v9623_v40  ;;  %v3182_v42 = vadd.f32 %v3181_v53, %v8366_v46  ;;  %v9631_v52 = vld [vmem:[#allocation97_spill] sm:$0xff]  ;;  %v9632_v14 = vld [vmem:[#allocation98_spill] sm:$0xff] }
 0x4f7   : > { %v8525_v49 = vmul.f32 %v3704_v20, %v9624_v18  ;;  %v3185_v50 = vpop.f32.mrf.mxu1  ;;  %v9633_v18 = vld [vmem:[#allocation101_spill] sm:$0xff] }
 0x4f8   : > { %3897 = vst [vmem:[%s8375_s20 + $0x50] sm:$0xff] %v3865_v21  ;;  %4360 = vst [vmem:[%s8375_s20 + $0x150] sm:$0xff] %v3929_v2  ;;  %v3705_v4 = vmul.f32 %v8531_v27, %v3182_v42  ;;  %v3186_v6 = vadd.f32 %v3185_v50, %v8363_v41  ;;  %v8561_v2 = vld [vmem:[%s5938_s27 + $0x60] sm:$0xff] }
 0x4f9   : > { %4392 = vst [vmem:[%s8375_s20 + $0x250] sm:$0xff] %v3994_v7  ;;  %v3187_v31 = vpop.f32.mrf.mxu1 }
 0x4fa   : > { %v8536_v19 = vmul.f32 %v3705_v4, %v9625_v37  ;;  %v3866_v26 = vmul.f32 %v3186_v6, %v9626_v59  ;;  %v3930_v51 = vmul.f32 %v3186_v6, %v9627_v61  ;;  %v3995_v35 = vmul.f32 %v3186_v6, %v9628_v10  ;;  %v9634_v4 = vld [vmem:[#allocation48_spill] sm:$0xff] }
 0x4fb   : > { %v3188_v48 = vadd.f32 %v3187_v31, %v8366_v46  ;;  %v3191_v24 = vpop.f32.mrf.mxu1  ;;  %v9635_v31 = vld [vmem:[#allocation111_spill] sm:$0xff]  ;;  %v9636_v59 = vld [vmem:[#allocation100_spill] sm:$0xff] }
 0x4fc   : > { %3898 = vst [vmem:[%s8375_s20 + $0x58] sm:$0xff] %v3866_v26  ;;  %4361 = vst [vmem:[%s8375_s20 + $0x158] sm:$0xff] %v3930_v51  ;;  %v3192_v54 = vadd.f32 %v3191_v24, %v8363_v41 }
 0x4fd   : > { %4393 = vst [vmem:[%s8375_s20 + $0x258] sm:$0xff] %v3995_v35  ;;  %v3706_v58 = vmul.f32 %v8547_v47, %v3188_v48  ;;  %v3193_v22 = vpop.f32.mrf.mxu1  ;;  %v8577_v35 = vld [vmem:[%s5938_s27 + $0x68] sm:$0xff] }
 0x4fe   : > { %v3867_v57 = vmul.f32 %v3192_v54, %v9629_v34  ;;  %v3931_v8 = vmul.f32 %v3192_v54, %v9630_v16  ;;  %v3996_v20 = vmul.f32 %v3192_v54, %v9631_v52  ;;  %v3194_v53 = vadd.f32 %v3193_v22, %v8366_v46  ;;  %v9637_v54 = vld [vmem:[#allocation49_spill] sm:$0xff]  ;;  %v9638_v22 = vld [vmem:[#allocation114_spill] sm:$0xff] }
 0x4ff   : > { %v8555_v21 = vmul.f32 %v3706_v58, %v9632_v14  ;;  %v3197_v25 = vpop.f32.mrf.mxu1  ;;  %v9640_v52 = vld [vmem:[#allocation106_spill] sm:$0xff]  ;;  %v8591_v14 = vld [vmem:[%s5938_s27 + $0x70] sm:$0xff] }
 0x500   : > { %3899 = vst [vmem:[%s8375_s20 + $0x60] sm:$0xff] %v3867_v57  ;;  %4362 = vst [vmem:[%s8375_s20 + $0x160] sm:$0xff] %v3931_v8  ;;  %v3707_v40 = vmul.f32 %v8561_v2, %v3194_v53  ;;  %v3198_v7 = vadd.f32 %v3197_v25, %v8363_v41  ;;  %v9639_v57 = vld [vmem:[#allocation104_spill] sm:$0xff] }
 0x501   : > { %4394 = vst [vmem:[%s8375_s20 + $0x260] sm:$0xff] %v3996_v20  ;;  %v3199_v42 = vpop.f32.mrf.mxu1 }
 0x502   : > { %v8566_v50 = vmul.f32 %v3707_v40, %v9633_v18  ;;  %v3868_v6 = vmul.f32 %v3198_v7, %v9634_v4  ;;  %v3932_v37 = vmul.f32 %v3198_v7, %v9635_v31  ;;  %v3997_v26 = vmul.f32 %v3198_v7, %v9636_v59  ;;  %v9642_v4 = vld [vmem:[#allocation50_spill] sm:$0xff]  ;;  %v9643_v31 = vld [vmem:[#allocation117_spill] sm:$0xff] }
 0x503   : > { %v3200_v61 = vadd.f32 %v3199_v42, %v8366_v46  ;;  %v3203_v51 = vpop.f32.mrf.mxu1  ;;  %v9641_v42 = vld [vmem:[#allocation110_spill] sm:$0xff]  ;;  %v9644_v59 = vld [vmem:[#allocation109_spill] sm:$0xff] }
 0x504   : > { %3900 = vst [vmem:[%s8375_s20 + $0x68] sm:$0xff] %v3868_v6  ;;  %4363 = vst [vmem:[%s8375_s20 + $0x168] sm:$0xff] %v3932_v37  ;;  %v3204_v10 = vadd.f32 %v3203_v51, %v8363_v41 }
 0x505   : > { %4395 = vst [vmem:[%s8375_s20 + $0x268] sm:$0xff] %v3997_v26  ;;  %v3708_v48 = vmul.f32 %v8577_v35, %v3200_v61  ;;  %v3205_v24 = vpop.f32.mrf.mxu1 }
 0x506   : > { %v3869_v58 = vmul.f32 %v3204_v10, %v9637_v54  ;;  %v3933_v34 = vmul.f32 %v3204_v10, %v9638_v22  ;;  %v3998_v16 = vmul.f32 %v3204_v10, %v9639_v57  ;;  %v3206_v8 = vadd.f32 %v3205_v24, %v8366_v46 }
 0x507   : > { %v8585_v20 = vmul.f32 %v3708_v48, %v9640_v52  ;;  %v3209_v53 = vpop.f32.mrf.mxu1  ;;  %v8607_v48 = vld [vmem:[%s5938_s27 + $0x78] sm:$0xff] }
 0x508   : > { %3901 = vst [vmem:[%s8375_s20 + $0x70] sm:$0xff] %v3869_v58  ;;  %4364 = vst [vmem:[%s8375_s20 + $0x170] sm:$0xff] %v3933_v34  ;;  %v3709_v25 = vmul.f32 %v8591_v14, %v3206_v8  ;;  %v3210_v40 = vadd.f32 %v3209_v53, %v8363_v41  ;;  %v9645_v58 = vld [vmem:[#allocation51_spill] sm:$0xff]  ;;  %v9646_v34 = vld [vmem:[#allocation120_spill] sm:$0xff] }
 0x509   : > { %4396 = vst [vmem:[%s8375_s20 + $0x270] sm:$0xff] %v3998_v16  ;;  %v3211_v7 = vpop.f32.mrf.mxu1  ;;  %v9647_v16 = vld [vmem:[#allocation113_spill] sm:$0xff]  ;;  %v9648_v53 = vld [vmem:[#allocation115_spill] sm:$0xff] }
 0x50a   : > { %v8596_v18 = vmul.f32 %v3709_v25, %v9641_v42  ;;  %v3870_v6 = vmul.f32 %v3210_v40, %v9642_v4  ;;  %v3934_v37 = vmul.f32 %v3210_v40, %v9643_v31  ;;  %v3999_v26 = vmul.f32 %v3210_v40, %v9644_v59  ;;  %v9649_v31 = vld [vmem:[#allocation119_spill] sm:$0xff]  ;;  %v9650_v59 = vld [vmem:[#allocation52_spill] sm:$0xff] }
 0x50b   : > { %v3212_v61 = vadd.f32 %v3211_v7, %v8366_v46  ;;  %v3215_v51 = vpop.f32.mrf.mxu1  ;;  %v8621_v7 = vld [vmem:[%s5938_s27 + $0x80] sm:$0xff] }
 0x50c   : > { %3902 = vst [vmem:[%s8375_s20 + $0x78] sm:$0xff] %v3870_v6  ;;  %4365 = vst [vmem:[%s8375_s20 + $0x178] sm:$0xff] %v3934_v37  ;;  %v3216_v10 = vadd.f32 %v3215_v51, %v8363_v41 }
 0x50d   : > { %4397 = vst [vmem:[%s8375_s20 + $0x278] sm:$0xff] %v3999_v26  ;;  %v3710_v24 = vmul.f32 %v8607_v48, %v3212_v61  ;;  %v3217_v54 = vpop.f32.mrf.mxu1  ;;  %v9651_v61 = vld [vmem:[#allocation123_spill] sm:$0xff] }
 0x50e   : > { %v3871_v22 = vmul.f32 %v3216_v10, %v9645_v58  ;;  %v3935_v57 = vmul.f32 %v3216_v10, %v9646_v34  ;;  %v4000_v8 = vmul.f32 %v3216_v10, %v9647_v16  ;;  %v3218_v52 = vadd.f32 %v3217_v54, %v8366_v46  ;;  %v9652_v10 = vld [vmem:[#allocation118_spill] sm:$0xff]  ;;  %v8637_v34 = vld [vmem:[%s5938_s27 + $0x88] sm:$0xff] }
 0x50f   : > { %v8615_v25 = vmul.f32 %v3710_v24, %v9648_v53  ;;  %v3221_v40 = vpop.f32.mrf.mxu1  ;;  %v9654_v53 = vld [vmem:[#allocation129_spill] sm:$0xff] }
 0x510   : > { %3903 = vst [vmem:[%s8375_s20 + $0x80] sm:$0xff] %v3871_v22  ;;  %4366 = vst [vmem:[%s8375_s20 + $0x180] sm:$0xff] %v3935_v57  ;;  %v3711_v42 = vmul.f32 %v8621_v7, %v3218_v52  ;;  %v3222_v4 = vadd.f32 %v3221_v40, %v8363_v41 }
 0x511   : > { %4398 = vst [vmem:[%s8375_s20 + $0x280] sm:$0xff] %v4000_v8  ;;  %v3223_v6 = vpop.f32.mrf.mxu1  ;;  %v9653_v8 = vld [vmem:[#allocation53_spill] sm:$0xff] }
 0x512   : > { %v8626_v37 = vmul.f32 %v3711_v42, %v9649_v31  ;;  %v3872_v26 = vmul.f32 %v3222_v4, %v9650_v59  ;;  %v3936_v51 = vmul.f32 %v3222_v4, %v9651_v61  ;;  %v4001_v24 = vmul.f32 %v3222_v4, %v9652_v10  ;;  %v9655_v42 = vld [vmem:[#allocation122_spill] sm:$0xff]  ;;  %v9656_v31 = vld [vmem:[#allocation124_spill] sm:$0xff] }
 0x513   : > { %v3224_v54 = vadd.f32 %v3223_v6, %v8366_v46  ;;  %v3227_v58 = vpop.f32.mrf.mxu1  ;;  %v8651_v61 = vld [vmem:[%s5938_s27 + $0x90] sm:$0xff] }
 0x514   : > { %3904 = vst [vmem:[%s8375_s20 + $0x88] sm:$0xff] %v3872_v26  ;;  %4367 = vst [vmem:[%s8375_s20 + $0x188] sm:$0xff] %v3936_v51  ;;  %v3228_v22 = vadd.f32 %v3227_v58, %v8363_v41 }
 0x515   : > { %4399 = vst [vmem:[%s8375_s20 + $0x288] sm:$0xff] %v4001_v24  ;;  %v3712_v57 = vmul.f32 %v8637_v34, %v3224_v54  ;;  %v3229_v16 = vpop.f32.mrf.mxu1  ;;  %9657 = vst [vmem:[#allocation160_spill] sm:$0xff] %v8651_v61  ;;  %v9658_v54 = vld [vmem:[#allocation133_spill] sm:$0xff] }
 0x516   : > { %v3873_v52 = vmul.f32 %v3228_v22, %v9653_v8  ;;  %v3937_v40 = vmul.f32 %v3228_v22, %v9654_v53  ;;  %v4002_v4 = vmul.f32 %v3228_v22, %v9655_v42  ;;  %v3230_v6 = vadd.f32 %v3229_v16, %v8366_v46  ;;  %v9660_v22 = vld [vmem:[#allocation54_spill] sm:$0xff]  ;;  %v9662_v53 = vld [vmem:[#allocation132_spill] sm:$0xff] }
 0x517   : > { %v8645_v59 = vmul.f32 %v3712_v57, %v9656_v31  ;;  %v3233_v26 = vpop.f32.mrf.mxu1  ;;  %v9661_v16 = vld [vmem:[#allocation134_spill] sm:$0xff] }
 0x518   : > { %3905 = vst [vmem:[%s8375_s20 + $0x90] sm:$0xff] %v3873_v52  ;;  %4368 = vst [vmem:[%s8375_s20 + $0x190] sm:$0xff] %v3937_v40  ;;  %v3713_v51 = vmul.f32 %v8651_v61, %v3230_v6  ;;  %v3234_v10 = vadd.f32 %v3233_v26, %v8363_v41  ;;  %v8667_v6 = vld [vmem:[%s5938_s27 + $0x98] sm:$0xff] }
 0x519   : > { %4400 = vst [vmem:[%s8375_s20 + $0x290] sm:$0xff] %v4002_v4  ;;  %v3235_v24 = vpop.f32.mrf.mxu1 }
 0x51a   : > { %v8656_v58 = vmul.f32 %v3713_v51, %v9658_v54  ;;  %v3874_v57 = vmul.f32 %v3234_v10, %v9660_v22  ;;  %v3938_v8 = vmul.f32 %v3234_v10, %v9661_v16  ;;  %v4003_v42 = vmul.f32 %v3234_v10, %v9662_v53  ;;  %v9663_v51 = vld [vmem:[#allocation55_spill] sm:$0xff]  ;;  %v9664_v10 = vld [vmem:[#allocation137_spill] sm:$0xff]  ;;  %v9665_v16 = vld [vmem:[#allocation136_spill] sm:$0xff] }
 0x51b   : > { %v3236_v52 = vadd.f32 %v3235_v24, %v8366_v46  ;;  %v3239_v40 = vpop.f32.mrf.mxu1 }
 0x51c   : > { %9659 = vst [vmem:[#allocation161_spill] sm:$0xff] %v8656_v58  ;;  %3906 = vst [vmem:[%s8375_s20 + $0x98] sm:$0xff] %v3874_v57  ;;  %v3240_v4 = vadd.f32 %v3239_v40, %v8363_v41  ;;  %v9672_v58 = vld [vmem:[#allocation173_spill] sm:$0xff] }
 0x51d   : > { %4369 = vst [vmem:[%s8375_s20 + $0x198] sm:$0xff] %v3938_v8  ;;  %4401 = vst [vmem:[%s8375_s20 + $0x298] sm:$0xff] %v4003_v42  ;;  %v3714_v31 = vmul.f32 %v8667_v6, %v3236_v52  ;;  %v3241_v26 = vpop.f32.mrf.mxu1  ;;  %v8681_v42 = vld [vmem:[%s5938_s27 + $0xa0] sm:$0xff] }
 0x51e   : > { %v3875_v54 = vmul.f32 %v3240_v4, %v9663_v51  ;;  %v3939_v22 = vmul.f32 %v3240_v4, %v9664_v10  ;;  %v4004_v24 = vmul.f32 %v3240_v4, %v9665_v16  ;;  %v3242_v53 = vadd.f32 %v3241_v26, %v8366_v46  ;;  %9667 = vst [vmem:[#allocation168_spill] sm:$0xff] %v8681_v42  ;;  %v9668_v51 = vld [vmem:[#allocation143_spill] sm:$0xff]  ;;  %v9670_v10 = vld [vmem:[#allocation56_spill] sm:$0xff] }
 0x51f   : > { %v8675_v57 = vmul.f32 %v3714_v31, %v9666_v44  ;;  %v3245_v8 = vpop.f32.mrf.mxu1  ;;  %v9671_v31 = vld [vmem:[#allocation141_spill] sm:$0xff] }
 0x520   : > { %3907 = vst [vmem:[%s8375_s20 + $0xa0] sm:$0xff] %v3875_v54  ;;  %4370 = vst [vmem:[%s8375_s20 + $0x1a0] sm:$0xff] %v3939_v22  ;;  %v3715_v52 = vmul.f32 %v8681_v42, %v3242_v53  ;;  %v3246_v40 = vadd.f32 %v3245_v8, %v8363_v41  ;;  %v8697_v53 = vld [vmem:[%s5938_s27 + $0xa8] sm:$0xff] }
 0x521   : > { %4402 = vst [vmem:[%s8375_s20 + $0x2a0] sm:$0xff] %v4004_v24  ;;  %v3247_v4 = vpop.f32.mrf.mxu1 }
 0x522   : > { %v8686_v26 = vmul.f32 %v3715_v52, %v9668_v51  ;;  %v3876_v44 = vmul.f32 %v3246_v40, %v9670_v10  ;;  %v3940_v16 = vmul.f32 %v3246_v40, %v9671_v31  ;;  %v4005_v61 = vmul.f32 %v3246_v40, %v9672_v58  ;;  %v9673_v51 = vld [vmem:[#allocation57_spill] sm:$0xff]  ;;  %v9674_v58 = vld [vmem:[#allocation151_spill] sm:$0xff] }
 0x523   : > { %v3248_v54 = vadd.f32 %v3247_v4, %v8366_v46  ;;  %v3251_v22 = vpop.f32.mrf.mxu1 }
 0x524   : > { %9669 = vst [vmem:[#allocation169_spill] sm:$0xff] %v8686_v26  ;;  %3908 = vst [vmem:[%s8375_s20 + $0xa8] sm:$0xff] %v3876_v44  ;;  %v3252_v24 = vadd.f32 %v3251_v22, %v8363_v41  ;;  %v9680_v26 = vld [vmem:[#allocation89_spill] sm:$0xff] }
 0x525   : > { %4371 = vst [vmem:[%s8375_s20 + $0x1a8] sm:$0xff] %v3940_v16  ;;  %4403 = vst [vmem:[%s8375_s20 + $0x2a8] sm:$0xff] %v4005_v61  ;;  %v3716_v8 = vmul.f32 %v8697_v53, %v3248_v54  ;;  %v3253_v52 = vpop.f32.mrf.mxu1  ;;  %v8711_v16 = vld [vmem:[%s5938_s27 + $0xb0] sm:$0xff] }
 0x526   : > { %v3877_v10 = vmul.f32 %v3252_v24, %v9673_v51  ;;  %v3941_v40 = vmul.f32 %v3252_v24, %v9674_v58  ;;  %v4006_v4 = vmul.f32 %v3252_v24, %v7483_v45  ;;  %v3254_v31 = vadd.f32 %v3253_v52, %v8366_v46  ;;  %9675 = vst [vmem:[#allocation149_spill] sm:$0xff] %v8711_v16  ;;  %v9678_v52 = vld [vmem:[#allocation158_spill] sm:$0xff] }
 0x527   : > { %v8705_v44 = vmul.f32 %v3716_v8, %v7491_v28  ;;  %v3257_v61 = vpop.f32.mrf.mxu1  ;;  %v9677_v28 = vld [vmem:[#allocation58_spill] sm:$0xff] }
 0x528   : > { %3909 = vst [vmem:[%s8375_s20 + $0xb0] sm:$0xff] %v3877_v10  ;;  %4372 = vst [vmem:[%s8375_s20 + $0x1b0] sm:$0xff] %v3941_v40  ;;  %v3717_v54 = vmul.f32 %v8711_v16, %v3254_v31  ;;  %v3258_v22 = vadd.f32 %v3257_v61, %v8363_v41  ;;  %v8729_v31 = vld [vmem:[%s5938_s27 + $0xb8] sm:$0xff] }
 0x529   : > { %4404 = vst [vmem:[%s8375_s20 + $0x2b0] sm:$0xff] %v4006_v4  ;;  %v3259_v45 = vpop.f32.mrf.mxu1  ;;  %v9679_v4 = vld [vmem:[#allocation167_spill] sm:$0xff]  ;;  %9681 = vst [vmem:[#allocation71_spill] sm:$0xff] %v8729_v31 }
 0x52a   : > { %v8716_v24 = vmul.f32 %v3717_v54, %v7514_v15  ;;  %v3878_v8 = vmul.f32 %v3258_v22, %v9677_v28  ;;  %v3942_v51 = vmul.f32 %v3258_v22, %v9678_v52  ;;  %v4007_v10 = vmul.f32 %v3258_v22, %v7505_v3  ;;  %v9682_v54 = vld [vmem:[#allocation59_spill] sm:$0xff] }
 0x52b   : > { %v3260_v58 = vadd.f32 %v3259_v45, %v8366_v46  ;;  %v3263_v40 = vpop.f32.mrf.mxu1  ;;  %v3655_v42 = vmul.f32 %v9680_v26, %v9679_v4  ;;  %v9683_v45 = vld [vmem:[#allocation166_spill] sm:$0xff] }
 0x52c   : > { %9676 = vst [vmem:[#allocation145_spill] sm:$0xff] %v8716_v24  ;;  %3910 = vst [vmem:[%s8375_s20 + $0xb8] sm:$0xff] %v3878_v8  ;;  %v3264_v15 = vadd.f32 %v3263_v40, %v8363_v41 }
 0x52d   : > { %4373 = vst [vmem:[%s8375_s20 + $0x1b8] sm:$0xff] %v3942_v51  ;;  %4405 = vst [vmem:[%s8375_s20 + $0x2b8] sm:$0xff] %v4007_v10  ;;  %v3718_v61 = vmul.f32 %v8729_v31, %v3260_v58  ;;  %v3265_v3 = vpop.f32.mrf.mxu1  ;;  %v9685_v10 = vld [vmem:[#allocation174_spill] sm:$0xff]  ;;  %v9699_v31 = vld [vmem:[#allocation177_spill] sm:$0xff] }
 0x52e   : > { %v3879_v22 = vmul.f32 %v3264_v15, %v9682_v54  ;;  %v3943_v28 = vmul.f32 %v3264_v15, %v9683_v45  ;;  %v4008_v52 = vmul.f32 %v3264_v15, %v9679_v4  ;;  %v3266_v26 = vadd.f32 %v3265_v3, %v8366_v46  ;;  %v8744_v58 = vld [vmem:[%s5938_s27 + $0xc0] sm:$0xff]  ;;  %v9688_v3 = vld [vmem:[#allocation140_spill] sm:$0xff] }
 0x52f   : > { %v8737_v8 = vmul.f32 %v3718_v61, %v7534_v5  ;;  %v3269_v51 = vpop.f32.mrf.mxu1  ;;  %v3687_v24 = vadd.f32 %v3655_v42, %v9685_v10  ;;  %9686 = vst [vmem:[#allocation73_spill] sm:$0xff] %v8744_v58  ;;  %v9687_v15 = vld [vmem:[#allocation130_spill] sm:$0xff]  ;;  %v9690_v42 = vld [vmem:[#allocation60_spill] sm:$0xff] }
 0x530   : > { %3911 = vst [vmem:[%s8375_s20 + $0xc0] sm:$0xff] %v3879_v22  ;;  %4374 = vst [vmem:[%s8375_s20 + $0x1c0] sm:$0xff] %v3943_v28  ;;  %v3719_v40 = vmul.f32 %v8744_v58, %v3266_v26  ;;  %v3270_v4 = vadd.f32 %v3269_v51, %v8363_v41  ;;  %v3656_v5 = vmul.f32 %v9688_v3, %v9687_v15  ;;  %v9691_v22 = vld [vmem:[#allocation172_spill] sm:$0xff]  ;;  %v9693_v26 = vld [vmem:[#allocation103_spill] sm:$0xff] }
 0x531   : > { %9684 = vst [vmem:[#allocation152_spill] sm:$0xff] %v8737_v8  ;;  %4406 = vst [vmem:[%s8375_s20 + $0x2c0] sm:$0xff] %v4008_v52  ;;  %v3271_v61 = vpop.f32.mrf.mxu1  ;;  %v9692_v8 = vld [vmem:[#allocation131_spill] sm:$0xff]  ;;  %v9694_v51 = vld [vmem:[#allocation176_spill] sm:$0xff] }
 0x532   : > { %v8750_v54 = vmul.f32 %v3719_v40, %v3687_v24  ;;  %v3880_v45 = vmul.f32 %v3270_v4, %v9690_v42  ;;  %v3944_v10 = vmul.f32 %v3270_v4, %v9691_v22  ;;  %v4009_v28 = vmul.f32 %v3270_v4, %v9687_v15  ;;  %v8764_v3 = vld [vmem:[%s5938_s27 + $0xc8] sm:$0xff] }
 0x533   : > { %v3272_v52 = vadd.f32 %v3271_v61, %v8366_v46  ;;  %v3275_v16 = vpop.f32.mrf.mxu1  ;;  %v3657_v58 = vmul.f32 %v9693_v26, %v9692_v8  ;;  %v3688_v40 = vadd.f32 %v3656_v5, %v9694_v51  ;;  %9695 = vst [vmem:[#allocation77_spill] sm:$0xff] %v8764_v3  ;;  %v9696_v61 = vld [vmem:[#allocation62_spill] sm:$0xff]  ;;  %v9697_v22 = vld [vmem:[#allocation175_spill] sm:$0xff]  ;;  %v8778_v5 = vld [vmem:[%s5938_s27 + $0xd0] sm:$0xff] }
 0x534   : > { %9689 = vst [vmem:[#allocation61_spill] sm:$0xff] %v8750_v54  ;;  %3912 = vst [vmem:[%s8375_s20 + $0xc8] sm:$0xff] %v3880_v45  ;;  %v3276_v24 = vadd.f32 %v3275_v16, %v8363_v41  ;;  %v9702_v51 = vld [vmem:[#allocation112_spill] sm:$0xff] }
 0x535   : > { %4375 = vst [vmem:[%s8375_s20 + $0x1c8] sm:$0xff] %v3944_v10  ;;  %4407 = vst [vmem:[%s8375_s20 + $0x2c8] sm:$0xff] %v4009_v28  ;;  %v3720_v4 = vmul.f32 %v8764_v3, %v3272_v52  ;;  %v3277_v15 = vpop.f32.mrf.mxu1  ;;  %v3689_v16 = vadd.f32 %v3657_v58, %v9699_v31  ;;  %v9704_v31 = vld [vmem:[#allocation64_spill] sm:$0xff]  ;;  %v9712_v3 = vld [vmem:[#allocation179_spill] sm:$0xff] }
 0x536   : > { %v3881_v42 = vmul.f32 %v3276_v24, %v9696_v61  ;;  %v3945_v26 = vmul.f32 %v3276_v24, %v9697_v22  ;;  %v4010_v45 = vmul.f32 %v3276_v24, %v9692_v8  ;;  %v3278_v10 = vadd.f32 %v3277_v15, %v8366_v46  ;;  %9700 = vst [vmem:[#allocation126_spill] sm:$0xff] %v8778_v5  ;;  %v9701_v24 = vld [vmem:[#allocation107_spill] sm:$0xff] }
 0x537   : > { %v8771_v54 = vmul.f32 %v3720_v4, %v3688_v40  ;;  %v3281_v28 = vpop.f32.mrf.mxu1  ;;  %v3658_v40 = vmul.f32 %v9702_v51, %v9701_v24  ;;  %v9705_v61 = vld [vmem:[#allocation63_spill] sm:$0xff]  ;;  %v8798_v51 = vld [vmem:[%s5938_s27 + $0xd8] sm:$0xff] }
 0x538   : > { %3913 = vst [vmem:[%s8375_s20 + $0xd0] sm:$0xff] %v3881_v42  ;;  %4376 = vst [vmem:[%s8375_s20 + $0x1d0] sm:$0xff] %v3945_v26  ;;  %v3721_v52 = vmul.f32 %v8778_v5, %v3278_v10  ;;  %v3282_v8 = vadd.f32 %v3281_v28, %v8363_v41  ;;  %v9707_v10 = vld [vmem:[#allocation121_spill] sm:$0xff] }
 0x539   : > { %9698 = vst [vmem:[#allocation80_spill] sm:$0xff] %v8771_v54  ;;  %4408 = vst [vmem:[%s8375_s20 + $0x2d0] sm:$0xff] %v4010_v45  ;;  %v3283_v4 = vpop.f32.mrf.mxu1  ;;  %v9706_v54 = vld [vmem:[#allocation116_spill] sm:$0xff] }
 0x53a   : > { %v8784_v15 = vmul.f32 %v3721_v52, %v3689_v16  ;;  %v3882_v58 = vmul.f32 %v3282_v8, %v9704_v31  ;;  %v3946_v42 = vmul.f32 %v3282_v8, %v9705_v61  ;;  %v4011_v22 = vmul.f32 %v3282_v8, %v9701_v24  ;;  %v9708_v16 = vld [vmem:[#allocation178_spill] sm:$0xff]  ;;  %v9710_v61 = vld [vmem:[#allocation65_spill] sm:$0xff] }
 0x53b   : > { %v3284_v26 = vadd.f32 %v3283_v4, %v8366_v46  ;;  %v3287_v45 = vpop.f32.mrf.mxu1  ;;  %v3659_v5 = vmul.f32 %v9707_v10, %v9706_v54  ;;  %v3690_v52 = vadd.f32 %v3658_v40, %v9708_v16  ;;  %v9709_v4 = vld [vmem:[#allocation66_spill] sm:$0xff] }
 0x53c   : > { %9703 = vst [vmem:[#allocation171_spill] sm:$0xff] %v8784_v15  ;;  %3914 = vst [vmem:[%s8375_s20 + $0xd8] sm:$0xff] %v3882_v58  ;;  %v3288_v28 = vadd.f32 %v3287_v45, %v8363_v41  ;;  %v8812_v40 = vld [vmem:[%s5938_s27 + $0xe0] sm:$0xff] }
 0x53d   : > { %4377 = vst [vmem:[%s8375_s20 + $0x1d8] sm:$0xff] %v3946_v42  ;;  %4409 = vst [vmem:[%s8375_s20 + $0x2d8] sm:$0xff] %v4011_v22  ;;  %v3722_v8 = vmul.f32 %v8798_v51, %v3284_v26  ;;  %v3289_v24 = vpop.f32.mrf.mxu1  ;;  %v3691_v45 = vadd.f32 %v3659_v5, %v9712_v3  ;;  %v9717_v3 = vld [vmem:[#allocation68_spill] sm:$0xff] }
 0x53e   : > { %v3883_v31 = vmul.f32 %v3288_v28, %v9709_v4  ;;  %v3947_v10 = vmul.f32 %v3288_v28, %v9710_v61  ;;  %v4012_v58 = vmul.f32 %v3288_v28, %v9706_v54  ;;  %v3290_v42 = vadd.f32 %v3289_v24, %v8366_v46  ;;  %9713 = vst [vmem:[#allocation74_spill] sm:$0xff] %v8812_v40  ;;  %v9714_v54 = vld [vmem:[#allocation125_spill] sm:$0xff]  ;;  %v9715_v28 = vld [vmem:[#allocation135_spill] sm:$0xff] }
 0x53f   : > { %v8805_v15 = vmul.f32 %v3722_v8, %v3690_v52  ;;  %v3293_v22 = vpop.f32.mrf.mxu1  ;;  %v3660_v52 = vmul.f32 %v9715_v28, %v9714_v54  ;;  %v9718_v4 = vld [vmem:[#allocation67_spill] sm:$0xff] }
 0x540   : > { %3915 = vst [vmem:[%s8375_s20 + $0xe0] sm:$0xff] %v3883_v31  ;;  %4378 = vst [vmem:[%s8375_s20 + $0x1e0] sm:$0xff] %v3947_v10  ;;  %v3723_v26 = vmul.f32 %v8812_v40, %v3290_v42  ;;  %v3294_v16 = vadd.f32 %v3293_v22, %v8363_v41  ;;  %v9720_v42 = vld [vmem:[#allocation144_spill] sm:$0xff] }
 0x541   : > { %9711 = vst [vmem:[#allocation35_spill] sm:$0xff] %v8805_v15  ;;  %4410 = vst [vmem:[%s8375_s20 + $0x2e0] sm:$0xff] %v4012_v58  ;;  %v3295_v8 = vpop.f32.mrf.mxu1  ;;  %v9719_v15 = vld [vmem:[#allocation139_spill] sm:$0xff] }
 0x542   : > { %v8818_v24 = vmul.f32 %v3723_v26, %v3691_v45  ;;  %v3884_v5 = vmul.f32 %v3294_v16, %v9717_v3  ;;  %v3948_v31 = vmul.f32 %v3294_v16, %v9718_v4  ;;  %v4013_v61 = vmul.f32 %v3294_v16, %v9714_v54  ;;  %v9721_v26 = vld [vmem:[#allocation142_spill] sm:$0xff]  ;;  %v8833_v16 = vld [vmem:[%s5938_s27 + $0xe8] sm:$0xff] }
 0x543   : > { %v3296_v10 = vadd.f32 %v3295_v8, %v8366_v46  ;;  %v3299_v58 = vpop.f32.mrf.mxu1  ;;  %v3661_v40 = vmul.f32 %v9720_v42, %v9719_v15  ;;  %v3048_v45 = vsub.s32 2, %v8356_v55  ;;  %v3692_v28 = vadd.f32 %v3660_v52, %v9721_v26  ;;  %v9722_v3 = vld [vmem:[#allocation70_spill] sm:$0xff] }
 0x544   : > { %9716 = vst [vmem:[#allocation147_spill] sm:$0xff] %v8818_v24  ;;  %3916 = vst [vmem:[%s8375_s20 + $0xe8] sm:$0xff] %v3884_v5  ;;  %v3300_v22 = vadd.f32 %v3299_v58, %v8363_v41  ;;  %v9723_v5 = vld [vmem:[#allocation69_spill] sm:$0xff]  ;;  %v9724_v55 = vld [vmem:[#allocation146_spill] sm:$0xff] }
 0x545   : > { %4379 = vst [vmem:[%s8375_s20 + $0x1e8] sm:$0xff] %v3948_v31  ;;  %4411 = vst [vmem:[%s8375_s20 + $0x2e8] sm:$0xff] %v4013_v61  ;;  %v3724_v54 = vmul.f32 %v8833_v16, %v3296_v10  ;;  %v3301_v8 = vpop.f32.mrf.mxu1  ;;  %v3693_v52 = vadd.f32 %v3661_v40, %v9724_v55  ;;  %v8847_v10 = vld [vmem:[%s5938_s27 + $0xf0] sm:$0xff]  ;;  %v9726_v40 = vld [vmem:[#allocation150_spill] sm:$0xff] }
 0x546   : > { %v3885_v4 = vmul.f32 %v3300_v22, %v9722_v3  ;;  %v3949_v42 = vmul.f32 %v3300_v22, %v9723_v5  ;;  %v4014_v31 = vmul.f32 %v3300_v22, %v9719_v15  ;;  %v3302_v61 = vadd.f32 %v3301_v8, %v8366_v46  ;;  %v9727_v5 = vld [vmem:[#allocation153_spill] sm:$0xff] }
 0x547   : > { %v8840_v24 = vmul.f32 %v3724_v54, %v3692_v28  ;;  %v3305_v58 = vpop.f32.mrf.mxu1  ;;  %v8852_v15 = vrot.slane %v8359_v13, %v3048_v45  ;;  %v9725_v54 = vld [vmem:[#allocation72_spill] sm:$0xff] }
 0x548   : > { %3917 = vst [vmem:[%s8375_s20 + $0xf0] sm:$0xff] %v3885_v4  ;;  %4380 = vst [vmem:[%s8375_s20 + $0x1f0] sm:$0xff] %v3949_v42  ;;  %v3725_v26 = vmul.f32 %v8847_v10, %v3302_v61  ;;  %v3306_v3 = vadd.f32 %v3305_v58, %v8363_v41 }
 0x549   : > { %4412 = vst [vmem:[%s8375_s20 + $0x2f0] sm:$0xff] %v4014_v31  ;;  %v8854_v22 = vpop.f32.mrf.mxu1 }
 0x54a   : > { %v8856_v28 = vmul.f32 %v3725_v26, %v3693_v52  ;;  %v3886_v8 = vmul.f32 %v3306_v3, %v9725_v54  ;;  %v3950_v4 = vmul.f32 %v3306_v3, %v9726_v40  ;;  %v4015_v42 = vmul.f32 %v3306_v3, %v9727_v5 }
 0x54b   : > { %v4763_v31 = vpop.f32.mrf.mxu1 }
 0x54c   : > { %3918 = vst [vmem:[%s8375_s20 + $0xf8] sm:$0xff] %v3886_v8  ;;  %4381 = vst [vmem:[%s8375_s20 + $0x1f8] sm:$0xff] %v3950_v4  ;;  %v3382_v41 = vadd.f32 %v4763_v31, %v8852_v15 }
 0x54d   : > { %4413 = vst [vmem:[%s8375_s20 + $0x2f8] sm:$0xff] %v4015_v42  ;;  %v3376_v61 = vpop.f32.mrf.mxu1 }
 0x54e   : > { %v3760_v13 = vmul.f32 %v8397_v11, %v3382_v41  ;;  %v3377_v45 = vadd.f32 %v3376_v61, %v8852_v15 }
 0x54f   : > { %v4766_v58 = vpop.f32.mrf.mxu1 }
 0x550   : > { %v3792_v55 = vadd.f32 %v3760_v13, %v8405_v39  ;;  %v3759_v52 = vmul.f32 %v8381_v17, %v3377_v45  ;;  %v3392_v26 = vadd.f32 %v4766_v58, %v8852_v15 }
 0x551   : > { %v3386_v54 = vpop.f32.mrf.mxu1 }
 0x552   : > { %3824 = vst [vmem:[%s8872_s25 + $0x8] sm:$0xff] %v3792_v55  ;;  %v3791_v11 = vadd.f32 %v3759_v52, %v8386_v9  ;;  %v3762_v3 = vmul.f32 %v8427_v60, %v3392_v26  ;;  %v3387_v8 = vadd.f32 %v3386_v54, %v8852_v15 }
 0x553   : > { %v4769_v39 = vpop.f32.mrf.mxu1 }
 0x554   : > { %3823 = vst [vmem:[%s8872_s25] sm:$0xff] %v3791_v11  ;;  %v3794_v17 = vadd.f32 %v3762_v3, %v8435_v12  ;;  %v3761_v40 = vmul.f32 %v8411_v30, %v3387_v8  ;;  %v3402_v4 = vadd.f32 %v4769_v39, %v8852_v15 }
 0x555   : > { %v3396_v42 = vpop.f32.mrf.mxu1 }
 0x556   : > { %3826 = vst [vmem:[%s8872_s25 + $0x18] sm:$0xff] %v3794_v17  ;;  %v3793_v31 = vadd.f32 %v3761_v40, %v8416_v43  ;;  %v3764_v9 = vmul.f32 %v8457_v36, %v3402_v4  ;;  %v3397_v60 = vadd.f32 %v3396_v42, %v8852_v15 }
 0x557   : > { %v4772_v41 = vpop.f32.mrf.mxu1 }
 0x558   : > { %3825 = vst [vmem:[%s8872_s25 + $0x10] sm:$0xff] %v3793_v31  ;;  %v3796_v61 = vadd.f32 %v3764_v9, %v8465_v32  ;;  %v3763_v12 = vmul.f32 %v8441_v23, %v3397_v60  ;;  %v3412_v30 = vadd.f32 %v4772_v41, %v8852_v15 }
 0x559   : > { %v3406_v13 = vpop.f32.mrf.mxu1 }
 0x55a   : > { %3828 = vst [vmem:[%s8872_s25 + $0x28] sm:$0xff] %v3796_v61  ;;  %v3795_v45 = vadd.f32 %v3763_v12, %v8446_v56  ;;  %v3766_v43 = vmul.f32 %v8487_v38, %v3412_v30  ;;  %v3407_v36 = vadd.f32 %v3406_v13, %v8852_v15 }
 0x55b   : > { %v4775_v58 = vpop.f32.mrf.mxu1 }
 0x55c   : > { %3827 = vst [vmem:[%s8872_s25 + $0x20] sm:$0xff] %v3795_v45  ;;  %v3798_v55 = vadd.f32 %v3766_v43, %v8495_v0  ;;  %v3765_v32 = vmul.f32 %v8471_v1, %v3407_v36  ;;  %v3422_v23 = vadd.f32 %v4775_v58, %v8852_v15 }
 0x55d   : > { %v3416_v52 = vpop.f32.mrf.mxu1 }
 0x55e   : > { %3830 = vst [vmem:[%s8872_s25 + $0x38] sm:$0xff] %v3798_v55  ;;  %v3797_v26 = vadd.f32 %v3765_v32, %v8476_v29  ;;  %v3768_v56 = vmul.f32 %v8517_v63, %v3422_v23  ;;  %v3417_v38 = vadd.f32 %v3416_v52, %v8852_v15  ;;  %v9728_v32 = vld [vmem:[#allocation160_spill] sm:$0xff]  ;;  %v9729_v52 = vld [vmem:[#allocation161_spill] sm:$0xff] }
 0x55f   : > { %v4778_v54 = vpop.f32.mrf.mxu1 }
 0x560   : > { %3829 = vst [vmem:[%s8872_s25 + $0x30] sm:$0xff] %v3797_v26  ;;  %v3800_v11 = vadd.f32 %v3768_v56, %v8525_v49  ;;  %v3767_v0 = vmul.f32 %v8501_v33, %v3417_v38  ;;  %v3432_v1 = vadd.f32 %v4778_v54, %v8852_v15  ;;  %v9730_v54 = vld [vmem:[#allocation168_spill] sm:$0xff] }
 0x561   : > { %v3426_v3 = vpop.f32.mrf.mxu1 }
 0x562   : > { %3832 = vst [vmem:[%s8872_s25 + $0x48] sm:$0xff] %v3800_v11  ;;  %v3799_v8 = vadd.f32 %v3767_v0, %v8506_v62  ;;  %v3770_v29 = vmul.f32 %v8547_v47, %v3432_v1  ;;  %v3427_v63 = vadd.f32 %v3426_v3, %v8852_v15  ;;  %v9731_v1 = vld [vmem:[#allocation169_spill] sm:$0xff] }
 0x563   : > { %v4781_v39 = vpop.f32.mrf.mxu1 }
 0x564   : > { %3831 = vst [vmem:[%s8872_s25 + $0x40] sm:$0xff] %v3799_v8  ;;  %v3802_v17 = vadd.f32 %v3770_v29, %v8555_v21  ;;  %v3769_v49 = vmul.f32 %v8531_v27, %v3427_v63  ;;  %v3442_v33 = vadd.f32 %v4781_v39, %v8852_v15  ;;  %v9732_v8 = vld [vmem:[#allocation71_spill] sm:$0xff]  ;;  %v9733_v39 = vld [vmem:[#allocation152_spill] sm:$0xff] }
 0x565   : > { %v3436_v40 = vpop.f32.mrf.mxu1 }
 0x566   : > { %3834 = vst [vmem:[%s8872_s25 + $0x58] sm:$0xff] %v3802_v17  ;;  %v3801_v4 = vadd.f32 %v3769_v49, %v8536_v19  ;;  %v3772_v62 = vmul.f32 %v8577_v35, %v3442_v33  ;;  %v3437_v47 = vadd.f32 %v3436_v40, %v8852_v15  ;;  %v9734_v49 = vld [vmem:[#allocation149_spill] sm:$0xff] }
 0x567   : > { %v4784_v42 = vpop.f32.mrf.mxu1 }
 0x568   : > { %3833 = vst [vmem:[%s8872_s25 + $0x50] sm:$0xff] %v3801_v4  ;;  %v3804_v31 = vadd.f32 %v3772_v62, %v8585_v20  ;;  %v3771_v21 = vmul.f32 %v8561_v2, %v3437_v47  ;;  %v3452_v27 = vadd.f32 %v4784_v42, %v8852_v15  ;;  %v9735_v4 = vld [vmem:[#allocation145_spill] sm:$0xff] }
 0x569   : > { %v3446_v9 = vpop.f32.mrf.mxu1  ;;  %v9736_v47 = vld [vmem:[#allocation77_spill] sm:$0xff] }
 0x56a   : > { %3836 = vst [vmem:[%s8872_s25 + $0x68] sm:$0xff] %v3804_v31  ;;  %v3803_v60 = vadd.f32 %v3771_v21, %v8566_v50  ;;  %v3774_v19 = vmul.f32 %v8607_v48, %v3452_v27  ;;  %v3447_v35 = vadd.f32 %v3446_v9, %v8852_v15  ;;  %v9737_v27 = vld [vmem:[#allocation80_spill] sm:$0xff] }
 0x56b   : > { %v4787_v41 = vpop.f32.mrf.mxu1 }
 0x56c   : > { %3835 = vst [vmem:[%s8872_s25 + $0x60] sm:$0xff] %v3803_v60  ;;  %v3806_v61 = vadd.f32 %v3774_v19, %v8615_v25  ;;  %v3773_v20 = vmul.f32 %v8591_v14, %v3447_v35  ;;  %v3462_v2 = vadd.f32 %v4787_v41, %v8852_v15  ;;  %v9738_v60 = vld [vmem:[#allocation73_spill] sm:$0xff] }
 0x56d   : > { %v3456_v12 = vpop.f32.mrf.mxu1 }
 0x56e   : > { %3838 = vst [vmem:[%s8872_s25 + $0x78] sm:$0xff] %v3806_v61  ;;  %v3805_v30 = vadd.f32 %v3773_v20, %v8596_v18  ;;  %v3776_v50 = vmul.f32 %v8637_v34, %v3462_v2  ;;  %v3457_v48 = vadd.f32 %v3456_v12, %v8852_v15  ;;  %v3308_v61 = vadd.f32 %v8854_v22, %v8366_v46  ;;  %v9739_v20 = vld [vmem:[#allocation61_spill] sm:$0xff] }
 0x56f   : > { %v4790_v13 = vpop.f32.mrf.mxu1  ;;  %v5387_v22 = vld [vmem:[%s5938_s27 + $0xf8] sm:$0xff]  ;;  %s5576_s27 = scalar_lea.vmem %s5575_s24, 8192 }
 0x570   : > { %3837 = vst [vmem:[%s8872_s25 + $0x70] sm:$0xff] %v3805_v30  ;;  %v3808_v45 = vadd.f32 %v3776_v50, %v8645_v59  ;;  %v3775_v25 = vmul.f32 %v8621_v7, %v3457_v48  ;;  %v3472_v14 = vadd.f32 %v4790_v13, %v8852_v15  ;;  %v9740_v48 = vld [vmem:[#allocation154_spill] sm:$0xff]  ;;  %p5578_p9 = scmp.lt.s32.totalorder %s5576_s27, %s5570_s18 }
 0x571   : > { %v3466_v43 = vpop.f32.mrf.mxu1  ;;  %v3662_v13 = vmul.f32 %v9740_v48, %v9727_v5 }
 0x572   : > { %3840 = vst [vmem:[%s8872_s25 + $0x88] sm:$0xff] %v3808_v45  ;;  %v3807_v36 = vadd.f32 %v3775_v25, %v8626_v37  ;;  %v3778_v18 = vmul.f32 %v8667_v6, %v3472_v14  ;;  %v3467_v34 = vadd.f32 %v3466_v43, %v8852_v15  ;;  %v9741_v45 = vld [vmem:[#allocation35_spill] sm:$0xff]  ;;  %v9742_v14 = vld [vmem:[#allocation126_spill] sm:$0xff]  ;;  %p5579_p5 = por %p5578_p9, %p5577_p0 }
 0x573   : > { %v4793_v58 = vpop.f32.mrf.mxu1 }
 0x574   : > { %3839 = vst [vmem:[%s8872_s25 + $0x80] sm:$0xff] %v3807_v36  ;;  %v3810_v55 = vadd.f32 %v3778_v18, %v8675_v57  ;;  %v3777_v59 = vmul.f32 %v9728_v32, %v3467_v34  ;;  %v3482_v7 = vadd.f32 %v4793_v58, %v8852_v15  ;;  %v3726_v18 = vmul.f32 %v5387_v22, %v3308_v61  ;;  %v9744_v32 = vld [vmem:[#allocation155_spill] sm:$0xff]  ;;  %p5580_p13 = pnand %p5579_p5, %p5573_p2 }
 0x575   : > { %v3476_v23 = vpop.f32.mrf.mxu1 }
 0x576   : > { %3842 = vst [vmem:[%s8872_s25 + $0x98] sm:$0xff] %v3810_v55  ;;  %v3809_v26 = vadd.f32 %v3777_v59, %v9729_v52  ;;  %v3780_v37 = vmul.f32 %v8697_v53, %v3482_v7  ;;  %v3477_v6 = vadd.f32 %v3476_v23, %v8852_v15  ;;  %v3694_v59 = vadd.f32 %v3662_v13, %v9744_v32  ;;  %v9745_v23 = vld [vmem:[#allocation74_spill] sm:$0xff] }
 0x577   : > { %v4796_v56 = vpop.f32.mrf.mxu1 }
 0x578   : > { %3841 = vst [vmem:[%s8872_s25 + $0x90] sm:$0xff] %v3809_v26  ;;  %v3812_v38 = vadd.f32 %v3780_v37, %v8705_v44  ;;  %v3779_v57 = vmul.f32 %v9730_v54, %v3477_v6  ;;  %v3492_v11 = vadd.f32 %v4796_v56, %v8852_v15  ;;  %v3758_v6 = vmul.f32 %v3726_v18, %v3694_v59 }
 0x579   : > { %v3486_v0 = vpop.f32.mrf.mxu1 }
 0x57a   : > { %3844 = vst [vmem:[%s8872_s25 + $0xa8] sm:$0xff] %v3812_v38  ;;  %v3811_v3 = vadd.f32 %v3779_v57, %v9731_v1  ;;  %v3782_v29 = vmul.f32 %v9732_v8, %v3492_v11  ;;  %v3487_v53 = vadd.f32 %v3486_v0, %v8852_v15 }
 0x57b   : > { %v4799_v63 = vpop.f32.mrf.mxu1 }
 0x57c   : > { %3843 = vst [vmem:[%s8872_s25 + $0xa0] sm:$0xff] %v3811_v3  ;;  %v3814_v17 = vadd.f32 %v3782_v29, %v9733_v39  ;;  %v3781_v44 = vmul.f32 %v9734_v49, %v3487_v53  ;;  %v3502_v33 = vadd.f32 %v4799_v63, %v8852_v15 }
 0x57d   : > { %v3496_v40 = vpop.f32.mrf.mxu1 }
 0x57e   : > { %3846 = vst [vmem:[%s8872_s25 + $0xb8] sm:$0xff] %v3814_v17  ;;  %v3813_v62 = vadd.f32 %v3781_v44, %v9735_v4  ;;  %v3784_v42 = vmul.f32 %v9736_v47, %v3502_v33  ;;  %v3497_v31 = vadd.f32 %v3496_v40, %v8852_v15 }
 0x57f   : > { %v4802_v21 = vpop.f32.mrf.mxu1 }
 0x580   : > { %3845 = vst [vmem:[%s8872_s25 + $0xb0] sm:$0xff] %v3813_v62  ;;  %v3816_v9 = vadd.f32 %v3784_v42, %v9737_v27  ;;  %v3783_v19 = vmul.f32 %v9738_v60, %v3497_v31  ;;  %v3512_v35 = vadd.f32 %v4802_v21, %v8852_v15 }
 0x581   : > { %v3506_v41 = vpop.f32.mrf.mxu1 }
 0x582   : > { %3848 = vst [vmem:[%s8872_s25 + $0xc8] sm:$0xff] %v3816_v9  ;;  %v3815_v2 = vadd.f32 %v3783_v19, %v9739_v20  ;;  %v3786_v12 = vmul.f32 %v8798_v51, %v3512_v35  ;;  %v3507_v30 = vadd.f32 %v3506_v41, %v8852_v15  ;;  %v9743_v51 = vld [vmem:[#allocation171_spill] sm:$0xff] }
 0x583   : > { %v4805_v50 = vpop.f32.mrf.mxu1 }
 0x584   : > { %3847 = vst [vmem:[%s8872_s25 + $0xc0] sm:$0xff] %v3815_v2  ;;  %v3818_v25 = vadd.f32 %v3786_v12, %v9741_v45  ;;  %v3785_v43 = vmul.f32 %v9742_v14, %v3507_v30  ;;  %v3522_v36 = vadd.f32 %v4805_v50, %v8852_v15 }
 0x585   : > { %v3516_v46 = vpop.f32.mrf.mxu1 }
 0x586   : > { %3850 = vst [vmem:[%s8872_s25 + $0xd8] sm:$0xff] %v3818_v25  ;;  %v3817_v34 = vadd.f32 %v3785_v43, %v9743_v51  ;;  %v3788_v58 = vmul.f32 %v8833_v16, %v3522_v36  ;;  %v3517_v5 = vadd.f32 %v3516_v46, %v8852_v15  ;;  %v9746_v16 = vld [vmem:[#allocation147_spill] sm:$0xff] }
 0x587   : > { %v4808_v55 = vpop.f32.mrf.mxu1 }
 0x588   : > { %3849 = vst [vmem:[%s8872_s25 + $0xd0] sm:$0xff] %v3817_v34  ;;  %v3820_v7 = vadd.f32 %v3788_v58, %v8840_v24  ;;  %v3787_v52 = vmul.f32 %v9745_v23, %v3517_v5  ;;  %v3532_v26 = vadd.f32 %v4808_v55, %v8852_v15 }
 0x589   : > { %v3526_v37 = vpop.f32.mrf.mxu1 }
 0x58a   : > { %3852 = vst [vmem:[%s8872_s25 + $0xe8] sm:$0xff] %v3820_v7  ;;  %v3819_v56 = vadd.f32 %v3787_v52, %v9746_v16  ;;  %v3790_v38 = vmul.f32 %v5387_v22, %v3532_v26  ;;  %v3527_v54 = vadd.f32 %v3526_v37, %v8852_v15 }
 0x58c   : > { %3851 = vst [vmem:[%s8872_s25 + $0xe0] sm:$0xff] %v3819_v56  ;;  %v3822_v24 = vadd.f32 %v3790_v38, %v3758_v6  ;;  %v3789_v57 = vmul.f32 %v8847_v10, %v3527_v54 }
 0x58e   : > { %3854 = vst [vmem:[%s8872_s25 + $0xf8] sm:$0xff] %v3822_v24  ;;  %v3821_v15 = vadd.f32 %v3789_v57, %v8856_v28 }
 0x590   : > { %3853 = vst [vmem:[%s8872_s25 + $0xf0] sm:$0xff] %v3821_v15 }
 0x591   : > { %5583 = shalt.err (!%p5580_p13)
}
 0x592   : > { %s5584_s19 = scalar_lea.hbm %s9004_s3, 4096  ;;  %s5588_s14 = scalar_lea.hbm %s9080_s8, 16384 }
 0x593   : > { %p5585_p11 = scmp.ne.s32.totalorder %s9004_s3, %s5584_s19  ;;  %p5589_p3 = scmp.lt.s32.totalorder %s9004_s3, %s9080_s8 }
 0x594   : > { %p5590_p7 = scmp.lt.s32.totalorder %s5588_s14, %s5584_s19 }
 0x595   : > { %p5586_p10 = pnand %p5585_p11, %p9747_p4 }
 0x596   : > { %p5591_p8 = por %p5590_p7, %p5589_p3 }
 0x597   : > { %p5587_p1 = pneg %p5586_p10 }
 0x599   : > { %p5592_p12 = pnand %p5591_p8, %p5587_p1 }
 0x59b   : > { %5595 = shalt.err (!%p5592_p12)
}
 0x59c   : > { %s5683_s28 = smov 128   ;;  %s5684_s18 = smov 8  }
 0x59d   : > { %4878 = dma.vmem_to_hbm [thread:$0]  (%p9747_p4), %s9006_s29, 4096, %s9004_s3, %s4050_s26, %s5683_s28, %s5683_s28, %s5684_s18  }
 0x59e   : > { %s4055_s22 = scalar_lea.sflag [#allocation18], %s5932_s0 }
 0x59f   : > { %s4083_s19 = scalar_lea.hbm %s9081_s9, %s4423_s16  ;;  %s4094_s23 = sshll.u32 %s8375_s20, 4  ;;  %s4095_s23 = int_to_ptr.vmem [resolvable:$true] %s4094_s23 }
 0x5a0   : > { %s5685_s15 = smov 4096   ;;  %s5686_s0 = smov 16384  }
 0x5a1   : > { %4879 = sst [smem:[#allocation22]] (%p9747_p4), %s5685_s15  ;;  %s5687_s13 = smov 32  }
 0x5a2   : > { %4880 = sst [smem:[#allocation22 + $0x1]] (%p9747_p4), %s5686_s0  ;;  %s5688_s29 = smov 128  }
 0x5a3   : > { %4881 = sst [smem:[#allocation22 + $0x2]] (%p9747_p4), %s5687_s13  ;;  %s5689_s3 = smov 8  }
 0x5a4   : > { %4882 = sst [smem:[#allocation22 + $0x3]] (%p9747_p4), %s5688_s29  ;;  %s5690_s16 = smov 131072  }
 0x5a5   : > { %4883 = sst [smem:[#allocation22 + $0x4]] (%p9747_p4), %s5688_s29  ;;  %s5691_s20 = smov 0  }
 0x5a6   : > { %4884 = sst [smem:[#allocation22 + $0x5]] (%p9747_p4), %s5689_s3 }
 0x5a7   : > { %4885 = dma.general (%p9747_p4), %s4095_s23, 12288, %s4083_s19, %s4055_s22, %s5690_s16, [#allocation22], %s5691_s20, 0  }
 0x5a8 PF: > { %s9748_s26 = sld [smem:[#allocation34_spill]]  ;;  %p4926_p6 = scmp.ge.s32.totalorder %s5658_s12, 2 }
 0x5a9   : > { %s4122_s14 = sand.u32 1, %s5646_s30  }
 0x5aa   : > { %s4123_s25 = scalar_lea.sflag [#allocation4], %s4122_s14 }
 0x5ae   : > { %p9749_p2 = scmp.ne.s32.totalorder %s9748_s26, 0 }
 0x5b0   : > { %p4908_p0 = pnand %p4926_p6, %p9749_p2 }
 0x5b2   : > { %p4909_p9 = pneg %p4908_p0 }
 0x5b4   : > { %5637 = dma.done.wait (%p4909_p9), %s4123_s25, 4096  }
 0x5b5   : > { %5639 = vsyncadd (%p4909_p9), %s4123_s25, 4294963200  ;;  %s4132_s17 = scalar_lea.sflag [#allocation18], %s4122_s14 }
 0x5b6   : > { %5641 = dma.done.wait (%p4909_p9), %s4132_s17, 12288  }
 0x5b7   : > { %5643 = vsyncadd (%p4909_p9), %s4132_s17, 4294955008  ;;  %s9750_s12 = sld [smem:[#allocation32_spill]]  ;;  %s9752_s30 = smov %s5650_s10 }
 0x5b8   : > { %s9751_s21 = sld [smem:[#allocation33_spill]]  ;;  %s9753_s10 = smov %s5654_s11 }
 0x5bd   : > { %p32_p4 = scmp.ge.s32.totalorder %s9750_s12, 6  }
 0x5be   : > { %s9754_s11 = smov %s9751_s21 }
 0x5bf   :  { %34 = sbr.rel (!%p32_p4) target bundleno = 15 (0xf), region = 163 }
 0x5c4   :  { %4137 = vsyncpa [#allocation3], 1 }
 0x5c5   :  { %4139 = vsyncpa [#allocation3 + $0x1], 1 }
 0x5c6   :  { %4140 = vsyncpa [#allocation6], 1 }
 0x5c7   :  { %4142 = vsyncpa [#allocation6 + $0x1], 1 }
 0x5c8   :  { %4143 = vsyncpa [#allocation9], 1 }
 0x5c9   :  { %4144 = vsyncpa [#allocation12], 1 }
 0x5ca   :  { %4145 = vsyncpa [#allocation15], 1 }
 0x5cb   :  { %4146 = vsyncpa [#allocation4], 1 }
 0x5cc   :  { %4148 = vsyncpa [#allocation4 + $0x1], 1 }
 0x5cd   :  { %4149 = vsyncpa [#allocation18], 1 }
 0x5ce   :  { %4151 = vsyncpa [#allocation18 + $0x1], 1 }

</bundles_post_ra>
